<compile_context>
chip_gen: v7x
topology: tpu7x:2x2x1
jax: 0.10.0
libtpu: 0.0.40
codegen_flags: <defaults>
</compile_context>

<pallas_src>
import jax
import jax.numpy as jnp
from jax.experimental import pallas as pl
from jax.experimental.pallas import tpu as pltpu


HIDDEN = 1000       # logical hidden width (matches the PyTorch module)
HIDDEN_PAD = 1024   # lane-aligned padded hidden width


def _round_up(n, m):
    return ((n + m - 1) // m) * m


def timenet_kernel(x_ref, w1_ref, b1_ref, w2_ref, b2_ref, w3_ref, b3_ref, o_ref):
    # fc1 + relu   (bf16 operands, f32 MXU accumulate; elementwise in f32)
    h1 = jnp.dot(x_ref[...], w1_ref[...], preferred_element_type=jnp.float32)
    h1 = jnp.maximum(h1 + b1_ref[...], 0.0)

    # fc2 + relu
    h2 = jnp.dot(h1.astype(jnp.bfloat16), w2_ref[...],
                 preferred_element_type=jnp.float32)
    h2 = jnp.maximum(h2 + b2_ref[...], 0.0)

    # fc3 (out_features == 1): VPU multiply + lane reduction instead of a
    # 1-column MXU matmul, then the final F.relu.
    w3_row = w3_ref[...].astype(jnp.float32)                   # (1, HIDDEN_PAD)
    h3 = jnp.sum(h2 * w3_row, axis=-1, keepdims=True) + b3_ref[...]
    o_ref[...] = jnp.maximum(h3, 0.0).astype(o_ref.dtype)


def time_network_forward(x, padded_params, *, tb=256):
    """x: (B, input_size) float32 -> (B, 1) float32.

    padded_params come from prepare_params(): bf16 weights / f32 biases,
    already padded to lane-aligned shapes.
    """
    w1, b1, w2, b2, w3, b3 = padded_params
    B, F = x.shape
    F_pad = w1.shape[0]
    H = w1.shape[1]

    # Batch tile: multiple of 8 sublanes; shrink for tiny batches.
    tb = min(tb, _round_up(B, 8))
    B_pad = _round_up(B, tb)

    # Pad batch + feature dims; cast activations to bf16 for the MXU.
    x_p = jnp.pad(x.astype(jnp.bfloat16), ((0, B_pad - B), (0, F_pad - F)))

    grid = (pl.cdiv(B_pad, tb),)

    out = pl.pallas_call(
        timenet_kernel,
        out_shape=jax.ShapeDtypeStruct((B_pad, 1), jnp.float32),
        grid=grid,
        in_specs=[
            pl.BlockSpec((tb, F_pad), lambda i: (i, 0)),   # x tile (pipelined)
            pl.BlockSpec((F_pad, H), lambda i: (0, 0)),    # w1 (VMEM-resident)
            pl.BlockSpec((1, H),     lambda i: (0, 0)),    # b1 (resident)
            pl.BlockSpec((H, H),     lambda i: (0, 0)),    # w2 (resident)
            pl.BlockSpec((1, H),     lambda i: (0, 0)),    # b2 (resident)
            pl.BlockSpec((1, H),     lambda i: (0, 0)),    # w3 row (resident)
            pl.BlockSpec((1, 1),     lambda i: (0, 0)),    # b3 (resident)
        ],
        out_specs=pl.BlockSpec((tb, 1), lambda i: (i, 0)),
        compiler_params=pltpu.CompilerParams(
            dimension_semantics=("parallel",),
        ),
    )(x_p, w1, b1, w2, b2, w3, b3)

    return out[:B]


def init_params(key, input_size):
    """Deterministic synthetic parameters at the logical PyTorch shapes.

    Weights are stored (in_features, out_features); this is the torch
    nn.Linear weight (out, in) transposed, so y = x @ W + b.
    """
    k1, k2, k3, k4, k5, k6 = jax.random.split(key, 6)
    w1 = jax.random.normal(k1, (input_size, HIDDEN), jnp.float32) * 0.05
    b1 = jax.random.normal(k2, (1, HIDDEN), jnp.float32) * 0.05
    w2 = jax.random.normal(k3, (HIDDEN, HIDDEN), jnp.float32) * 0.02
    b2 = jax.random.normal(k4, (1, HIDDEN), jnp.float32) * 0.02
    w3 = jax.random.normal(k5, (HIDDEN, 1), jnp.float32) * 0.05
    b3 = jax.random.normal(k6, (1, 1), jnp.float32) * 0.05
    return (w1, b1, w2, b2, w3, b3)


def prepare_params(logical_params, input_size):
    """Pad to lane-aligned shapes and cast matmul operands to bf16."""
    w1, b1, w2, b2, w3, b3 = logical_params
    F_pad = _round_up(input_size, 128)

    w1p = jnp.zeros((F_pad, HIDDEN_PAD), jnp.bfloat16)
    w1p = w1p.at[:input_size, :HIDDEN].set(w1.astype(jnp.bfloat16))
    b1p = jnp.zeros((1, HIDDEN_PAD), jnp.float32).at[:, :HIDDEN].set(b1)

    w2p = jnp.zeros((HIDDEN_PAD, HIDDEN_PAD), jnp.bfloat16)
    w2p = w2p.at[:HIDDEN, :HIDDEN].set(w2.astype(jnp.bfloat16))
    b2p = jnp.zeros((1, HIDDEN_PAD), jnp.float32).at[:, :HIDDEN].set(b2)

    w3p = jnp.zeros((1, HIDDEN_PAD), jnp.bfloat16)
    w3p = w3p.at[:, :HIDDEN].set(w3.reshape(1, HIDDEN).astype(jnp.bfloat16))
    b3p = b3.reshape(1, 1).astype(jnp.float32)

    return (w1p, b1p, w2p, b2p, w3p, b3p)


def reference_forward(x, logical_params):
    """Pure-JAX reference mirroring the kernel's bf16-operand numerics."""
    w1, b1, w2, b2, w3, b3 = logical_params
    xb = x.astype(jnp.bfloat16)
    h = jnp.dot(xb, w1.astype(jnp.bfloat16),
                preferred_element_type=jnp.float32) + b1
    h = jnp.maximum(h, 0.0)
    h = jnp.dot(h.astype(jnp.bfloat16), w2.astype(jnp.bfloat16),
                preferred_element_type=jnp.float32) + b2
    h = jnp.maximum(h, 0.0)
    # Match the kernel's fc3: f32 elementwise multiply + lane reduction.
    w3f = w3.astype(jnp.bfloat16).astype(jnp.float32).reshape(1, HIDDEN)
    h = jnp.sum(h * w3f, axis=-1, keepdims=True) + b3.reshape(1, 1)
    return jnp.maximum(h, 0.0)


def _check(x, logical_params, padded_params, **kw):
    out = jax.block_until_ready(time_network_forward(x, padded_params, **kw))
    ref = reference_forward(x, logical_params)
    assert out.shape == (x.shape[0], 1), out.shape
    assert jnp.allclose(out, ref, atol=2e-3, rtol=2e-3), (
        "Pallas output mismatch vs reference"
    )
    return out


if __name__ == "__main__":
    key = jax.random.PRNGKey(0)
    kx, kx2, kp = jax.random.split(key, 3)

    input_size = 32
    logical_params = init_params(kp, input_size)
    padded_params = prepare_params(logical_params, input_size)

    # Small single-tile case.
    x = jax.random.normal(kx, (8, input_size), jnp.float32)
    _check(x, logical_params, padded_params)

    # Ragged multi-tile case (exercises batch padding + the pipelined grid).
    x2 = jax.random.normal(kx2, (40, input_size), jnp.float32)
    _check(x2, logical_params, padded_params, tb=16)

    print("KERNEL_OK")
</pallas_src>

<mosaic_0001>
module attributes {stable_mosaic.version = 11 : i64} {
  func.func @timenet_kernel(%arg0: i32, %arg1: memref<8x128xbf16, #tpu.memory_space<vmem>>, %arg2: memref<128x1024xbf16, #tpu.memory_space<vmem>>, %arg3: memref<1x1024xf32, #tpu.memory_space<vmem>>, %arg4: memref<1024x1024xbf16, #tpu.memory_space<vmem>>, %arg5: memref<1x1024xf32, #tpu.memory_space<vmem>>, %arg6: memref<1x1024xbf16, #tpu.memory_space<vmem>>, %arg7: memref<1x1xf32, #tpu.memory_space<vmem>>, %arg8: memref<8x1xf32, #tpu.memory_space<vmem>>) attributes {dimension_semantics = [#tpu.dimension_semantics<parallel>], iteration_bounds = array<i64: 1>, scalar_prefetch = 0 : i64, scratch_operands = 0 : i64, tpu.core_type = #tpu.core_type<tc>, window_params = [{transform_indices = @transform_0, window_bounds = array<i64: 8, 128>}, {pipeline_mode = #tpu.pipeline_mode<synchronous>, transform_indices = @transform_1, window_bounds = array<i64: 128, 1024>}, {pipeline_mode = #tpu.pipeline_mode<synchronous>, transform_indices = @transform_2, window_bounds = array<i64: 1, 1024>}, {pipeline_mode = #tpu.pipeline_mode<synchronous>, transform_indices = @transform_3, window_bounds = array<i64: 1024, 1024>}, {pipeline_mode = #tpu.pipeline_mode<synchronous>, transform_indices = @transform_4, window_bounds = array<i64: 1, 1024>}, {pipeline_mode = #tpu.pipeline_mode<synchronous>, transform_indices = @transform_5, window_bounds = array<i64: 1, 1024>}, {pipeline_mode = #tpu.pipeline_mode<synchronous>, transform_indices = @transform_6, window_bounds = array<i64: 1, 1>}, {transform_indices = @transform_7, window_bounds = array<i64: 8, 1>}]} {
    %c0 = arith.constant 0 : index
    %c0_0 = arith.constant 0 : index
    %0 = vector.load %arg1[%c0, %c0_0] : memref<8x128xbf16, #tpu.memory_space<vmem>>, vector<8x128xbf16>
    %c0_1 = arith.constant 0 : index
    %c0_2 = arith.constant 0 : index
    %1 = vector.load %arg2[%c0_1, %c0_2] : memref<128x1024xbf16, #tpu.memory_space<vmem>>, vector<128x1024xbf16>
    %cst = arith.constant dense<0.000000e+00> : vector<8x1024xf32>
    %2 = tpu.matmul %0, %1, %cst {dimension_numbers = #tpu.dot_dimension_numbers<[1], [0], [0], [1], [0, 0, 1, 1], [], []>} : vector<8x128xbf16>, vector<128x1024xbf16>, vector<8x1024xf32> -> vector<8x1024xf32>
    %c0_3 = arith.constant 0 : index
    %c0_4 = arith.constant 0 : index
    %3 = vector.load %arg3[%c0_3, %c0_4] : memref<1x1024xf32, #tpu.memory_space<vmem>>, vector<1x1024xf32>
    %4 = vector.broadcast %3 : vector<1x1024xf32> to vector<8x1024xf32>
    %5 = arith.addf %2, %4 : vector<8x1024xf32>
    %cst_5 = arith.constant 0.000000e+00 : f32
    %6 = vector.broadcast %cst_5 : f32 to vector<8x1024xf32>
    %7 = arith.maximumf %5, %6 : vector<8x1024xf32>
    %8 = arith.truncf %7 : vector<8x1024xf32> to vector<8x1024xbf16>
    %c0_6 = arith.constant 0 : index
    %c0_7 = arith.constant 0 : index
    %9 = vector.load %arg4[%c0_6, %c0_7] : memref<1024x1024xbf16, #tpu.memory_space<vmem>>, vector<1024x1024xbf16>
    %cst_8 = arith.constant dense<0.000000e+00> : vector<8x1024xf32>
    %10 = tpu.matmul %8, %9, %cst_8 {dimension_numbers = #tpu.dot_dimension_numbers<[1], [0], [0], [1], [0, 0, 1, 1], [], []>} : vector<8x1024xbf16>, vector<1024x1024xbf16>, vector<8x1024xf32> -> vector<8x1024xf32>
    %c0_9 = arith.constant 0 : index
    %c0_10 = arith.constant 0 : index
    %11 = vector.load %arg5[%c0_9, %c0_10] : memref<1x1024xf32, #tpu.memory_space<vmem>>, vector<1x1024xf32>
    %12 = vector.broadcast %11 : vector<1x1024xf32> to vector<8x1024xf32>
    %13 = arith.addf %10, %12 : vector<8x1024xf32>
    %cst_11 = arith.constant 0.000000e+00 : f32
    %14 = vector.broadcast %cst_11 : f32 to vector<8x1024xf32>
    %15 = arith.maximumf %13, %14 : vector<8x1024xf32>
    %c0_12 = arith.constant 0 : index
    %c0_13 = arith.constant 0 : index
    %16 = vector.load %arg6[%c0_12, %c0_13] : memref<1x1024xbf16, #tpu.memory_space<vmem>>, vector<1x1024xbf16>
    %17 = arith.extf %16 : vector<1x1024xbf16> to vector<1x1024xf32>
    %18 = vector.broadcast %17 : vector<1x1024xf32> to vector<8x1024xf32>
    %19 = arith.mulf %15, %18 : vector<8x1024xf32>
    %cst_14 = arith.constant dense<0.000000e+00> : vector<8xf32>
    %20 = vector.multi_reduction <add>, %19, %cst_14 [1] : vector<8x1024xf32> to vector<8xf32>
    %21 = vector.shape_cast %20 : vector<8xf32> to vector<8x1xf32>
    %c0_15 = arith.constant 0 : index
    %c0_16 = arith.constant 0 : index
    %22 = vector.load %arg7[%c0_15, %c0_16] : memref<1x1xf32, #tpu.memory_space<vmem>>, vector<1x1xf32>
    %23 = vector.broadcast %22 : vector<1x1xf32> to vector<8x1xf32>
    %24 = arith.addf %21, %23 : vector<8x1xf32>
    %cst_17 = arith.constant 0.000000e+00 : f32
    %25 = vector.broadcast %cst_17 : f32 to vector<8x1xf32>
    %26 = arith.maximumf %24, %25 : vector<8x1xf32>
    %c0_18 = arith.constant 0 : index
    %c0_19 = arith.constant 0 : index
    %27 = vector.load %arg8[%c0_18, %c0_19] : memref<8x1xf32, #tpu.memory_space<vmem>>, vector<8x1xf32>
    tpu.vector_store %arg8[%c0_18, %c0_19], %26 {strides = array<i32>} : memref<8x1xf32, #tpu.memory_space<vmem>>, vector<8x1xf32>,
    return
  }
  func.func @transform_0(%arg0: i32) -> (i32, i32) {
    %c0_i32 = arith.constant 0 : i32
    %c0_i32_0 = arith.constant 0 : i32
    return %arg0, %c0_i32 : i32, i32
  }
  func.func @transform_1(%arg0: i32) -> (i32, i32) {
    %c0_i32 = arith.constant 0 : i32
    %c0_i32_0 = arith.constant 0 : i32
    %c0_i32_1 = arith.constant 0 : i32
    return %c0_i32, %c0_i32_0 : i32, i32
  }
  func.func @transform_2(%arg0: i32) -> (i32, i32) {
    %c0_i32 = arith.constant 0 : i32
    %c0_i32_0 = arith.constant 0 : i32
    %c0_i32_1 = arith.constant 0 : i32
    return %c0_i32, %c0_i32_0 : i32, i32
  }
  func.func @transform_3(%arg0: i32) -> (i32, i32) {
    %c0_i32 = arith.constant 0 : i32
    %c0_i32_0 = arith.constant 0 : i32
    %c0_i32_1 = arith.constant 0 : i32
    return %c0_i32, %c0_i32_0 : i32, i32
  }
  func.func @transform_4(%arg0: i32) -> (i32, i32) {
    %c0_i32 = arith.constant 0 : i32
    %c0_i32_0 = arith.constant 0 : i32
    %c0_i32_1 = arith.constant 0 : i32
    return %c0_i32, %c0_i32_0 : i32, i32
  }
  func.func @transform_5(%arg0: i32) -> (i32, i32) {
    %c0_i32 = arith.constant 0 : i32
    %c0_i32_0 = arith.constant 0 : i32
    %c0_i32_1 = arith.constant 0 : i32
    return %c0_i32, %c0_i32_0 : i32, i32
  }
  func.func @transform_6(%arg0: i32) -> (i32, i32) {
    %c0_i32 = arith.constant 0 : i32
    %c0_i32_0 = arith.constant 0 : i32
    %c0_i32_1 = arith.constant 0 : i32
    return %c0_i32, %c0_i32_0 : i32, i32
  }
  func.func @transform_7(%arg0: i32) -> (i32, i32) {
    %c0_i32 = arith.constant 0 : i32
    %c0_i32_0 = arith.constant 0 : i32
    return %arg0, %c0_i32 : i32, i32
  }
}

</mosaic_0001>

<bundles_post_ra>
// kernel: tpu_custom_call.1
= control target key start
LH: loop header
LB: loop body
LE: loop exit
PB: predicated region body
PF: predicated region fallthrough
CT: control target
= control target key end

     0   :  { %s5674_s0 = inlined_call_operand.hbm [shape: bf16[8,128], index: 0, kind: input, shape index: {}]   ;;  %s5675_s1 = inlined_call_operand.hbm [shape: bf16[128,1024], index: 1, kind: input, shape index: {}]   ;;  %s5676_s2 = inlined_call_operand.hbm [shape: f32[1,1024], index: 2, kind: input, shape index: {}]   ;;  %s5677_s3 = inlined_call_operand.hbm [shape: bf16[1024,1024], index: 3, kind: input, shape index: {}]   ;;  %s5678_s4 = inlined_call_operand.hbm [shape: f32[1,1024], index: 4, kind: input, shape index: {}]   ;;  %s5679_s5 = inlined_call_operand.hbm [shape: bf16[1,1024], index: 5, kind: input, shape index: {}]   ;;  %s5680_s6 = inlined_call_operand.<no memory space> [shape: f32[1,1], index: 6, kind: input, shape index: {}]   ;;  %s5681_s7 = inlined_call_operand.vmem [shape: f32[8,1], index: 7, kind: output, shape index: {}]  }
   0x1   :  { %v12_v0 = vstv %s5680_s6 }
   0x2   :  { %13 = vst [vmem:[#allocation2] sm:$0x1] %v12_v0 }
   0x3   :  { %14 = vsyncpa [#allocation4], 0 }
   0x4   :  { %15 = vsyncpa [#allocation6], 0 }
   0x5   :  { %16 = vsyncpa [#allocation9], 0 }
   0x6   :  { %17 = vsyncpa [#allocation12], 0  ;;  %s5384_s26 = smov [#allocation5]   ;;  %s5244_s30 = scalar_lea.hbm %s5675_s1, 8192 }
   0x7   :  { %s33_s27 = sshll.u32 %s5384_s26, 4  ;;  %p5245_p0 = scmp.ne.s32.totalorder %s5675_s1, %s5244_s30  ;;  %s34_s27 = int_to_ptr.vmem [resolvable:$true] %s33_s27 }
   0x8   :  { %p5248_p1 = scmp.lt.u32.totalorder %s5244_s30, %s5675_s1 }
   0xa   :  { %p5250_p2 = pnand %p5248_p1, %p5245_p0 }
   0xc   :  { %5253 = shalt.err (!%p5250_p2)
}
   0xd   :  { %s5254_s6 = scalar_lea.vmem %s34_s27, 8192  ;;  %p5259_p4 = scmp.lt.s32.totalorder %s34_s27, %s34_s27 }
   0xe   :  { %p5255_p3 = scmp.ne.s32.totalorder %s34_s27, %s5254_s6  ;;  %p5260_p5 = scmp.lt.s32.totalorder %s5254_s6, %s5254_s6 }
  0x10   :  { %p5261_p6 = por %p5260_p5, %p5259_p4 }
  0x12   :  { %p5262_p7 = pnand %p5261_p6, %p5255_p3 }
  0x14   :  { %5265 = shalt.err (!%p5262_p7)
}
  0x15   :  { %s5385_s12 = smov 512   ;;  %s5386_s13 = smov 32  }
  0x16   :  { %39 = dma.hbm_to_vmem [thread:$0]  %s5675_s1, 8192, %s34_s27, [#allocation6], %s5385_s12, %s5385_s12, %s5386_s13  }
  0x17   :  { %s5387_s16 = smov [#allocation8]   ;;  %s5388_s18 = smov [#allocation3]  }
  0x18   :  { %s55_s17 = sshll.u32 %s5387_s16, 4  ;;  %s24_s19 = sshll.u32 %s5388_s18, 4  ;;  %s56_s17 = int_to_ptr.vmem [resolvable:$true] %s55_s17  ;;  %s25_s19 = int_to_ptr.vmem [resolvable:$true] %s24_s19 }
  0x19   :  { %s5266_s22 = scalar_lea.hbm %s5677_s3, 65536 }
  0x1a   :  { %p5267_p8 = scmp.ne.s32.totalorder %s5677_s3, %s5266_s22  ;;  %p5270_p9 = scmp.lt.u32.totalorder %s5266_s22, %s5677_s3 }
  0x1c   :  { %p5272_p10 = pnand %p5270_p9, %p5267_p8 }
  0x1e   :  { %5275 = shalt.err (!%p5272_p10)
}
  0x1f   :  { %s5276_s1 = scalar_lea.vmem %s56_s17, 65536  ;;  %p5281_p12 = scmp.lt.s32.totalorder %s56_s17, %s56_s17 }
  0x20   :  { %p5277_p11 = scmp.ne.s32.totalorder %s56_s17, %s5276_s1  ;;  %p5282_p13 = scmp.lt.s32.totalorder %s5276_s1, %s5276_s1 }
  0x22   :  { %p5283_p0 = por %p5282_p13, %p5281_p12 }
  0x24   :  { %p5284_p1 = pnand %p5283_p0, %p5277_p11 }
  0x26   :  { %5287 = shalt.err (!%p5284_p1)
}
  0x27   :  { %61 = dma.hbm_to_vmem [thread:$0]  %s5677_s3, 65536, %s56_s17, [#allocation9], %s5385_s12, %s5385_s12, %s5386_s13  }
  0x28   :  { %s5288_s8 = scalar_lea.hbm %s5674_s0, 64 }
  0x29   :  { %p5289_p2 = scmp.ne.s32.totalorder %s5674_s0, %s5288_s8  ;;  %p5292_p3 = scmp.lt.u32.totalorder %s5288_s8, %s5674_s0 }
  0x2b   :  { %p5294_p4 = pnand %p5292_p3, %p5289_p2 }
  0x2d   :  { %5297 = shalt.err (!%p5294_p4)
}
  0x2e   :  { %s5298_s14 = scalar_lea.vmem %s25_s19, 64  ;;  %p5303_p6 = scmp.lt.s32.totalorder %s25_s19, %s25_s19 }
  0x2f   :  { %p5299_p5 = scmp.ne.s32.totalorder %s25_s19, %s5298_s14  ;;  %p5304_p7 = scmp.lt.s32.totalorder %s5298_s14, %s5298_s14 }
  0x31   :  { %p5305_p8 = por %p5304_p7, %p5303_p6 }
  0x33   :  { %p5306_p9 = pnand %p5305_p8, %p5299_p5 }
  0x35   :  { %5309 = shalt.err (!%p5306_p9)
}
  0x36   :  { %27 = dma.hbm_to_vmem [thread:$0]  %s5674_s0, 64, %s25_s19, [#allocation4]  }
  0x37   :  { %s5389_s13 = smov [#allocation7]   ;;  %s5390_s16 = smov [#allocation10]  }
  0x38   :  { %s46_s15 = sshll.u32 %s5389_s13, 4  ;;  %s68_s17 = sshll.u32 %s5390_s16, 4  ;;  %s47_s15 = int_to_ptr.vmem [resolvable:$true] %s46_s15  ;;  %s69_s17 = int_to_ptr.vmem [resolvable:$true] %s68_s17 }
  0x39   :  { %s5310_s21 = scalar_lea.hbm %s5676_s2, 128 }
  0x3a   :  { %p5311_p10 = scmp.ne.s32.totalorder %s5676_s2, %s5310_s21  ;;  %p5314_p11 = scmp.lt.u32.totalorder %s5310_s21, %s5676_s2 }
  0x3c   :  { %p5316_p12 = pnand %p5314_p11, %p5311_p10 }
  0x3e   :  { %5319 = shalt.err (!%p5316_p12)
}
  0x3f   :  { %s5320_s0 = scalar_lea.vmem %s47_s15, 128  ;;  %p5325_p0 = scmp.lt.s32.totalorder %s47_s15, %s47_s15 }
  0x40   :  { %p5321_p13 = scmp.ne.s32.totalorder %s47_s15, %s5320_s0  ;;  %p5326_p1 = scmp.lt.s32.totalorder %s5320_s0, %s5320_s0 }
  0x42   :  { %p5327_p2 = por %p5326_p1, %p5325_p0 }
  0x44   :  { %p5328_p3 = pnand %p5327_p2, %p5321_p13 }
  0x46   :  { %5331 = shalt.err (!%p5328_p3)
}
  0x47   :  { %49 = dma.hbm_to_vmem [thread:$0]  %s5676_s2, 128, %s47_s15, [#allocation6]  }
  0x48   :  { %s5332_s28 = scalar_lea.hbm %s5678_s4, 128 }
  0x49   :  { %p5333_p4 = scmp.ne.s32.totalorder %s5678_s4, %s5332_s28  ;;  %p5336_p5 = scmp.lt.u32.totalorder %s5332_s28, %s5678_s4 }
  0x4b   :  { %p5338_p6 = pnand %p5336_p5, %p5333_p4 }
  0x4d   :  { %5341 = shalt.err (!%p5338_p6)
}
  0x4e   :  { %s5342_s10 = scalar_lea.vmem %s69_s17, 128  ;;  %p5347_p8 = scmp.lt.s32.totalorder %s69_s17, %s69_s17 }
  0x4f   :  { %p5343_p7 = scmp.ne.s32.totalorder %s69_s17, %s5342_s10  ;;  %p5348_p9 = scmp.lt.s32.totalorder %s5342_s10, %s5342_s10 }
  0x51   :  { %p5349_p10 = por %p5348_p9, %p5347_p8 }
  0x53   :  { %p5350_p11 = pnand %p5349_p10, %p5343_p7 }
  0x55   :  { %5353 = shalt.err (!%p5350_p11)
}
  0x56   :  { %71 = dma.hbm_to_vmem [thread:$0]  %s5678_s4, 128, %s69_s17, [#allocation9]  }
  0x57   :  { %s5391_s6 = smov [#allocation11]   ;;  %s5354_s13 = scalar_lea.hbm %s5679_s5, 128 }
  0x58   :  { %s78_s14 = sshll.u32 %s5391_s6, 4  ;;  %p5355_p12 = scmp.ne.s32.totalorder %s5679_s5, %s5354_s13  ;;  %s79_s14 = int_to_ptr.vmem [resolvable:$true] %s78_s14 }
  0x59   :  { %p5358_p13 = scmp.lt.u32.totalorder %s5354_s13, %s5679_s5 }
  0x5b   :  { %p5360_p0 = pnand %p5358_p13, %p5355_p12 }
  0x5d   :  { %5363 = shalt.err (!%p5360_p0)
}
  0x5e   :  { %s5364_s21 = scalar_lea.vmem %s79_s14, 128  ;;  %p5369_p2 = scmp.lt.s32.totalorder %s79_s14, %s79_s14 }
  0x5f   :  { %p5365_p1 = scmp.ne.s32.totalorder %s79_s14, %s5364_s21  ;;  %p5370_p3 = scmp.lt.s32.totalorder %s5364_s21, %s5364_s21 }
  0x61   :  { %p5371_p4 = por %p5370_p3, %p5369_p2 }
  0x63   :  { %p5372_p5 = pnand %p5371_p4, %p5365_p1 }
  0x65   :  { %5375 = shalt.err (!%p5372_p5)
}
  0x66   :  { %81 = dma.hbm_to_vmem [thread:$0]  %s5679_s5, 128, %s79_s14, [#allocation12]  }
  0x67   :  { %5376 = dma.done.wait [#allocation4], 64  }
  0x68   :  { %5377 = vsyncadd [#allocation4], 4294967232 }
  0x69   :  { %5378 = dma.done.wait [#allocation6], 8320  }
  0x6a   :  { %5379 = vsyncadd [#allocation6], 4294958976 }
  0x6b   :  { %5380 = dma.done.wait [#allocation9], 65664  }
  0x6c   :  { %5381 = vsyncadd [#allocation9], 4294901632 }
  0x6d   :  { %5382 = dma.done.wait [#allocation12], 128  }
  0x6e   :  { %5383 = vsyncadd [#allocation12], 4294967168  ;;  %v5392_v1 = vmov 0   ;;  %v104_v2 = vld [vmem:[#allocation5] sm:$0xff]  ;;  %v105_v15 = vld [vmem:[#allocation5 + $0x8] sm:$0xff]  ;;  %vm4591_vm0 = vcmask 7168  }
  0x6f   :  { %562 = vmatprep.mubr.bf16.mxu0 %v5392_v1  ;;  %603 = vmatprep.mubr.bf16.mxu1 %v5392_v1  ;;  %v108_v3 = vld [vmem:[#allocation5 + $0x20] sm:$0xff]  ;;  %v109_v16 = vld [vmem:[#allocation5 + $0x28] sm:$0xff]  ;;  %v106_v59 = vld [vmem:[#allocation5 + $0x10] sm:$0xff] }
  0x70   :  { %v112_v4 = vld [vmem:[#allocation5 + $0x40] sm:$0xff]  ;;  %v4602_v5 = vcombine.high %v104_v2, %v108_v3  ;;  %v4601_v6 = vcombine.low %v104_v2, %v108_v3  ;;  %v113_v17 = vld [vmem:[#allocation5 + $0x48] sm:$0xff]  ;;  %v4604_v19 = vcombine.high %v105_v15, %v109_v16  ;;  %v4603_v20 = vcombine.low %v105_v15, %v109_v16  ;;  %v110_v60 = vld [vmem:[#allocation5 + $0x30] sm:$0xff] }
  0x71   :  { %v116_v7 = vld [vmem:[#allocation5 + $0x60] sm:$0xff]  ;;  %v117_v18 = vld [vmem:[#allocation5 + $0x68] sm:$0xff]  ;;  %v4606_v2 = vcombine.high %v106_v59, %v110_v60 }
  0x72   :  { %v4610_v8 = vcombine.high %v112_v4, %v116_v7  ;;  %v120_v9 = vld [vmem:[#allocation5 + $0x80] sm:$0xff]  ;;  %530 = vmatprep.subr.bf16.mxu0 %v4602_v5  ;;  %v4609_v11 = vcombine.low %v112_v4, %v116_v7  ;;  %v4612_v21 = vcombine.high %v113_v17, %v117_v18  ;;  %v121_v23 = vld [vmem:[#allocation5 + $0x88] sm:$0xff]  ;;  %571 = vmatprep.subr.bf16.mxu1 %v4604_v19  ;;  %v114_v4 = vld [vmem:[#allocation5 + $0x50] sm:$0xff] }
  0x73   :  { %v124_v10 = vld [vmem:[#allocation5 + $0xa0] sm:$0xff]  ;;  %531 = vmatpush1.bf16.msra.mxu0 %v4601_v6  ;;  %v125_v24 = vld [vmem:[#allocation5 + $0xa8] sm:$0xff]  ;;  %572 = vmatpush1.bf16.msra.mxu1 %v4603_v20  ;;  %v4611_v28 = vcombine.low %v113_v17, %v117_v18  ;;  %v118_v5 = vld [vmem:[#allocation5 + $0x70] sm:$0xff] }
  0x74   :  { %532 = vmatprep.subr.bf16.mxu0 %v4610_v8  ;;  %v4618_v12 = vcombine.high %v120_v9, %v124_v10  ;;  %v128_v13 = vld [vmem:[#allocation5 + $0xc0] sm:$0xff]  ;;  %v4617_v22 = vcombine.low %v120_v9, %v124_v10  ;;  %573 = vmatprep.subr.bf16.mxu1 %v4612_v21  ;;  %v4620_v29 = vcombine.high %v121_v23, %v125_v24  ;;  %v129_v31 = vld [vmem:[#allocation5 + $0xc8] sm:$0xff]  ;;  %v5510_v7 = vld [vmem:[#allocation3] sm:$0xf] }
  0x75   :  { %v132_v14 = vld [vmem:[#allocation5 + $0xe0] sm:$0xff]  ;;  %v133_v32 = vld [vmem:[#allocation5 + $0xe8] sm:$0xff]  ;;  %v4619_v36 = vcombine.low %v121_v23, %v125_v24  ;;  %v4605_v8 = vcombine.low %v106_v59, %v110_v60  ;;  %v107_v9 = vld [vmem:[#allocation5 + $0x18] sm:$0xff]  ;;  %v4613_v16 = vcombine.low %v114_v4, %v118_v5 }
  0x76   :  { %v4626_v25 = vcombine.high %v128_v13, %v132_v14  ;;  %v136_v26 = vld [vmem:[#allocation5 + $0x100] sm:$0xff]  ;;  %v4625_v30 = vcombine.low %v128_v13, %v132_v14  ;;  %v4628_v37 = vcombine.high %v129_v31, %v133_v32  ;;  %v137_v39 = vld [vmem:[#allocation5 + $0x108] sm:$0xff]  ;;  %v4627_v44 = vcombine.low %v129_v31, %v133_v32  ;;  %v111_v10 = vld [vmem:[#allocation5 + $0x38] sm:$0xff] }
  0x77   :  { %533 = vmatpush1.bf16.msra.mxu0 %v4609_v11  ;;  %v140_v27 = vld [vmem:[#allocation5 + $0x120] sm:$0xff]  ;;  %574 = vmatpush1.bf16.msra.mxu1 %v4611_v28  ;;  %v141_v40 = vld [vmem:[#allocation5 + $0x128] sm:$0xff]  ;;  %v4614_v11 = vcombine.high %v114_v4, %v118_v5  ;;  %v122_v13 = vld [vmem:[#allocation5 + $0x90] sm:$0xff]  ;;  %v4608_v15 = vcombine.high %v107_v9, %v111_v10 }
  0x78   :  { %534 = vmatprep.subr.bf16.mxu0 %v4618_v12  ;;  %v4634_v33 = vcombine.high %v136_v26, %v140_v27  ;;  %v144_v34 = vld [vmem:[#allocation5 + $0x140] sm:$0xff]  ;;  %575 = vmatprep.subr.bf16.mxu1 %v4620_v29  ;;  %v4633_v38 = vcombine.low %v136_v26, %v140_v27  ;;  %v4636_v45 = vcombine.high %v137_v39, %v141_v40  ;;  %v145_v47 = vld [vmem:[#allocation5 + $0x148] sm:$0xff]  ;;  %v126_v14 = vld [vmem:[#allocation5 + $0xb0] sm:$0xff] }
  0x79   :  { %v148_v35 = vld [vmem:[#allocation5 + $0x160] sm:$0xff]  ;;  %v149_v48 = vld [vmem:[#allocation5 + $0x168] sm:$0xff]  ;;  %v4635_v52 = vcombine.low %v137_v39, %v141_v40  ;;  %v115_v17 = vld [vmem:[#allocation5 + $0x58] sm:$0xff]  ;;  %v4622_v19 = vcombine.high %v122_v13, %v126_v14  ;;  %v4621_v24 = vcombine.low %v122_v13, %v126_v14 }
  0x7a   :  { %v4642_v41 = vcombine.high %v144_v34, %v148_v35  ;;  %v152_v42 = vld [vmem:[#allocation5 + $0x180] sm:$0xff]  ;;  %v4641_v46 = vcombine.low %v144_v34, %v148_v35  ;;  %v4644_v53 = vcombine.high %v145_v47, %v149_v48  ;;  %v153_v55 = vld [vmem:[#allocation5 + $0x188] sm:$0xff]  ;;  %v4643_v58 = vcombine.low %v145_v47, %v149_v48  ;;  %v119_v18 = vld [vmem:[#allocation5 + $0x78] sm:$0xff] }
  0x7b   :  { %535 = vmatpush1.bf16.msra.mxu0 %v4617_v22  ;;  %v156_v43 = vld [vmem:[#allocation5 + $0x1a0] sm:$0xff]  ;;  %576 = vmatpush1.bf16.msra.mxu1 %v4619_v36  ;;  %v157_v56 = vld [vmem:[#allocation5 + $0x1a8] sm:$0xff]  ;;  %v130_v20 = vld [vmem:[#allocation5 + $0xd0] sm:$0xff]  ;;  %v4607_v22 = vcombine.low %v107_v9, %v111_v10  ;;  %v4616_v23 = vcombine.high %v115_v17, %v119_v18 }
  0x7c   :  { %536 = vmatprep.subr.bf16.mxu0 %v4626_v25  ;;  %577 = vmatprep.subr.bf16.mxu1 %v4628_v37  ;;  %v4650_v49 = vcombine.high %v152_v42, %v156_v43  ;;  %v160_v50 = vld [vmem:[#allocation5 + $0x1c0] sm:$0xff]  ;;  %v4649_v54 = vcombine.low %v152_v42, %v156_v43  ;;  %v4652_v61 = vcombine.high %v153_v55, %v157_v56  ;;  %v161_v63 = vld [vmem:[#allocation5 + $0x1c8] sm:$0xff]  ;;  %v134_v21 = vld [vmem:[#allocation5 + $0xf0] sm:$0xff] }
  0x7d   :  { %v164_v51 = vld [vmem:[#allocation5 + $0x1e0] sm:$0xff]  ;;  %v165_v0 = vld [vmem:[#allocation5 + $0x1e8] sm:$0xff]  ;;  %v4651_v3 = vcombine.low %v153_v55, %v157_v56  ;;  %v123_v25 = vld [vmem:[#allocation5 + $0x98] sm:$0xff]  ;;  %v4630_v27 = vcombine.high %v130_v20, %v134_v21  ;;  %v4629_v32 = vcombine.low %v130_v20, %v134_v21 }
  0x7e   :  { %v4658_v57 = vcombine.high %v160_v50, %v164_v51  ;;  %v4657_v62 = vcombine.low %v160_v50, %v164_v51  ;;  %v4660_v6 = vcombine.high %v161_v63, %v165_v0  ;;  %v4659_v12 = vcombine.low %v161_v63, %v165_v0  ;;  %v127_v26 = vld [vmem:[#allocation5 + $0xb8] sm:$0xff]  ;;  %v138_v28 = vld [vmem:[#allocation5 + $0x110] sm:$0xff]  ;;  %v710_v60 = vld [vmem:[#allocation8] sm:$0xff] }
  0x7f   :  { %537 = vmatpush1.bf16.msra.mxu0 %v4625_v30  ;;  %578 = vmatpush1.bf16.msra.mxu1 %v4627_v44  ;;  %v142_v29 = vld [vmem:[#allocation5 + $0x130] sm:$0xff]  ;;  %v4615_v30 = vcombine.low %v115_v17, %v119_v18  ;;  %v4624_v31 = vcombine.high %v123_v25, %v127_v26  ;;  %v135_v34 = vld [vmem:[#allocation5 + $0xf8] sm:$0xff]  ;;  %v718_v5 = vld [vmem:[#allocation8 + $0x40] sm:$0xff] }
  0x80   :  { %538 = vmatprep.subr.bf16.mxu0 %v4634_v33  ;;  %579 = vmatprep.subr.bf16.mxu1 %v4636_v45  ;;  %v131_v33 = vld [vmem:[#allocation5 + $0xd8] sm:$0xff]  ;;  %v4638_v35 = vcombine.high %v138_v28, %v142_v29  ;;  %v146_v36 = vld [vmem:[#allocation5 + $0x150] sm:$0xff]  ;;  %v4637_v40 = vcombine.low %v138_v28, %v142_v29  ;;  %v726_v14 = vld [vmem:[#allocation8 + $0x80] sm:$0xff] }
  0x81   :  { %v150_v37 = vld [vmem:[#allocation5 + $0x170] sm:$0xff]  ;;  %v4632_v39 = vcombine.high %v131_v33, %v135_v34  ;;  %v143_v42 = vld [vmem:[#allocation5 + $0x138] sm:$0xff]  ;;  %v4631_v45 = vcombine.low %v131_v33, %v135_v34 }
  0x82   :  { %v154_v43 = vld [vmem:[#allocation5 + $0x190] sm:$0xff]  ;;  %v4645_v47 = vcombine.low %v146_v36, %v150_v37  ;;  %v147_v48 = vld [vmem:[#allocation5 + $0x158] sm:$0xff] }
  0x83   :  { %539 = vmatpush1.bf16.msra.mxu0 %v4633_v38  ;;  %580 = vmatpush1.bf16.msra.mxu1 %v4635_v52  ;;  %v4623_v38 = vcombine.low %v123_v25, %v127_v26  ;;  %v158_v44 = vld [vmem:[#allocation5 + $0x1b0] sm:$0xff]  ;;  %v155_v56 = vld [vmem:[#allocation5 + $0x198] sm:$0xff] }
  0x84   :  { %540 = vmatprep.subr.bf16.mxu0 %v4642_v41  ;;  %581 = vmatprep.subr.bf16.mxu1 %v4644_v53  ;;  %v139_v41 = vld [vmem:[#allocation5 + $0x118] sm:$0xff]  ;;  %v4654_v50 = vcombine.high %v154_v43, %v158_v44  ;;  %v162_v51 = vld [vmem:[#allocation5 + $0x1d0] sm:$0xff]  ;;  %v4653_v55 = vcombine.low %v154_v43, %v158_v44  ;;  %v758_v44 = vld [vmem:[#allocation8 + $0x180] sm:$0xff] }
  0x85   :  { %v166_v52 = vld [vmem:[#allocation5 + $0x1f0] sm:$0xff]  ;;  %v4639_v53 = vcombine.low %v139_v41, %v143_v42  ;;  %v163_v0 = vld [vmem:[#allocation5 + $0x1d8] sm:$0xff] }
  0x86   :  { %v4661_v63 = vcombine.low %v162_v51, %v166_v52  ;;  %v711_v10 = vld [vmem:[#allocation8 + $0x8] sm:$0xff] }
  0x87   :  { %541 = vmatpush1.bf16.msra.mxu0 %v4641_v46  ;;  %582 = vmatpush1.bf16.msra.mxu1 %v4643_v58  ;;  %v4640_v46 = vcombine.high %v139_v41, %v143_v42  ;;  %v4662_v58 = vcombine.high %v162_v51, %v166_v52  ;;  %v719_v18 = vld [vmem:[#allocation8 + $0x48] sm:$0xff]  ;;  %v766_v52 = vld [vmem:[#allocation8 + $0x1c0] sm:$0xff] }
  0x88   :  { %542 = vmatprep.subr.bf16.mxu0 %v4650_v49  ;;  %583 = vmatprep.subr.bf16.mxu1 %v4652_v61  ;;  %v151_v49 = vld [vmem:[#allocation5 + $0x178] sm:$0xff]  ;;  %v714_v61 = vld [vmem:[#allocation8 + $0x20] sm:$0xff]  ;;  %v727_v26 = vld [vmem:[#allocation8 + $0x88] sm:$0xff] }
  0x89   :  { %v4647_v59 = vcombine.low %v147_v48, %v151_v49  ;;  %v4665_v9 = vcombine.low %v710_v60, %v714_v61  ;;  %v735_v34 = vld [vmem:[#allocation8 + $0xc8] sm:$0xff] }
  0x8a   :  { %v743_v41 = vld [vmem:[#allocation8 + $0x108] sm:$0xff] }
  0x8b   :  { %543 = vmatpush1.bf16.msra.mxu0 %v4649_v54  ;;  %584 = vmatpush1.bf16.msra.mxu1 %v4651_v3  ;;  %v4648_v54 = vcombine.high %v147_v48, %v151_v49  ;;  %v4666_v3 = vcombine.high %v710_v60, %v714_v61  ;;  %v747_v42 = vld [vmem:[#allocation8 + $0x128] sm:$0xff]  ;;  %v774_v60 = vld [vmem:[#allocation8 + $0x200] sm:$0xff] }
  0x8c   :  { %544 = vmatprep.subr.bf16.mxu0 %v4658_v57  ;;  %585 = vmatprep.subr.bf16.mxu1 %v4660_v6  ;;  %v159_v57 = vld [vmem:[#allocation5 + $0x1b8] sm:$0xff]  ;;  %v722_v6 = vld [vmem:[#allocation8 + $0x60] sm:$0xff]  ;;  %v751_v48 = vld [vmem:[#allocation8 + $0x148] sm:$0xff]  ;;  %v4699_v51 = vcombine.low %v743_v41, %v747_v42 }
  0x8d   :  { %v4655_v4 = vcombine.low %v155_v56, %v159_v57  ;;  %v4673_v17 = vcombine.low %v718_v5, %v722_v6  ;;  %v755_v49 = vld [vmem:[#allocation8 + $0x168] sm:$0xff]  ;;  %v778_v61 = vld [vmem:[#allocation8 + $0x220] sm:$0xff] }
  0x8f   :  { %545 = vmatpush1.bf16.msra.mxu0 %v4657_v62  ;;  %586 = vmatpush1.bf16.msra.mxu1 %v4659_v12  ;;  %v4656_v62 = vcombine.high %v155_v56, %v159_v57  ;;  %v4674_v12 = vcombine.high %v718_v5, %v722_v6  ;;  %v759_v56 = vld [vmem:[#allocation8 + $0x188] sm:$0xff]  ;;  %v782_v5 = vld [vmem:[#allocation8 + $0x240] sm:$0xff] }
  0x90   :  { %612 = vmatprep.subr.bf16.mxu0 %v4606_v2  ;;  %653 = vmatprep.subr.bf16.mxu1 %v4608_v15  ;;  %v167_v2 = vld [vmem:[#allocation5 + $0x1f8] sm:$0xff]  ;;  %v730_v15 = vld [vmem:[#allocation8 + $0xa0] sm:$0xff]  ;;  %v763_v57 = vld [vmem:[#allocation8 + $0x1a8] sm:$0xff] }
  0x91   :  { %v4663_v13 = vcombine.low %v163_v0, %v167_v2  ;;  %v4682_v20 = vcombine.high %v726_v14, %v730_v15  ;;  %v4681_v25 = vcombine.low %v726_v14, %v730_v15  ;;  %v786_v6 = vld [vmem:[#allocation8 + $0x260] sm:$0xff] }
  0x92   :  { %563 = vmatmul.mubr.bf16.vlgmr.msra.gmra.mrb[0].mxu0 %v5510_v7  ;;  %604 = vmatmul.mubr.bf16.vlgmr.msra.gmra.mrb[0].mxu1 %v5510_v7  ;;  %v790_v14 = vld [vmem:[#allocation8 + $0x280] sm:$0xff] }
  0x93   :  { %613 = vmatpush1.bf16.msra.mxu0 %v4605_v8  ;;  %644 = vmatprep.mubr.bf16.mxu0 %v5392_v1  ;;  %v4664_v8 = vcombine.high %v163_v0, %v167_v2  ;;  %v767_v0 = vld [vmem:[#allocation8 + $0x1c8] sm:$0xff]  ;;  %v794_v15 = vld [vmem:[#allocation8 + $0x2a0] sm:$0xff] }
  0x94   :  { %614 = vmatprep.subr.bf16.mxu0 %v4614_v11  ;;  %654 = vmatpush1.bf16.msra.mxu1 %v4607_v22  ;;  %v715_v11 = vld [vmem:[#allocation8 + $0x28] sm:$0xff]  ;;  %v734_v22 = vld [vmem:[#allocation8 + $0xc0] sm:$0xff] }
  0x95   :  { %685 = vmatprep.mubr.bf16.mxu1 %v5392_v1  ;;  %655 = vmatprep.subr.bf16.mxu1 %v4616_v23  ;;  %v4646_v1 = vcombine.high %v146_v36, %v150_v37  ;;  %v4667_v21 = vcombine.low %v711_v10, %v715_v11  ;;  %v738_v23 = vld [vmem:[#allocation8 + $0xe0] sm:$0xff]  ;;  %v771_v2 = vld [vmem:[#allocation8 + $0x1e8] sm:$0xff] }
  0x96   :  { %v4690_v28 = vcombine.high %v734_v22, %v738_v23  ;;  %v4689_v33 = vcombine.low %v734_v22, %v738_v23  ;;  %v798_v22 = vld [vmem:[#allocation8 + $0x2c0] sm:$0xff] }
  0x97   :  { %615 = vmatpush1.bf16.msra.mxu0 %v4613_v16  ;;  %v4668_v16 = vcombine.high %v711_v10, %v715_v11  ;;  %v775_v10 = vld [vmem:[#allocation8 + $0x208] sm:$0xff]  ;;  %v802_v23 = vld [vmem:[#allocation8 + $0x2e0] sm:$0xff] }
  0x98   :  { %616 = vmatprep.subr.bf16.mxu0 %v4622_v19  ;;  %656 = vmatpush1.bf16.msra.mxu1 %v4615_v30  ;;  %v723_v19 = vld [vmem:[#allocation8 + $0x68] sm:$0xff]  ;;  %v742_v30 = vld [vmem:[#allocation8 + $0x100] sm:$0xff] }
  0x99   :  { %657 = vmatprep.subr.bf16.mxu1 %v4624_v31  ;;  %v4675_v29 = vcombine.low %v719_v18, %v723_v19  ;;  %v746_v31 = vld [vmem:[#allocation8 + $0x120] sm:$0xff]  ;;  %v779_v11 = vld [vmem:[#allocation8 + $0x228] sm:$0xff] }
  0x9a   :  { %v4698_v36 = vcombine.high %v742_v30, %v746_v31 }
  0x9b   :  { %617 = vmatpush1.bf16.msra.mxu0 %v4621_v24  ;;  %v4676_v24 = vcombine.high %v719_v18, %v723_v19  ;;  %v783_v18 = vld [vmem:[#allocation8 + $0x248] sm:$0xff] }
  0x9c   :  { %618 = vmatprep.subr.bf16.mxu0 %v4630_v27  ;;  %658 = vmatpush1.bf16.msra.mxu1 %v4623_v38  ;;  %v731_v27 = vld [vmem:[#allocation8 + $0xa8] sm:$0xff]  ;;  %v750_v38 = vld [vmem:[#allocation8 + $0x140] sm:$0xff] }
  0x9d   :  { %659 = vmatprep.subr.bf16.mxu1 %v4632_v39  ;;  %v4683_v37 = vcombine.low %v727_v26, %v731_v27  ;;  %v754_v39 = vld [vmem:[#allocation8 + $0x160] sm:$0xff]  ;;  %v787_v19 = vld [vmem:[#allocation8 + $0x268] sm:$0xff] }
  0x9f   :  { %619 = vmatpush1.bf16.msra.mxu0 %v4629_v32  ;;  %v4684_v32 = vcombine.high %v727_v26, %v731_v27  ;;  %v791_v26 = vld [vmem:[#allocation8 + $0x288] sm:$0xff] }
  0xa0   :  { %620 = vmatprep.subr.bf16.mxu0 %v4638_v35  ;;  %660 = vmatpush1.bf16.msra.mxu1 %v4631_v45  ;;  %v739_v35 = vld [vmem:[#allocation8 + $0xe8] sm:$0xff]  ;;  %v762_v45 = vld [vmem:[#allocation8 + $0x1a0] sm:$0xff] }
  0xa1   :  { %661 = vmatprep.subr.bf16.mxu1 %v4640_v46  ;;  %v4691_v43 = vcombine.low %v735_v34, %v739_v35  ;;  %v4700_v46 = vcombine.high %v743_v41, %v747_v42  ;;  %v795_v27 = vld [vmem:[#allocation8 + $0x2a8] sm:$0xff] }
  0xa2   :  { %v807_v41 = vld [vmem:[#allocation8 + $0x308] sm:$0xff] }
  0xa3   :  { %621 = vmatpush1.bf16.msra.mxu0 %v4637_v40  ;;  %v4697_v40 = vcombine.low %v742_v30, %v746_v31  ;;  %v806_v30 = vld [vmem:[#allocation8 + $0x300] sm:$0xff]  ;;  %v811_v42 = vld [vmem:[#allocation8 + $0x328] sm:$0xff] }
  0xa4   :  { %622 = vmatprep.subr.bf16.mxu0 %v4646_v1  ;;  %662 = vmatpush1.bf16.msra.mxu1 %v4639_v53  ;;  %v4706_v1 = vcombine.high %v750_v38, %v754_v39  ;;  %v770_v53 = vld [vmem:[#allocation8 + $0x1e0] sm:$0xff] }
  0xa5   :  { %663 = vmatprep.subr.bf16.mxu1 %v4648_v54  ;;  %v4708_v54 = vcombine.high %v751_v48, %v755_v49  ;;  %v810_v31 = vld [vmem:[#allocation8 + $0x320] sm:$0xff] }
  0xa7   :  { %623 = vmatpush1.bf16.msra.mxu0 %v4645_v47  ;;  %v4705_v47 = vcombine.low %v750_v38, %v754_v39  ;;  %v814_v38 = vld [vmem:[#allocation8 + $0x340] sm:$0xff] }
  0xa8   :  { %624 = vmatprep.subr.bf16.mxu0 %v4654_v50  ;;  %664 = vmatpush1.bf16.msra.mxu1 %v4647_v59  ;;  %v4714_v50 = vcombine.high %v758_v44, %v762_v45  ;;  %v4707_v59 = vcombine.low %v751_v48, %v755_v49  ;;  %v818_v39 = vld [vmem:[#allocation8 + $0x360] sm:$0xff]  ;;  %v815_v48 = vld [vmem:[#allocation8 + $0x348] sm:$0xff] }
  0xa9   :  { %665 = vmatprep.subr.bf16.mxu1 %v4656_v62  ;;  %v4716_v62 = vcombine.high %v759_v56, %v763_v57  ;;  %v819_v49 = vld [vmem:[#allocation8 + $0x368] sm:$0xff] }
  0xab   :  { %625 = vmatpush1.bf16.msra.mxu0 %v4653_v55  ;;  %v4713_v55 = vcombine.low %v758_v44, %v762_v45  ;;  %v4764_v44 = vcombine.high %v807_v41, %v811_v42  ;;  %v822_v45 = vld [vmem:[#allocation8 + $0x380] sm:$0xff] }
  0xac   :  { %626 = vmatprep.subr.bf16.mxu0 %v4662_v58  ;;  %666 = vmatpush1.bf16.msra.mxu1 %v4655_v4  ;;  %v4722_v58 = vcombine.high %v766_v52, %v770_v53  ;;  %v4715_v4 = vcombine.low %v759_v56, %v763_v57  ;;  %v823_v56 = vld [vmem:[#allocation8 + $0x388] sm:$0xff] }
  0xad   :  { %667 = vmatprep.subr.bf16.mxu1 %v4664_v8  ;;  %v4724_v8 = vcombine.high %v767_v0, %v771_v2  ;;  %v827_v57 = vld [vmem:[#allocation8 + $0x3a8] sm:$0xff] }
  0xaf   :  { %627 = vmatpush1.bf16.msra.mxu0 %v4661_v63  ;;  %v4721_v63 = vcombine.low %v766_v52, %v770_v53  ;;  %v4772_v52 = vcombine.high %v815_v48, %v819_v49  ;;  %v830_v53 = vld [vmem:[#allocation8 + $0x3c0] sm:$0xff] }
  0xb0   :  { %3824 = vmatprep.subr.bf16.mxu0 %v4666_v3  ;;  %668 = vmatpush1.bf16.msra.mxu1 %v4663_v13  ;;  %v4730_v3 = vcombine.high %v774_v60, %v778_v61  ;;  %v4723_v13 = vcombine.low %v767_v0, %v771_v2  ;;  %v831_v2 = vld [vmem:[#allocation8 + $0x3c8] sm:$0xff] }
  0xb1   :  { %3988 = vmatprep.subr.bf16.mxu1 %v4668_v16  ;;  %v4732_v16 = vcombine.high %v775_v10, %v779_v11 }
  0xb2   :  { %645 = vmatmul.mubr.bf16.vlgmr.msra.gmra.mrb[4].mxu0 %v5510_v7 }
  0xb3   :  { %3825 = vmatpush1.bf16.msra.mxu0 %v4665_v9  ;;  %686 = vmatmul.mubr.bf16.vlgmr.msra.gmra.mrb[4].mxu1 %v5510_v7  ;;  %v4692_v7 = vcombine.high %v735_v34, %v739_v35  ;;  %v4729_v9 = vcombine.low %v774_v60, %v778_v61  ;;  %v799_v34 = vld [vmem:[#allocation8 + $0x2c8] sm:$0xff]  ;;  %v4780_v60 = vcombine.high %v823_v56, %v827_v57  ;;  %v838_v61 = vld [vmem:[#allocation8 + $0x400] sm:$0xff] }
  0xb4   :  { %3826 = vmatprep.subr.bf16.mxu0 %v4674_v12  ;;  %3989 = vmatpush1.bf16.msra.mxu1 %v4667_v21  ;;  %v4738_v12 = vcombine.high %v782_v5, %v786_v6  ;;  %v4731_v21 = vcombine.low %v775_v10, %v779_v11  ;;  %v803_v35 = vld [vmem:[#allocation8 + $0x2e8] sm:$0xff] }
  0xb5   :  { %3990 = vmatprep.subr.bf16.mxu1 %v4676_v24  ;;  %v4740_v24 = vcombine.high %v783_v18, %v787_v19 }
  0xb7   :  { %3827 = vmatpush1.bf16.msra.mxu0 %v4673_v17  ;;  %v4737_v17 = vcombine.low %v782_v5, %v786_v6 }
  0xb8   :  { %3828 = vmatprep.subr.bf16.mxu0 %v4682_v20  ;;  %3991 = vmatpush1.bf16.msra.mxu1 %v4675_v29  ;;  %v4746_v20 = vcombine.high %v790_v14, %v794_v15  ;;  %v4739_v29 = vcombine.low %v783_v18, %v787_v19 }
  0xb9   :  { %3992 = vmatprep.subr.bf16.mxu1 %v4684_v32  ;;  %v4748_v32 = vcombine.high %v791_v26, %v795_v27 }
  0xbb   :  { %3829 = vmatpush1.bf16.msra.mxu0 %v4681_v25  ;;  %v4745_v25 = vcombine.low %v790_v14, %v794_v15 }
  0xbc   :  { %3830 = vmatprep.subr.bf16.mxu0 %v4690_v28  ;;  %3993 = vmatpush1.bf16.msra.mxu1 %v4683_v37  ;;  %v4754_v28 = vcombine.high %v798_v22, %v802_v23  ;;  %v4747_v37 = vcombine.low %v791_v26, %v795_v27 }
  0xbd   :  { %3994 = vmatprep.subr.bf16.mxu1 %v4692_v7  ;;  %v4756_v7 = vcombine.high %v799_v34, %v803_v35 }
  0xbf   :  { %3831 = vmatpush1.bf16.msra.mxu0 %v4689_v33  ;;  %v4753_v33 = vcombine.low %v798_v22, %v802_v23 }
  0xc0   :  { %3832 = vmatprep.subr.bf16.mxu0 %v4698_v36  ;;  %3995 = vmatpush1.bf16.msra.mxu1 %v4691_v43  ;;  %v4762_v36 = vcombine.high %v806_v30, %v810_v31  ;;  %v4755_v43 = vcombine.low %v799_v34, %v803_v35 }
  0xc1   :  { %3996 = vmatprep.subr.bf16.mxu1 %v4700_v46  ;;  %v826_v46 = vld [vmem:[#allocation8 + $0x3a0] sm:$0xff] }
  0xc3   :  { %3833 = vmatpush1.bf16.msra.mxu0 %v4697_v40  ;;  %v4761_v40 = vcombine.low %v806_v30, %v810_v31  ;;  %v850_v30 = vld [vmem:[#allocation8 + $0x460] sm:$0xff]  ;;  %v847_v31 = vld [vmem:[#allocation8 + $0x448] sm:$0xff] }
  0xc4   :  { %3834 = vmatprep.subr.bf16.mxu0 %v4706_v1  ;;  %3997 = vmatpush1.bf16.msra.mxu1 %v4699_v51  ;;  %v4770_v1 = vcombine.high %v814_v38, %v818_v39  ;;  %v4763_v51 = vcombine.low %v807_v41, %v811_v42  ;;  %v855_v41 = vld [vmem:[#allocation8 + $0x488] sm:$0xff] }
  0xc5   :  { %3998 = vmatprep.subr.bf16.mxu1 %v4708_v54  ;;  %v834_v54 = vld [vmem:[#allocation8 + $0x3e0] sm:$0xff]  ;;  %v859_v42 = vld [vmem:[#allocation8 + $0x4a8] sm:$0xff] }
  0xc6   :  { %v4785_v0 = vcombine.low %v830_v53, %v834_v54 }
  0xc7   :  { %3835 = vmatpush1.bf16.msra.mxu0 %v4705_v47  ;;  %v4769_v47 = vcombine.low %v814_v38, %v818_v39  ;;  %v854_v39 = vld [vmem:[#allocation8 + $0x480] sm:$0xff] }
  0xc8   :  { %3836 = vmatprep.subr.bf16.mxu0 %v4714_v50  ;;  %3999 = vmatpush1.bf16.msra.mxu1 %v4707_v59  ;;  %v4778_v50 = vcombine.high %v822_v45, %v826_v46  ;;  %v4771_v59 = vcombine.low %v815_v48, %v819_v49  ;;  %v4812_v49 = vcombine.high %v855_v41, %v859_v42 }
  0xc9   :  { %4000 = vmatprep.subr.bf16.mxu1 %v4716_v62  ;;  %v842_v62 = vld [vmem:[#allocation8 + $0x420] sm:$0xff] }
  0xca   :  { %v4793_v5 = vcombine.low %v838_v61, %v842_v62  ;;  %v4794_v6 = vcombine.high %v838_v61, %v842_v62  ;;  %v871_v61 = vld [vmem:[#allocation8 + $0x508] sm:$0xff] }
  0xcb   :  { %3837 = vmatpush1.bf16.msra.mxu0 %v4713_v55  ;;  %v4777_v55 = vcombine.low %v822_v45, %v826_v46  ;;  %v875_v62 = vld [vmem:[#allocation8 + $0x528] sm:$0xff] }
  0xcc   :  { %3838 = vmatprep.subr.bf16.mxu0 %v4722_v58  ;;  %4001 = vmatpush1.bf16.msra.mxu1 %v4715_v4  ;;  %v4786_v58 = vcombine.high %v830_v53, %v834_v54  ;;  %v843_v4 = vld [vmem:[#allocation8 + $0x428] sm:$0xff] }
  0xcd   :  { %4002 = vmatprep.subr.bf16.mxu1 %v4724_v8  ;;  %v867_v53 = vld [vmem:[#allocation8 + $0x4e8] sm:$0xff] }
  0xcf   :  { %3839 = vmatpush1.bf16.msra.mxu0 %v4721_v63  ;;  %v839_v63 = vld [vmem:[#allocation8 + $0x408] sm:$0xff] }
  0xd0   :  { %3840 = vmatprep.subr.bf16.mxu0 %v4730_v3  ;;  %4003 = vmatpush1.bf16.msra.mxu1 %v4723_v13  ;;  %v835_v3 = vld [vmem:[#allocation8 + $0x3e8] sm:$0xff]  ;;  %v4795_v8 = vcombine.low %v839_v63, %v843_v4  ;;  %v170_v13 = vlaneseq }
  0xd1   :  { %4004 = vmatprep.subr.bf16.mxu1 %v4732_v16  ;;  %v4788_v10 = vcombine.high %v831_v2, %v835_v3  ;;  %v4787_v11 = vcombine.low %v831_v2, %v835_v3  ;;  %v5523_v16 = vld [vmem:[#allocation7] sm:$0xff]  ;;  %v4828_v3 = vcombine.high %v871_v61, %v875_v62 }
  0xd2   :  { %v5518_v14 = vshrl.u32 %v170_v13, 7  ;;  %v886_v13 = vld [vmem:[#allocation8 + $0x580] sm:$0xff] }
  0xd3   :  { %3841 = vmatpush1.bf16.msra.mxu0 %v4729_v9  ;;  %v4779_v9 = vcombine.low %v823_v56, %v827_v57  ;;  %v4811_v56 = vcombine.low %v855_v41, %v859_v42 }
  0xd4   :  { %3842 = vmatprep.subr.bf16.mxu0 %v4738_v12  ;;  %4005 = vmatpush1.bf16.msra.mxu1 %v4731_v21  ;;  %v4796_v12 = vcombine.high %v839_v63, %v843_v4  ;;  %v5521_v15 = vsub.s32 0, %v5518_v14  ;;  %v184_v21 = vsub.s32 3, %v5518_v14  ;;  %v878_v4 = vld [vmem:[#allocation8 + $0x540] sm:$0xff] }
  0xd5   :  { %4006 = vmatprep.subr.bf16.mxu1 %v4740_v24 }
  0xd6   :  { %v173_v18 = vrot.slane %v5523_v16, %v5521_v15 }
  0xd7   :  { %3843 = vmatpush1.bf16.msra.mxu0 %v4737_v17  ;;  %v176_v17 = vsub.s32 1, %v5518_v14 }
  0xd8   :  { %3844 = vmatprep.subr.bf16.mxu0 %v4746_v20  ;;  %4007 = vmatpush1.bf16.msra.mxu1 %v4739_v29 }
  0xd9   :  { %4008 = vmatprep.subr.bf16.mxu1 %v4748_v32  ;;  %v177_v19 = vrot.slane %v5523_v16, %v176_v17  ;;  %v851_v32 = vld [vmem:[#allocation8 + $0x468] sm:$0xff] }
  0xda   :  { %v4804_v38 = vcombine.high %v847_v31, %v851_v32  ;;  %v4803_v46 = vcombine.low %v847_v31, %v851_v32 }
  0xdb   :  { %3845 = vmatpush1.bf16.msra.mxu0 %v4745_v25 }
  0xdc   :  { %3846 = vmatprep.subr.bf16.mxu0 %v4754_v28  ;;  %4009 = vmatpush1.bf16.msra.mxu1 %v4747_v37  ;;  %v846_v28 = vld [vmem:[#allocation8 + $0x440] sm:$0xff] }
  0xdd   :  { %4010 = vmatprep.subr.bf16.mxu1 %v4756_v7  ;;  %v4802_v37 = vcombine.high %v846_v28, %v850_v30  ;;  %v4801_v45 = vcombine.low %v846_v28, %v850_v30  ;;  %v895_v28 = vld [vmem:[#allocation8 + $0x5c8] sm:$0xff] }
  0xdf   :  { %3847 = vmatpush1.bf16.msra.mxu0 %v4753_v33  ;;  %v185_v33 = vrot.slane %v5523_v16, %v184_v21 }
  0xe0   :  { %3848 = vmatprep.subr.bf16.mxu0 %v4762_v36  ;;  %4011 = vmatpush1.bf16.msra.mxu1 %v4755_v43 }
  0xe1   :  { %4012 = vmatprep.subr.bf16.mxu1 %v4764_v44 }
  0xe3   :  { %3849 = vmatpush1.bf16.msra.mxu0 %v4761_v40  ;;  %v858_v40 = vld [vmem:[#allocation8 + $0x4a0] sm:$0xff] }
  0xe4   :  { %3850 = vmatprep.subr.bf16.mxu0 %v4770_v1  ;;  %4013 = vmatpush1.bf16.msra.mxu1 %v4763_v51  ;;  %v4810_v48 = vcombine.high %v854_v39, %v858_v40  ;;  %v866_v51 = vld [vmem:[#allocation8 + $0x4e0] sm:$0xff] }
  0xe5   :  { %4014 = vmatprep.subr.bf16.mxu1 %v4772_v52  ;;  %v863_v52 = vld [vmem:[#allocation8 + $0x4c8] sm:$0xff] }
  0xe7   :  { %3851 = vmatpush1.bf16.msra.mxu0 %v4769_v47 }
  0xe8   :  { %3852 = vmatprep.subr.bf16.mxu0 %v4778_v50  ;;  %4015 = vmatpush1.bf16.msra.mxu1 %v4771_v59  ;;  %v862_v50 = vld [vmem:[#allocation8 + $0x4c0] sm:$0xff] }
  0xe9   :  { %4016 = vmatprep.subr.bf16.mxu1 %v4780_v60  ;;  %v4818_v57 = vcombine.high %v862_v50, %v866_v51  ;;  %v870_v59 = vld [vmem:[#allocation8 + $0x500] sm:$0xff]  ;;  %v4817_v63 = vcombine.low %v862_v50, %v866_v51  ;;  %v915_v50 = vld [vmem:[#allocation8 + $0x668] sm:$0xff] }
  0xea   :  { %v874_v60 = vld [vmem:[#allocation8 + $0x520] sm:$0xff] }
  0xeb   :  { %3853 = vmatpush1.bf16.msra.mxu0 %v4777_v55  ;;  %v4809_v55 = vcombine.low %v854_v39, %v858_v40  ;;  %v4826_v2 = vcombine.high %v870_v59, %v874_v60  ;;  %v903_v39 = vld [vmem:[#allocation8 + $0x608] sm:$0xff] }
  0xec   :  { %3854 = vmatprep.subr.bf16.mxu0 %v4786_v58  ;;  %4017 = vmatpush1.bf16.msra.mxu1 %v4779_v9  ;;  %v4820_v58 = vcombine.high %v863_v52, %v867_v53  ;;  %v4825_v9 = vcombine.low %v870_v59, %v874_v60  ;;  %v922_v59 = vld [vmem:[#allocation8 + $0x6a0] sm:$0xff]  ;;  %v919_v60 = vld [vmem:[#allocation8 + $0x688] sm:$0xff] }
  0xed   :  { %4018 = vmatprep.subr.bf16.mxu1 %v4788_v10  ;;  %v4827_v10 = vcombine.low %v871_v61, %v875_v62  ;;  %v923_v61 = vld [vmem:[#allocation8 + $0x6a8] sm:$0xff] }
  0xef   :  { %3855 = vmatpush1.bf16.msra.mxu0 %v4785_v0  ;;  %v4819_v0 = vcombine.low %v863_v52, %v867_v53 }
  0xf0   :  { %3865 = vmatprep.subr.bf16.mxu0 %v4794_v6  ;;  %4019 = vmatpush1.bf16.msra.mxu1 %v4787_v11  ;;  %v879_v6 = vld [vmem:[#allocation8 + $0x548] sm:$0xff] }
  0xf1   :  { %4029 = vmatprep.subr.bf16.mxu1 %v4796_v12 }
 0x165   :  { %v564_v20 = vpop.f32.mrb[0].mxu0  ;;  %v5537_v35 = vpop.f32.mrb[0].mxu1 }
 0x166   :  { %v565_v22 = vadd.f32 %v564_v20, %v173_v18  ;;  %v566_v23 = vpop.f32.mrb[1].mxu0  ;;  %v607_v7 = vpop.f32.mrb[1].mxu1  ;;  %v890_v18 = vld [vmem:[#allocation8 + $0x5a0] sm:$0xff]  ;;  %v891_v20 = vld [vmem:[#allocation8 + $0x5a8] sm:$0xff] }
 0x167   :  { %v567_v24 = vadd.f32 %v566_v23, %v177_v19  ;;  %v568_v25 = vpop.f32.mrb[2].mxu0  ;;  %v608_v1 = vadd.f32 %v607_v7, %v185_v33  ;;  %v609_v43 = vpop.f32.mrb[2].mxu1  ;;  %v887_v19 = vld [vmem:[#allocation8 + $0x588] sm:$0xff]  ;;  %v4841_v30 = vcombine.low %v886_v13, %v890_v18 }
 0x168   :  { %v694_v26 = vmax.f32 %v565_v22, 0.0  ;;  %v569_v27 = vpop.f32.mrb[3].mxu0  ;;  %v610_v44 = vpop.f32.mrb[3].mxu1  ;;  %v4844_v25 = vcombine.high %v887_v19, %v891_v20  ;;  %v4843_v31 = vcombine.low %v887_v19, %v891_v20  ;;  %v907_v7 = vld [vmem:[#allocation8 + $0x628] sm:$0xff]  ;;  %v938_v19 = vld [vmem:[#allocation8 + $0x720] sm:$0xff] }
 0x169   :  { %v695_v29 = vmax.f32 %v567_v24, 0.0  ;;  %v697_v47 = vmax.f32 %v608_v1, 0.0  ;;  %v4842_v24 = vcombine.high %v886_v13, %v890_v18  ;;  %v898_v27 = vld [vmem:[#allocation8 + $0x5e0] sm:$0xff]  ;;  %v4859_v52 = vcombine.low %v903_v39, %v907_v7  ;;  %v935_v20 = vld [vmem:[#allocation8 + $0x708] sm:$0xff] }
 0x16a   :  { %v5539_v36 = vpack.c.bf16 %v694_v26, %v694_v26  ;;  %v894_v26 = vld [vmem:[#allocation8 + $0x5c0] sm:$0xff] }
 0x16b   :  { %v5535_v34 = vpack.c.bf16 %v695_v29, %v695_v29  ;;  %v5545_v54 = vpack.c.bf16 %v697_v47, %v697_v47  ;;  %v899_v29 = vld [vmem:[#allocation8 + $0x5e8] sm:$0xff]  ;;  %v4850_v32 = vcombine.high %v894_v26, %v898_v27  ;;  %v4849_v42 = vcombine.low %v894_v26, %v898_v27  ;;  %v934_v18 = vld [vmem:[#allocation8 + $0x700] sm:$0xff] }
 0x16c   :  { %v4852_v33 = vcombine.high %v895_v28, %v899_v29  ;;  %v4851_v1 = vcombine.low %v895_v28, %v899_v29  ;;  %v942_v27 = vld [vmem:[#allocation8 + $0x740] sm:$0xff]  ;;  %v943_v29 = vld [vmem:[#allocation8 + $0x748] sm:$0xff] }
 0x16d   :  { %3856 = vmatprep.mubr.bf16.mxu0 %v5535_v34  ;;  %4020 = vmatprep.mubr.bf16.mxu1 %v5535_v34  ;;  %v946_v28 = vld [vmem:[#allocation8 + $0x760] sm:$0xff] }
 0x16e   :  { %3857 = vmatmul.mubr.bf16.vlgmr.msra.gmra.mrb[8].mxu0 %v5539_v36  ;;  %4021 = vmatmul.mubr.bf16.vlgmr.msra.gmra.mrb[8].mxu1 %v5539_v36 }
 0x16f   :  { %3866 = vmatpush1.bf16.msra.mxu0 %v4793_v5  ;;  %4030 = vmatpush1.bf16.msra.mxu1 %v4795_v8  ;;  %v882_v5 = vld [vmem:[#allocation8 + $0x560] sm:$0xff]  ;;  %v883_v8 = vld [vmem:[#allocation8 + $0x568] sm:$0xff] }
 0x170   :  { %3867 = vmatprep.subr.bf16.mxu0 %v4802_v37  ;;  %4031 = vmatprep.subr.bf16.mxu1 %v4804_v38  ;;  %v4834_v11 = vcombine.high %v878_v4, %v882_v5  ;;  %v4836_v12 = vcombine.high %v879_v6, %v883_v8  ;;  %v4833_v22 = vcombine.low %v878_v4, %v882_v5  ;;  %v902_v37 = vld [vmem:[#allocation8 + $0x600] sm:$0xff] }
 0x171   :  { %3897 = vmatprep.mubr.bf16.mxu0 %v5545_v54  ;;  %4061 = vmatprep.mubr.bf16.mxu1 %v5545_v54  ;;  %v4835_v23 = vcombine.low %v879_v6, %v883_v8  ;;  %v906_v38 = vld [vmem:[#allocation8 + $0x620] sm:$0xff]  ;;  %v4876_v4 = vcombine.high %v919_v60, %v923_v61  ;;  %v927_v8 = vld [vmem:[#allocation8 + $0x6c8] sm:$0xff] }
 0x172   :  { %v4858_v44 = vcombine.high %v902_v37, %v906_v38  ;;  %v4857_v51 = vcombine.low %v902_v37, %v906_v38  ;;  %v926_v5 = vld [vmem:[#allocation8 + $0x6c0] sm:$0xff]  ;;  %v4898_v37 = vcombine.high %v942_v27, %v946_v28 }
 0x173   :  { %3868 = vmatpush1.bf16.msra.mxu0 %v4801_v45  ;;  %4032 = vmatpush1.bf16.msra.mxu1 %v4803_v46  ;;  %v4860_v45 = vcombine.high %v903_v39, %v907_v7  ;;  %v910_v46 = vld [vmem:[#allocation8 + $0x640] sm:$0xff] }
 0x174   :  { %3869 = vmatprep.subr.bf16.mxu0 %v4810_v48  ;;  %4033 = vmatprep.subr.bf16.mxu1 %v4812_v49  ;;  %v914_v48 = vld [vmem:[#allocation8 + $0x660] sm:$0xff]  ;;  %v911_v49 = vld [vmem:[#allocation8 + $0x648] sm:$0xff] }
 0x175   :  { %v930_v6 = vld [vmem:[#allocation8 + $0x6e0] sm:$0xff] }
 0x176   :  { %v950_v39 = vld [vmem:[#allocation8 + $0x780] sm:$0xff] }
 0x177   :  { %3870 = vmatpush1.bf16.msra.mxu0 %v4809_v55  ;;  %4034 = vmatpush1.bf16.msra.mxu1 %v4811_v56  ;;  %v4866_v55 = vcombine.high %v910_v46, %v914_v48  ;;  %v4868_v56 = vcombine.high %v911_v49, %v915_v50  ;;  %v954_v7 = vld [vmem:[#allocation8 + $0x7a0] sm:$0xff] }
 0x178   :  { %3871 = vmatprep.subr.bf16.mxu0 %v4818_v57  ;;  %4035 = vmatprep.subr.bf16.mxu1 %v4820_v58  ;;  %v918_v57 = vld [vmem:[#allocation8 + $0x680] sm:$0xff] }
 0x17b   :  { %3872 = vmatpush1.bf16.msra.mxu0 %v4817_v63  ;;  %4036 = vmatpush1.bf16.msra.mxu1 %v4819_v0  ;;  %v4865_v0 = vcombine.low %v910_v46, %v914_v48 }
 0x17c   :  { %3873 = vmatprep.subr.bf16.mxu0 %v4826_v2  ;;  %4037 = vmatprep.subr.bf16.mxu1 %v4828_v3  ;;  %v4867_v2 = vcombine.low %v911_v49, %v915_v50  ;;  %v4874_v3 = vcombine.high %v918_v57, %v922_v59  ;;  %v958_v49 = vld [vmem:[#allocation8 + $0x7c0] sm:$0xff] }
 0x17d   :  { %v962_v50 = vld [vmem:[#allocation8 + $0x7e0] sm:$0xff] }
 0x17f   :  { %3874 = vmatpush1.bf16.msra.mxu0 %v4825_v9  ;;  %4038 = vmatpush1.bf16.msra.mxu1 %v4827_v10  ;;  %v931_v9 = vld [vmem:[#allocation8 + $0x6e8] sm:$0xff]  ;;  %v4873_v10 = vcombine.low %v918_v57, %v922_v59  ;;  %v4905_v57 = vcombine.low %v950_v39, %v954_v7 }
 0x180   :  { %3875 = vmatprep.subr.bf16.mxu0 %v4834_v11  ;;  %4039 = vmatprep.subr.bf16.mxu1 %v4836_v12  ;;  %v4875_v11 = vcombine.low %v919_v60, %v923_v61  ;;  %v4882_v12 = vcombine.high %v926_v5, %v930_v6  ;;  %v4884_v13 = vcombine.high %v927_v8, %v931_v9 }
 0x181   :  { %v4914_v60 = vcombine.high %v958_v49, %v962_v50 }
 0x183   :  { %3876 = vmatpush1.bf16.msra.mxu0 %v4833_v22  ;;  %4040 = vmatpush1.bf16.msra.mxu1 %v4835_v23  ;;  %v939_v22 = vld [vmem:[#allocation8 + $0x728] sm:$0xff]  ;;  %v4881_v23 = vcombine.low %v926_v5, %v930_v6  ;;  %v4913_v5 = vcombine.low %v958_v49, %v962_v50 }
 0x184   :  { %3877 = vmatprep.subr.bf16.mxu0 %v4842_v24  ;;  %4041 = vmatprep.subr.bf16.mxu1 %v4844_v25  ;;  %v4883_v24 = vcombine.low %v927_v8, %v931_v9  ;;  %v4890_v25 = vcombine.high %v934_v18, %v938_v19  ;;  %v4892_v26 = vcombine.high %v935_v20, %v939_v22  ;;  %v974_v9 = vld [vmem:[#allocation8 + $0x840] sm:$0xff] }
 0x185   :  { %v5549_v40 = vpop.f32.mrb[4].mxu0 }
 0x186   :  { %v5551_v41 = vpop.f32.mrb[5].mxu0  ;;  %v5553_v53 = vpop.f32.mrb[4].mxu1 }
 0x187   :  { %3878 = vmatpush1.bf16.msra.mxu0 %v4841_v30  ;;  %4042 = vmatpush1.bf16.msra.mxu1 %v4843_v31  ;;  %v650_v43 = vpop.f32.mrb[6].mxu0  ;;  %v5555_v58 = vpop.f32.mrb[5].mxu1  ;;  %v947_v30 = vld [vmem:[#allocation8 + $0x768] sm:$0xff]  ;;  %v5558_v31 = vsub.s32 2, %v5518_v14 }
 0x188   :  { %3879 = vmatprep.subr.bf16.mxu0 %v4850_v32  ;;  %4043 = vmatprep.subr.bf16.mxu1 %v4852_v33  ;;  %v651_v47 = vpop.f32.mrb[7].mxu0  ;;  %v691_v62 = vpop.f32.mrb[6].mxu1  ;;  %v4889_v32 = vcombine.low %v934_v18, %v938_v19  ;;  %v4891_v33 = vcombine.low %v935_v20, %v939_v22  ;;  %v4900_v38 = vcombine.high %v943_v29, %v947_v30  ;;  %v192_v43 = vsub.s32 5, %v5518_v14 }
 0x189   :  { %v692_v63 = vpop.f32.mrb[7].mxu1  ;;  %v4899_v46 = vcombine.low %v943_v29, %v947_v30  ;;  %v4906_v47 = vcombine.high %v950_v39, %v954_v7  ;;  %v966_v62 = vld [vmem:[#allocation8 + $0x800] sm:$0xff]  ;;  %v995_v39 = vld [vmem:[#allocation8 + $0x8e8] sm:$0xff] }
 0x18a   :  { %v970_v63 = vld [vmem:[#allocation8 + $0x820] sm:$0xff] }
 0x18b   :  { %3880 = vmatpush1.bf16.msra.mxu0 %v4849_v42  ;;  %4044 = vmatpush1.bf16.msra.mxu1 %v4851_v1  ;;  %v951_v42 = vld [vmem:[#allocation8 + $0x788] sm:$0xff]  ;;  %v4921_v19 = vcombine.low %v966_v62, %v970_v63 }
 0x18c   :  { %3881 = vmatprep.subr.bf16.mxu0 %v4858_v44  ;;  %4045 = vmatprep.subr.bf16.mxu1 %v4860_v45  ;;  %v955_v1 = vld [vmem:[#allocation8 + $0x7a8] sm:$0xff]  ;;  %v181_v44 = vrot.slane %v5523_v16, %v5558_v31  ;;  %v4897_v45 = vcombine.low %v942_v27, %v946_v28 }
 0x18d   :  { %v4908_v48 = vcombine.high %v951_v42, %v955_v1  ;;  %v4907_v59 = vcombine.low %v951_v42, %v955_v1 }
 0x18f   :  { %3882 = vmatpush1.bf16.msra.mxu0 %v4857_v51  ;;  %4046 = vmatpush1.bf16.msra.mxu1 %v4859_v52  ;;  %v959_v51 = vld [vmem:[#allocation8 + $0x7c8] sm:$0xff] }
 0x190   :  { %3883 = vmatprep.subr.bf16.mxu0 %v4866_v55  ;;  %4047 = vmatprep.subr.bf16.mxu1 %v4868_v56  ;;  %v963_v52 = vld [vmem:[#allocation8 + $0x7e8] sm:$0xff]  ;;  %v193_v55 = vrot.slane %v5523_v16, %v192_v43  ;;  %v606_v56 = vadd.f32 %v5537_v35, %v181_v44  ;;  %v4922_v35 = vcombine.high %v966_v62, %v970_v63 }
 0x191   :  { %v4916_v61 = vcombine.high %v959_v51, %v963_v52  ;;  %v4915_v6 = vcombine.low %v959_v51, %v963_v52 }
 0x193   :  { %3884 = vmatpush1.bf16.msra.mxu0 %v4865_v0  ;;  %4048 = vmatpush1.bf16.msra.mxu1 %v4867_v2  ;;  %v967_v0 = vld [vmem:[#allocation8 + $0x808] sm:$0xff] }
 0x194   :  { %3885 = vmatprep.subr.bf16.mxu0 %v4874_v3  ;;  %4049 = vmatprep.subr.bf16.mxu1 %v4876_v4  ;;  %v971_v2 = vld [vmem:[#allocation8 + $0x828] sm:$0xff]  ;;  %v649_v3 = vadd.f32 %v5551_v41, %v193_v55  ;;  %v696_v4 = vmax.f32 %v606_v56, 0.0  ;;  %v1006_v55 = vld [vmem:[#allocation8 + $0x940] sm:$0xff] }
 0x195   :  { %v4924_v8 = vcombine.high %v967_v0, %v971_v2  ;;  %v4923_v41 = vcombine.low %v967_v0, %v971_v2  ;;  %v1010_v56 = vld [vmem:[#allocation8 + $0x960] sm:$0xff] }
 0x196   :  { %v5568_v18 = vpack.c.bf16 %v696_v4, %v696_v4  ;;  %v4962_v62 = vcombine.high %v1006_v55, %v1010_v56  ;;  %v1014_v0 = vld [vmem:[#allocation8 + $0x980] sm:$0xff]  ;;  %v1019_v4 = vld [vmem:[#allocation8 + $0x9a8] sm:$0xff] }
 0x197   :  { %3886 = vmatpush1.bf16.msra.mxu0 %v4873_v10  ;;  %4050 = vmatpush1.bf16.msra.mxu1 %v4875_v11  ;;  %v978_v10 = vld [vmem:[#allocation8 + $0x860] sm:$0xff]  ;;  %v975_v11 = vld [vmem:[#allocation8 + $0x848] sm:$0xff] }
 0x198   :  { %3887 = vmatprep.subr.bf16.mxu0 %v4882_v12  ;;  %4051 = vmatprep.subr.bf16.mxu1 %v4884_v13  ;;  %v979_v12 = vld [vmem:[#allocation8 + $0x868] sm:$0xff]  ;;  %v699_v13 = vmax.f32 %v649_v3, 0.0  ;;  %v4930_v20 = vcombine.high %v974_v9, %v978_v10  ;;  %v4929_v28 = vcombine.low %v974_v9, %v978_v10  ;;  %v1018_v2 = vld [vmem:[#allocation8 + $0x9a0] sm:$0xff] }
 0x199   :  { %v4932_v22 = vcombine.high %v975_v11, %v979_v12  ;;  %v4931_v29 = vcombine.low %v975_v11, %v979_v12  ;;  %v1015_v3 = vld [vmem:[#allocation8 + $0x988] sm:$0xff]  ;;  %v1022_v9 = vld [vmem:[#allocation8 + $0x9c0] sm:$0xff] }
 0x19a   :  { %v5570_v27 = vpack.c.bf16 %v699_v13, %v699_v13  ;;  %v1026_v10 = vld [vmem:[#allocation8 + $0x9e0] sm:$0xff]  ;;  %v1023_v11 = vld [vmem:[#allocation8 + $0x9c8] sm:$0xff]  ;;  %v4969_v13 = vcombine.low %v1014_v0, %v1018_v2 }
 0x19b   :  { %3888 = vmatpush1.bf16.msra.mxu0 %v4881_v23  ;;  %4052 = vmatpush1.bf16.msra.mxu1 %v4883_v24  ;;  %v982_v23 = vld [vmem:[#allocation8 + $0x880] sm:$0xff]  ;;  %v1027_v12 = vld [vmem:[#allocation8 + $0x9e8] sm:$0xff] }
 0x19c   :  { %3889 = vmatprep.subr.bf16.mxu0 %v4890_v25  ;;  %4053 = vmatprep.subr.bf16.mxu1 %v4892_v26  ;;  %v986_v24 = vld [vmem:[#allocation8 + $0x8a0] sm:$0xff]  ;;  %v983_v25 = vld [vmem:[#allocation8 + $0x888] sm:$0xff] }
 0x19d   :  { %v987_v26 = vld [vmem:[#allocation8 + $0x8a8] sm:$0xff]  ;;  %v4938_v30 = vcombine.high %v982_v23, %v986_v24  ;;  %v4937_v7 = vcombine.low %v982_v23, %v986_v24  ;;  %v1034_v23 = vld [vmem:[#allocation8 + $0xa20] sm:$0xff] }
 0x19e   :  { %v4939_v42 = vcombine.low %v983_v25, %v987_v26  ;;  %v1031_v24 = vld [vmem:[#allocation8 + $0xa08] sm:$0xff] }
 0x19f   :  { %3890 = vmatpush1.bf16.msra.mxu0 %v4889_v32  ;;  %4054 = vmatpush1.bf16.msra.mxu1 %v4891_v33  ;;  %v4940_v32 = vcombine.high %v983_v25, %v987_v26  ;;  %v990_v33 = vld [vmem:[#allocation8 + $0x8c0] sm:$0xff]  ;;  %v1035_v25 = vld [vmem:[#allocation8 + $0xa28] sm:$0xff]  ;;  %v4977_v26 = vcombine.low %v1022_v9, %v1026_v10 }
 0x1a0   :  { %3891 = vmatprep.subr.bf16.mxu0 %v4898_v37  ;;  %4055 = vmatprep.subr.bf16.mxu1 %v4900_v38  ;;  %v994_v37 = vld [vmem:[#allocation8 + $0x8e0] sm:$0xff]  ;;  %v991_v38 = vld [vmem:[#allocation8 + $0x8c8] sm:$0xff] }
 0x1a1   :  { %v4946_v1 = vcombine.high %v990_v33, %v994_v37  ;;  %v4948_v44 = vcombine.high %v991_v38, %v995_v39  ;;  %v4945_v49 = vcombine.low %v990_v33, %v994_v37  ;;  %v4947_v50 = vcombine.low %v991_v38, %v995_v39  ;;  %v1042_v33 = vld [vmem:[#allocation8 + $0xa60] sm:$0xff]  ;;  %v1039_v37 = vld [vmem:[#allocation8 + $0xa48] sm:$0xff] }
 0x1a2   :  { %v1043_v38 = vld [vmem:[#allocation8 + $0xa68] sm:$0xff] }
 0x1a3   :  { %3892 = vmatpush1.bf16.msra.mxu0 %v4897_v45  ;;  %4056 = vmatpush1.bf16.msra.mxu1 %v4899_v46  ;;  %v998_v45 = vld [vmem:[#allocation8 + $0x900] sm:$0xff] }
 0x1a4   :  { %3893 = vmatprep.subr.bf16.mxu0 %v4906_v47  ;;  %4057 = vmatprep.subr.bf16.mxu1 %v4908_v48  ;;  %v1002_v46 = vld [vmem:[#allocation8 + $0x920] sm:$0xff]  ;;  %v999_v47 = vld [vmem:[#allocation8 + $0x908] sm:$0xff] }
 0x1a5   :  { %v1003_v48 = vld [vmem:[#allocation8 + $0x928] sm:$0xff]  ;;  %v4954_v51 = vcombine.high %v998_v45, %v1002_v46 }
 0x1a6   :  { %v4956_v52 = vcombine.high %v999_v47, %v1003_v48 }
 0x1a7   :  { %3894 = vmatpush1.bf16.msra.mxu0 %v4905_v57  ;;  %4058 = vmatpush1.bf16.msra.mxu1 %v4907_v59  ;;  %v1007_v57 = vld [vmem:[#allocation8 + $0x948] sm:$0xff] }
 0x1a8   :  { %3895 = vmatprep.subr.bf16.mxu0 %v4914_v60  ;;  %4059 = vmatprep.subr.bf16.mxu1 %v4916_v61  ;;  %v1011_v59 = vld [vmem:[#allocation8 + $0x968] sm:$0xff]  ;;  %v4953_v60 = vcombine.low %v998_v45, %v1002_v46  ;;  %v4955_v61 = vcombine.low %v999_v47, %v1003_v48  ;;  %v1050_v45 = vld [vmem:[#allocation8 + $0xaa0] sm:$0xff] }
 0x1a9   :  { %v4964_v63 = vcombine.high %v1007_v57, %v1011_v59  ;;  %v1047_v46 = vld [vmem:[#allocation8 + $0xa88] sm:$0xff] }
 0x1aa   :  { %v1051_v47 = vld [vmem:[#allocation8 + $0xaa8] sm:$0xff] }
 0x1ab   :  { %3896 = vmatpush1.bf16.msra.mxu0 %v4913_v5  ;;  %4060 = vmatpush1.bf16.msra.mxu1 %v4915_v6  ;;  %v4961_v5 = vcombine.low %v1006_v55, %v1010_v56  ;;  %v4963_v6 = vcombine.low %v1007_v57, %v1011_v59  ;;  %v1058_v55 = vld [vmem:[#allocation8 + $0xae0] sm:$0xff]  ;;  %v1055_v56 = vld [vmem:[#allocation8 + $0xac8] sm:$0xff] }
 0x1ac   :  { %3906 = vmatprep.subr.bf16.mxu0 %v4922_v35  ;;  %4070 = vmatprep.subr.bf16.mxu1 %v4924_v8  ;;  %v4970_v35 = vcombine.high %v1014_v0, %v1018_v2  ;;  %v4972_v8 = vcombine.high %v1015_v3, %v1019_v4  ;;  %v1059_v57 = vld [vmem:[#allocation8 + $0xae8] sm:$0xff]  ;;  %v1066_v0 = vld [vmem:[#allocation8 + $0xb20] sm:$0xff] }
 0x1ad   :  { %v1063_v2 = vld [vmem:[#allocation8 + $0xb08] sm:$0xff] }
 0x1ae   :  { %3898 = vmatmul.mubr.bf16.vlgmr.msra.gmra.mrb[8].mxu0 %v5568_v18  ;;  %4062 = vmatmul.mubr.bf16.vlgmr.msra.gmra.mrb[8].mxu1 %v5568_v18 }
 0x1af   :  { %3907 = vmatpush1.bf16.msra.mxu0 %v4921_v19  ;;  %4071 = vmatpush1.bf16.msra.mxu1 %v4923_v41  ;;  %v4971_v19 = vcombine.low %v1015_v3, %v1019_v4  ;;  %v4978_v41 = vcombine.high %v1022_v9, %v1026_v10  ;;  %v1067_v3 = vld [vmem:[#allocation8 + $0xb28] sm:$0xff]  ;;  %v1074_v9 = vld [vmem:[#allocation8 + $0xb60] sm:$0xff] }
 0x1b0   :  { %3908 = vmatprep.subr.bf16.mxu0 %v4930_v20  ;;  %4072 = vmatprep.subr.bf16.mxu1 %v4932_v22  ;;  %v4980_v20 = vcombine.high %v1023_v11, %v1027_v12  ;;  %v1030_v22 = vld [vmem:[#allocation8 + $0xa00] sm:$0xff]  ;;  %v1071_v10 = vld [vmem:[#allocation8 + $0xb48] sm:$0xff] }
 0x1b1   :  { %3938 = vmatprep.mubr.bf16.mxu0 %v5570_v27  ;;  %4102 = vmatprep.mubr.bf16.mxu1 %v5570_v27  ;;  %v4985_v39 = vcombine.low %v1030_v22, %v1034_v23 }
 0x1b3   :  { %3909 = vmatpush1.bf16.msra.mxu0 %v4929_v28  ;;  %4073 = vmatpush1.bf16.msra.mxu1 %v4931_v29  ;;  %v4979_v28 = vcombine.low %v1023_v11, %v1027_v12  ;;  %v4986_v29 = vcombine.high %v1030_v22, %v1034_v23  ;;  %v1075_v11 = vld [vmem:[#allocation8 + $0xb68] sm:$0xff]  ;;  %v5577_v12 = vsub.s32 4, %v5518_v14  ;;  %v1078_v22 = vld [vmem:[#allocation8 + $0xb80] sm:$0xff] }
 0x1b4   :  { %3910 = vmatprep.subr.bf16.mxu0 %v4938_v30  ;;  %4074 = vmatprep.subr.bf16.mxu1 %v4940_v32  ;;  %v4988_v30 = vcombine.high %v1031_v24, %v1035_v25  ;;  %v1038_v32 = vld [vmem:[#allocation8 + $0xa40] sm:$0xff] }
 0x1b5   :  { %v4993_v48 = vcombine.low %v1038_v32, %v1042_v33  ;;  %v1082_v23 = vld [vmem:[#allocation8 + $0xba0] sm:$0xff] }
 0x1b7   :  { %3911 = vmatpush1.bf16.msra.mxu0 %v4937_v7  ;;  %4075 = vmatpush1.bf16.msra.mxu1 %v4939_v42  ;;  %v4987_v7 = vcombine.low %v1031_v24, %v1035_v25  ;;  %v4994_v42 = vcombine.high %v1038_v32, %v1042_v33  ;;  %v1079_v24 = vld [vmem:[#allocation8 + $0xb88] sm:$0xff]  ;;  %v5034_v32 = vcombine.high %v1078_v22, %v1082_v23 }
 0x1b8   :  { %3912 = vmatprep.subr.bf16.mxu0 %v4946_v1  ;;  %4076 = vmatprep.subr.bf16.mxu1 %v4948_v44  ;;  %v4996_v1 = vcombine.high %v1039_v37, %v1043_v38  ;;  %v1046_v44 = vld [vmem:[#allocation8 + $0xa80] sm:$0xff]  ;;  %v1083_v25 = vld [vmem:[#allocation8 + $0xba8] sm:$0xff] }
 0x1b9   :  { %v5001_v59 = vcombine.low %v1046_v44, %v1050_v45  ;;  %v5036_v33 = vcombine.high %v1079_v24, %v1083_v25 }
 0x1bb   :  { %3913 = vmatpush1.bf16.msra.mxu0 %v4945_v49  ;;  %4077 = vmatpush1.bf16.msra.mxu1 %v4947_v50  ;;  %v4995_v49 = vcombine.low %v1039_v37, %v1043_v38  ;;  %v5002_v50 = vcombine.high %v1046_v44, %v1050_v45  ;;  %v1086_v37 = vld [vmem:[#allocation8 + $0xbc0] sm:$0xff]  ;;  %v5033_v44 = vcombine.low %v1078_v22, %v1082_v23  ;;  %v1119_v22 = vld [vmem:[#allocation8 + $0xcc8] sm:$0xff] }
 0x1bc   :  { %3914 = vmatprep.subr.bf16.mxu0 %v4954_v51  ;;  %4078 = vmatprep.subr.bf16.mxu1 %v4956_v52  ;;  %v5004_v51 = vcombine.high %v1047_v46, %v1051_v47  ;;  %v1054_v52 = vld [vmem:[#allocation8 + $0xac0] sm:$0xff]  ;;  %v5035_v45 = vcombine.low %v1079_v24, %v1083_v25  ;;  %v1123_v23 = vld [vmem:[#allocation8 + $0xce8] sm:$0xff] }
 0x1bd   :  { %v5009_v4 = vcombine.low %v1054_v52, %v1058_v55  ;;  %v1090_v38 = vld [vmem:[#allocation8 + $0xbe0] sm:$0xff] }
 0x1bf   :  { %3915 = vmatpush1.bf16.msra.mxu0 %v4953_v60  ;;  %4079 = vmatpush1.bf16.msra.mxu1 %v4955_v61  ;;  %v5003_v60 = vcombine.low %v1047_v46, %v1051_v47  ;;  %v5010_v61 = vcombine.high %v1054_v52, %v1058_v55  ;;  %v5042_v46 = vcombine.high %v1086_v37, %v1090_v38 }
 0x1c0   :  { %3916 = vmatprep.subr.bf16.mxu0 %v4962_v62  ;;  %4080 = vmatprep.subr.bf16.mxu1 %v4964_v63  ;;  %v5012_v62 = vcombine.high %v1055_v56, %v1059_v57  ;;  %v1062_v63 = vld [vmem:[#allocation8 + $0xb00] sm:$0xff] }
 0x1c3   :  { %3917 = vmatpush1.bf16.msra.mxu0 %v4961_v5  ;;  %4081 = vmatpush1.bf16.msra.mxu1 %v4963_v6  ;;  %v5011_v5 = vcombine.low %v1055_v56, %v1059_v57  ;;  %v5018_v6 = vcombine.high %v1062_v63, %v1066_v0 }
 0x1c4   :  { %3918 = vmatprep.subr.bf16.mxu0 %v4970_v35  ;;  %4082 = vmatprep.subr.bf16.mxu1 %v4972_v8  ;;  %v5020_v35 = vcombine.high %v1063_v2, %v1067_v3  ;;  %v1070_v8 = vld [vmem:[#allocation8 + $0xb40] sm:$0xff] }
 0x1c7   :  { %3919 = vmatpush1.bf16.msra.mxu0 %v4969_v13  ;;  %4083 = vmatpush1.bf16.msra.mxu1 %v4971_v19  ;;  %v5017_v13 = vcombine.low %v1062_v63, %v1066_v0  ;;  %v5019_v19 = vcombine.low %v1063_v2, %v1067_v3 }
 0x1c8   :  { %3920 = vmatprep.subr.bf16.mxu0 %v4978_v41  ;;  %4084 = vmatprep.subr.bf16.mxu1 %v4980_v20  ;;  %v5026_v41 = vcombine.high %v1070_v8, %v1074_v9  ;;  %v5028_v20 = vcombine.high %v1071_v10, %v1075_v11 }
 0x1cb   :  { %3921 = vmatpush1.bf16.msra.mxu0 %v4977_v26  ;;  %4085 = vmatpush1.bf16.msra.mxu1 %v4979_v28  ;;  %v200_v26 = vsub.s32 7, %v5518_v14  ;;  %v189_v28 = vrot.slane %v5523_v16, %v5577_v12 }
 0x1cc   :  { %3922 = vmatprep.subr.bf16.mxu0 %v4986_v29  ;;  %4086 = vmatprep.subr.bf16.mxu1 %v4988_v30  ;;  %v5025_v29 = vcombine.low %v1070_v8, %v1074_v9  ;;  %v5027_v30 = vcombine.low %v1071_v10, %v1075_v11  ;;  %v1115_v8 = vld [vmem:[#allocation8 + $0xca8] sm:$0xff] }
 0x1cf   :  { %3923 = vmatpush1.bf16.msra.mxu0 %v4985_v39  ;;  %4087 = vmatpush1.bf16.msra.mxu1 %v4987_v7  ;;  %v1087_v39 = vld [vmem:[#allocation8 + $0xbc8] sm:$0xff] }
 0x1d0   :  { %3924 = vmatprep.subr.bf16.mxu0 %v4994_v42  ;;  %4088 = vmatprep.subr.bf16.mxu1 %v4996_v1  ;;  %v1091_v7 = vld [vmem:[#allocation8 + $0xbe8] sm:$0xff]  ;;  %v201_v42 = vrot.slane %v5523_v16, %v200_v26  ;;  %v647_v1 = vadd.f32 %v5549_v40, %v189_v28  ;;  %v5041_v16 = vcombine.low %v1086_v37, %v1090_v38 }
 0x1d1   :  { %v5044_v47 = vcombine.high %v1087_v39, %v1091_v7  ;;  %v5043_v56 = vcombine.low %v1087_v39, %v1091_v7  ;;  %v1131_v37 = vld [vmem:[#allocation8 + $0xd28] sm:$0xff]  ;;  %v5075_v39 = vcombine.low %v1119_v22, %v1123_v23 }
 0x1d2   :  { %v690_v52 = vadd.f32 %v5555_v58, %v201_v42  ;;  %v698_v55 = vmax.f32 %v647_v1, 0.0  ;;  %v1134_v1 = vld [vmem:[#allocation8 + $0xd40] sm:$0xff] }
 0x1d3   :  { %3925 = vmatpush1.bf16.msra.mxu0 %v4993_v48  ;;  %4089 = vmatpush1.bf16.msra.mxu1 %v4995_v49  ;;  %v1094_v48 = vld [vmem:[#allocation8 + $0xc00] sm:$0xff] }
 0x1d4   :  { %3926 = vmatprep.subr.bf16.mxu0 %v5002_v50  ;;  %4090 = vmatprep.subr.bf16.mxu1 %v5004_v51  ;;  %v1098_v49 = vld [vmem:[#allocation8 + $0xc20] sm:$0xff]  ;;  %v1095_v50 = vld [vmem:[#allocation8 + $0xc08] sm:$0xff]  ;;  %v701_v63 = vmax.f32 %v690_v52, 0.0  ;;  %v5587_v0 = vpack.c.bf16 %v698_v55, %v698_v55 }
 0x1d5   :  { %v1099_v51 = vld [vmem:[#allocation8 + $0xc28] sm:$0xff]  ;;  %v5050_v40 = vcombine.high %v1094_v48, %v1098_v49  ;;  %v5049_v2 = vcombine.low %v1094_v48, %v1098_v49  ;;  %v1146_v52 = vld [vmem:[#allocation8 + $0xda0] sm:$0xff] }
 0x1d6   :  { %v5052_v57 = vcombine.high %v1095_v50, %v1099_v51  ;;  %v5051_v58 = vcombine.low %v1095_v50, %v1099_v51  ;;  %v5589_v9 = vpack.c.bf16 %v701_v63, %v701_v63  ;;  %v1142_v51 = vld [vmem:[#allocation8 + $0xd80] sm:$0xff]  ;;  %v1143_v55 = vld [vmem:[#allocation8 + $0xd88] sm:$0xff] }
 0x1d7   :  { %3927 = vmatpush1.bf16.msra.mxu0 %v5001_v59  ;;  %4091 = vmatpush1.bf16.msra.mxu1 %v5003_v60  ;;  %v1102_v59 = vld [vmem:[#allocation8 + $0xc40] sm:$0xff]  ;;  %v1155_v63 = vld [vmem:[#allocation8 + $0xde8] sm:$0xff] }
 0x1d8   :  { %3928 = vmatprep.subr.bf16.mxu0 %v5010_v61  ;;  %4092 = vmatprep.subr.bf16.mxu1 %v5012_v62  ;;  %v1106_v60 = vld [vmem:[#allocation8 + $0xc60] sm:$0xff]  ;;  %v1103_v61 = vld [vmem:[#allocation8 + $0xc48] sm:$0xff] }
 0x1d9   :  { %v1107_v62 = vld [vmem:[#allocation8 + $0xc68] sm:$0xff]  ;;  %v5058_v3 = vcombine.high %v1102_v59, %v1106_v60  ;;  %v5057_v10 = vcombine.low %v1102_v59, %v1106_v60  ;;  %v1150_v60 = vld [vmem:[#allocation8 + $0xdc0] sm:$0xff] }
 0x1da   :  { %v5059_v11 = vcombine.low %v1103_v61, %v1107_v62 }
 0x1db   :  { %3929 = vmatpush1.bf16.msra.mxu0 %v5009_v4  ;;  %4093 = vmatpush1.bf16.msra.mxu1 %v5011_v5  ;;  %v5060_v4 = vcombine.high %v1103_v61, %v1107_v62  ;;  %v1110_v5 = vld [vmem:[#allocation8 + $0xc80] sm:$0xff]  ;;  %v1151_v62 = vld [vmem:[#allocation8 + $0xdc8] sm:$0xff] }
 0x1dc   :  { %3930 = vmatprep.subr.bf16.mxu0 %v5018_v6  ;;  %4094 = vmatprep.subr.bf16.mxu1 %v5020_v35  ;;  %v1114_v6 = vld [vmem:[#allocation8 + $0xca0] sm:$0xff]  ;;  %v1111_v35 = vld [vmem:[#allocation8 + $0xc88] sm:$0xff] }
 0x1dd   :  { %v5065_v24 = vcombine.low %v1110_v5, %v1114_v6  ;;  %v5067_v25 = vcombine.low %v1111_v35, %v1115_v8  ;;  %v1154_v61 = vld [vmem:[#allocation8 + $0xde0] sm:$0xff] }
 0x1df   :  { %3931 = vmatpush1.bf16.msra.mxu0 %v5017_v13  ;;  %4095 = vmatpush1.bf16.msra.mxu1 %v5019_v19  ;;  %v5066_v13 = vcombine.high %v1110_v5, %v1114_v6  ;;  %v5068_v19 = vcombine.high %v1111_v35, %v1115_v8  ;;  %v1158_v5 = vld [vmem:[#allocation8 + $0xe00] sm:$0xff]  ;;  %v1159_v35 = vld [vmem:[#allocation8 + $0xe08] sm:$0xff] }
 0x1e0   :  { %3932 = vmatprep.subr.bf16.mxu0 %v5026_v41  ;;  %4096 = vmatprep.subr.bf16.mxu1 %v5028_v20  ;;  %v1118_v41 = vld [vmem:[#allocation8 + $0xcc0] sm:$0xff]  ;;  %v1163_v8 = vld [vmem:[#allocation8 + $0xe28] sm:$0xff] }
 0x1e1   :  { %v1122_v20 = vld [vmem:[#allocation8 + $0xce0] sm:$0xff] }
 0x1e2   :  { %v5074_v28 = vcombine.high %v1118_v41, %v1122_v20  ;;  %v5073_v38 = vcombine.low %v1118_v41, %v1122_v20  ;;  %v1162_v6 = vld [vmem:[#allocation8 + $0xe20] sm:$0xff] }
 0x1e3   :  { %3933 = vmatpush1.bf16.msra.mxu0 %v5025_v29  ;;  %4097 = vmatpush1.bf16.msra.mxu1 %v5027_v30  ;;  %v5076_v29 = vcombine.high %v1119_v22, %v1123_v23  ;;  %v1126_v30 = vld [vmem:[#allocation8 + $0xd00] sm:$0xff]  ;;  %v1167_v22 = vld [vmem:[#allocation8 + $0xe48] sm:$0xff] }
 0x1e4   :  { %3934 = vmatprep.subr.bf16.mxu0 %v5034_v32  ;;  %4098 = vmatprep.subr.bf16.mxu1 %v5036_v33  ;;  %v1130_v32 = vld [vmem:[#allocation8 + $0xd20] sm:$0xff]  ;;  %v1127_v33 = vld [vmem:[#allocation8 + $0xd08] sm:$0xff] }
 0x1e5   :  { %v5082_v7 = vcombine.high %v1126_v30, %v1130_v32  ;;  %v5084_v42 = vcombine.high %v1127_v33, %v1131_v37  ;;  %v5083_v48 = vcombine.low %v1127_v33, %v1131_v37  ;;  %v1166_v41 = vld [vmem:[#allocation8 + $0xe40] sm:$0xff]  ;;  %v1171_v23 = vld [vmem:[#allocation8 + $0xe68] sm:$0xff] }
 0x1e6   :  { %v1170_v20 = vld [vmem:[#allocation8 + $0xe60] sm:$0xff]  ;;  %v1175_v33 = vld [vmem:[#allocation8 + $0xe88] sm:$0xff] }
 0x1e7   :  { %3935 = vmatpush1.bf16.msra.mxu0 %v5033_v44  ;;  %4099 = vmatpush1.bf16.msra.mxu1 %v5035_v45  ;;  %v1138_v44 = vld [vmem:[#allocation8 + $0xd60] sm:$0xff]  ;;  %v1135_v45 = vld [vmem:[#allocation8 + $0xd48] sm:$0xff] }
 0x1e8   :  { %3936 = vmatprep.subr.bf16.mxu0 %v5042_v46  ;;  %4100 = vmatprep.subr.bf16.mxu1 %v5044_v47  ;;  %v1139_v46 = vld [vmem:[#allocation8 + $0xd68] sm:$0xff]  ;;  %v5081_v47 = vcombine.low %v1126_v30, %v1130_v32  ;;  %v5090_v49 = vcombine.high %v1134_v1, %v1138_v44  ;;  %v1174_v30 = vld [vmem:[#allocation8 + $0xe80] sm:$0xff] }
 0x1e9   :  { %v5092_v50 = vcombine.high %v1135_v45, %v1139_v46  ;;  %v1178_v32 = vld [vmem:[#allocation8 + $0xea0] sm:$0xff]  ;;  %v1179_v37 = vld [vmem:[#allocation8 + $0xea8] sm:$0xff] }
 0x1eb   :  { %3937 = vmatpush1.bf16.msra.mxu0 %v5041_v16  ;;  %4101 = vmatpush1.bf16.msra.mxu1 %v5043_v56  ;;  %v1147_v16 = vld [vmem:[#allocation8 + $0xda8] sm:$0xff]  ;;  %v5089_v56 = vcombine.low %v1134_v1, %v1138_v44  ;;  %v1182_v1 = vld [vmem:[#allocation8 + $0xec0] sm:$0xff] }
 0x1ec   :  { %3947 = vmatprep.subr.bf16.mxu0 %v5050_v40  ;;  %4111 = vmatprep.subr.bf16.mxu1 %v5052_v57  ;;  %v5091_v40 = vcombine.low %v1135_v45, %v1139_v46  ;;  %v5098_v57 = vcombine.high %v1142_v51, %v1146_v52  ;;  %v5100_v59 = vcombine.high %v1143_v55, %v1147_v16  ;;  %v1186_v44 = vld [vmem:[#allocation8 + $0xee0] sm:$0xff]  ;;  %v1183_v45 = vld [vmem:[#allocation8 + $0xec8] sm:$0xff] }
 0x1ed   :  { %v1187_v46 = vld [vmem:[#allocation8 + $0xee8] sm:$0xff] }
 0x1ee   :  { %3939 = vmatmul.mubr.bf16.vlgmr.msra.gmra.mrb[8].mxu0 %v5587_v0  ;;  %4103 = vmatmul.mubr.bf16.vlgmr.msra.gmra.mrb[8].mxu1 %v5587_v0 }
 0x1ef   :  { %3948 = vmatpush1.bf16.msra.mxu0 %v5049_v2  ;;  %4112 = vmatpush1.bf16.msra.mxu1 %v5051_v58  ;;  %v5097_v2 = vcombine.low %v1142_v51, %v1146_v52  ;;  %v5099_v58 = vcombine.low %v1143_v55, %v1147_v16  ;;  %v1190_v51 = vld [vmem:[#allocation8 + $0xf00] sm:$0xff]  ;;  %v1191_v55 = vld [vmem:[#allocation8 + $0xf08] sm:$0xff] }
 0x1f0   :  { %3949 = vmatprep.subr.bf16.mxu0 %v5058_v3  ;;  %4113 = vmatprep.subr.bf16.mxu1 %v5060_v4  ;;  %v5106_v3 = vcombine.high %v1150_v60, %v1154_v61  ;;  %v5108_v4 = vcombine.high %v1151_v62, %v1155_v63  ;;  %v1194_v52 = vld [vmem:[#allocation8 + $0xf20] sm:$0xff]  ;;  %v1195_v16 = vld [vmem:[#allocation8 + $0xf28] sm:$0xff] }
 0x1f1   :  { %3979 = vmatprep.mubr.bf16.mxu0 %v5589_v9  ;;  %4143 = vmatprep.mubr.bf16.mxu1 %v5589_v9 }
 0x1f3   :  { %3950 = vmatpush1.bf16.msra.mxu0 %v5057_v10  ;;  %4114 = vmatpush1.bf16.msra.mxu1 %v5059_v11  ;;  %v5105_v10 = vcombine.low %v1150_v60, %v1154_v61  ;;  %v5107_v11 = vcombine.low %v1151_v62, %v1155_v63  ;;  %v1198_v60 = vld [vmem:[#allocation8 + $0xf40] sm:$0xff]  ;;  %v1199_v62 = vld [vmem:[#allocation8 + $0xf48] sm:$0xff] }
 0x1f4   :  { %3951 = vmatprep.subr.bf16.mxu0 %v5066_v13  ;;  %4115 = vmatprep.subr.bf16.mxu1 %v5068_v19  ;;  %v5114_v13 = vcombine.high %v1158_v5, %v1162_v6  ;;  %v5116_v19 = vcombine.high %v1159_v35, %v1163_v8  ;;  %v1202_v61 = vld [vmem:[#allocation8 + $0xf60] sm:$0xff]  ;;  %v1203_v63 = vld [vmem:[#allocation8 + $0xf68] sm:$0xff] }
 0x1f7   :  { %3952 = vmatpush1.bf16.msra.mxu0 %v5065_v24  ;;  %4116 = vmatpush1.bf16.msra.mxu1 %v5067_v25  ;;  %v5113_v24 = vcombine.low %v1158_v5, %v1162_v6  ;;  %v5115_v25 = vcombine.low %v1159_v35, %v1163_v8  ;;  %v5156_v5 = vcombine.high %v1199_v62, %v1203_v63  ;;  %v1206_v6 = vld [vmem:[#allocation8 + $0xf80] sm:$0xff]  ;;  %v1207_v8 = vld [vmem:[#allocation8 + $0xf88] sm:$0xff] }
 0x1f8   :  { %3953 = vmatprep.subr.bf16.mxu0 %v5074_v28  ;;  %4117 = vmatprep.subr.bf16.mxu1 %v5076_v29  ;;  %v5122_v28 = vcombine.high %v1166_v41, %v1170_v20  ;;  %v5124_v29 = vcombine.high %v1167_v22, %v1171_v23  ;;  %v1210_v35 = vld [vmem:[#allocation8 + $0xfa0] sm:$0xff] }
 0x1fb   :  { %3954 = vmatpush1.bf16.msra.mxu0 %v5073_v38  ;;  %4118 = vmatpush1.bf16.msra.mxu1 %v5075_v39  ;;  %v5121_v38 = vcombine.low %v1166_v41, %v1170_v20  ;;  %v5123_v39 = vcombine.low %v1167_v22, %v1171_v23  ;;  %v5162_v20 = vcombine.high %v1206_v6, %v1210_v35  ;;  %v1214_v23 = vld [vmem:[#allocation8 + $0xfc0] sm:$0xff] }
 0x1fc   :  { %3955 = vmatprep.subr.bf16.mxu0 %v5082_v7  ;;  %4119 = vmatprep.subr.bf16.mxu1 %v5084_v42  ;;  %v5130_v7 = vcombine.high %v1174_v30, %v1178_v32  ;;  %v5132_v42 = vcombine.high %v1175_v33, %v1179_v37 }
 0x1ff   :  { %3956 = vmatpush1.bf16.msra.mxu0 %v5081_v47  ;;  %4120 = vmatpush1.bf16.msra.mxu1 %v5083_v48  ;;  %v5129_v47 = vcombine.low %v1174_v30, %v1178_v32  ;;  %v5131_v48 = vcombine.low %v1175_v33, %v1179_v37 }
 0x200   :  { %3957 = vmatprep.subr.bf16.mxu0 %v5090_v49  ;;  %4121 = vmatprep.subr.bf16.mxu1 %v5092_v50  ;;  %v5138_v49 = vcombine.high %v1182_v1, %v1186_v44  ;;  %v5140_v50 = vcombine.high %v1183_v45, %v1187_v46 }
 0x203   :  { %3958 = vmatpush1.bf16.msra.mxu0 %v5089_v56  ;;  %4122 = vmatpush1.bf16.msra.mxu1 %v5091_v40  ;;  %v5137_v56 = vcombine.low %v1182_v1, %v1186_v44  ;;  %v5139_v40 = vcombine.low %v1183_v45, %v1187_v46 }
 0x204   :  { %3959 = vmatprep.subr.bf16.mxu0 %v5098_v57  ;;  %4123 = vmatprep.subr.bf16.mxu1 %v5100_v59  ;;  %v5146_v57 = vcombine.high %v1190_v51, %v1194_v52  ;;  %v5148_v59 = vcombine.high %v1191_v55, %v1195_v16 }
 0x207   :  { %3960 = vmatpush1.bf16.msra.mxu0 %v5097_v2  ;;  %4124 = vmatpush1.bf16.msra.mxu1 %v5099_v58  ;;  %v5145_v2 = vcombine.low %v1190_v51, %v1194_v52  ;;  %v5147_v58 = vcombine.low %v1191_v55, %v1195_v16 }
 0x208   :  { %3961 = vmatprep.subr.bf16.mxu0 %v5106_v3  ;;  %4125 = vmatprep.subr.bf16.mxu1 %v5108_v4  ;;  %v5596_v3 = vsub.s32 6, %v5518_v14  ;;  %v5154_v4 = vcombine.high %v1198_v60, %v1202_v61 }
 0x20b   :  { %3962 = vmatpush1.bf16.msra.mxu0 %v5105_v10  ;;  %4126 = vmatpush1.bf16.msra.mxu1 %v5107_v11  ;;  %v1211_v10 = vld [vmem:[#allocation8 + $0xfa8] sm:$0xff]  ;;  %v5153_v11 = vcombine.low %v1198_v60, %v1202_v61  ;;  %v733_v60 = vld [vmem:[#allocation8 + $0xb8] sm:$0xff] }
 0x20c   :  { %3963 = vmatprep.subr.bf16.mxu0 %v5114_v13  ;;  %4127 = vmatprep.subr.bf16.mxu1 %v5116_v19  ;;  %v5155_v13 = vcombine.low %v1199_v62, %v1203_v63  ;;  %v5243_v19 = vld [vmem:[#allocation7] sm:$0xff]  ;;  %v5164_v22 = vcombine.high %v1207_v8, %v1211_v10  ;;  %v5163_v30 = vcombine.low %v1207_v8, %v1211_v10 }
 0x20d   :  { %v197_v41 = vrot.slane %v5243_v19, %v5596_v3  ;;  %v748_v19 = vld [vmem:[#allocation8 + $0x130] sm:$0xff] }
 0x20f   :  { %3964 = vmatpush1.bf16.msra.mxu0 %v5113_v24  ;;  %4128 = vmatpush1.bf16.msra.mxu1 %v5115_v25  ;;  %v1218_v24 = vld [vmem:[#allocation8 + $0xfe0] sm:$0xff]  ;;  %v1215_v25 = vld [vmem:[#allocation8 + $0xfc8] sm:$0xff]  ;;  %v688_v32 = vadd.f32 %v5553_v53, %v197_v41  ;;  %v721_v53 = vld [vmem:[#allocation8 + $0x58] sm:$0xff] }
 0x210   :  { %3965 = vmatprep.subr.bf16.mxu0 %v5122_v28  ;;  %4129 = vmatprep.subr.bf16.mxu1 %v5124_v29  ;;  %v1219_v28 = vld [vmem:[#allocation8 + $0xfe8] sm:$0xff]  ;;  %v5161_v29 = vcombine.low %v1206_v6, %v1210_v35  ;;  %v5170_v33 = vcombine.high %v1214_v23, %v1218_v24  ;;  %v5169_v1 = vcombine.low %v1214_v23, %v1218_v24  ;;  %v741_v6 = vld [vmem:[#allocation8 + $0xf8] sm:$0xff] }
 0x211   :  { %v5172_v37 = vcombine.high %v1215_v25, %v1219_v28  ;;  %v5171_v44 = vcombine.low %v1215_v25, %v1219_v28  ;;  %v700_v45 = vmax.f32 %v688_v32, 0.0  ;;  %v749_v41 = vld [vmem:[#allocation8 + $0x138] sm:$0xff]  ;;  %v752_v25 = vld [vmem:[#allocation8 + $0x150] sm:$0xff] }
 0x212   :  { %v756_v28 = vld [vmem:[#allocation8 + $0x170] sm:$0xff] }
 0x213   :  { %3966 = vmatpush1.bf16.msra.mxu0 %v5121_v38  ;;  %4130 = vmatpush1.bf16.msra.mxu1 %v5123_v39  ;;  %v712_v38 = vld [vmem:[#allocation8 + $0x10] sm:$0xff]  ;;  %v5600_v52 = vpack.c.bf16 %v700_v45, %v700_v45 }
 0x214   :  { %3967 = vmatprep.subr.bf16.mxu0 %v5130_v7  ;;  %4131 = vmatprep.subr.bf16.mxu1 %v5132_v42  ;;  %v716_v39 = vld [vmem:[#allocation8 + $0x30] sm:$0xff]  ;;  %v713_v7 = vld [vmem:[#allocation8 + $0x18] sm:$0xff] }
 0x215   :  { %v717_v42 = vld [vmem:[#allocation8 + $0x38] sm:$0xff]  ;;  %v4670_v46 = vcombine.high %v712_v38, %v716_v39  ;;  %v4669_v51 = vcombine.low %v712_v38, %v716_v39  ;;  %v760_v39 = vld [vmem:[#allocation8 + $0x190] sm:$0xff] }
 0x216   :  { %v4671_v55 = vcombine.low %v713_v7, %v717_v42 }
 0x217   :  { %3968 = vmatpush1.bf16.msra.mxu0 %v5129_v47  ;;  %4132 = vmatpush1.bf16.msra.mxu1 %v5131_v48  ;;  %v4672_v47 = vcombine.high %v713_v7, %v717_v42  ;;  %v720_v48 = vld [vmem:[#allocation8 + $0x50] sm:$0xff]  ;;  %v761_v42 = vld [vmem:[#allocation8 + $0x198] sm:$0xff] }
 0x218   :  { %3969 = vmatprep.subr.bf16.mxu0 %v5138_v49  ;;  %4133 = vmatprep.subr.bf16.mxu1 %v5140_v50  ;;  %v724_v49 = vld [vmem:[#allocation8 + $0x70] sm:$0xff]  ;;  %v725_v50 = vld [vmem:[#allocation8 + $0x78] sm:$0xff] }
 0x219   :  { %v4678_v16 = vcombine.high %v720_v48, %v724_v49  ;;  %v4677_v61 = vcombine.low %v720_v48, %v724_v49  ;;  %v4679_v62 = vcombine.low %v721_v53, %v725_v50  ;;  %v764_v7 = vld [vmem:[#allocation8 + $0x1b0] sm:$0xff] }
 0x21a   :  { %v768_v48 = vld [vmem:[#allocation8 + $0x1d0] sm:$0xff] }
 0x21b   :  { %3970 = vmatpush1.bf16.msra.mxu0 %v5137_v56  ;;  %4134 = vmatpush1.bf16.msra.mxu1 %v5139_v40  ;;  %v4680_v56 = vcombine.high %v721_v53, %v725_v50  ;;  %v728_v40 = vld [vmem:[#allocation8 + $0x90] sm:$0xff]  ;;  %v769_v53 = vld [vmem:[#allocation8 + $0x1d8] sm:$0xff] }
 0x21c   :  { %3971 = vmatprep.subr.bf16.mxu0 %v5146_v57  ;;  %4135 = vmatprep.subr.bf16.mxu1 %v5148_v59  ;;  %v732_v57 = vld [vmem:[#allocation8 + $0xb0] sm:$0xff]  ;;  %v729_v59 = vld [vmem:[#allocation8 + $0x98] sm:$0xff] }
 0x21d   :  { %v4686_v63 = vcombine.high %v728_v40, %v732_v57  ;;  %v4685_v35 = vcombine.low %v728_v40, %v732_v57  ;;  %v4687_v8 = vcombine.low %v729_v59, %v733_v60  ;;  %v772_v49 = vld [vmem:[#allocation8 + $0x1f0] sm:$0xff]  ;;  %v773_v50 = vld [vmem:[#allocation8 + $0x1f8] sm:$0xff] }
 0x21e   :  { %v776_v40 = vld [vmem:[#allocation8 + $0x210] sm:$0xff] }
 0x21f   :  { %3972 = vmatpush1.bf16.msra.mxu0 %v5145_v2  ;;  %4136 = vmatpush1.bf16.msra.mxu1 %v5147_v58  ;;  %v4688_v2 = vcombine.high %v729_v59, %v733_v60  ;;  %v736_v58 = vld [vmem:[#allocation8 + $0xd0] sm:$0xff]  ;;  %v777_v59 = vld [vmem:[#allocation8 + $0x218] sm:$0xff] }
 0x220   :  { %3973 = vmatprep.subr.bf16.mxu0 %v5154_v4  ;;  %4137 = vmatprep.subr.bf16.mxu1 %v5156_v5  ;;  %v740_v4 = vld [vmem:[#allocation8 + $0xf0] sm:$0xff]  ;;  %v737_v5 = vld [vmem:[#allocation8 + $0xd8] sm:$0xff] }
 0x221   :  { %v4694_v10 = vcombine.high %v736_v58, %v740_v4  ;;  %v780_v57 = vld [vmem:[#allocation8 + $0x230] sm:$0xff]  ;;  %v781_v60 = vld [vmem:[#allocation8 + $0x238] sm:$0xff] }
 0x223   :  { %3974 = vmatpush1.bf16.msra.mxu0 %v5153_v11  ;;  %4138 = vmatpush1.bf16.msra.mxu1 %v5155_v13  ;;  %v4696_v11 = vcombine.high %v737_v5, %v741_v6  ;;  %v744_v13 = vld [vmem:[#allocation8 + $0x110] sm:$0xff] }
 0x224   :  { %3975 = vmatprep.subr.bf16.mxu0 %v5162_v20  ;;  %4139 = vmatprep.subr.bf16.mxu1 %v5164_v22  ;;  %v4693_v20 = vcombine.low %v736_v58, %v740_v4  ;;  %v4695_v22 = vcombine.low %v737_v5, %v741_v6  ;;  %v4702_v23 = vcombine.high %v744_v13, %v748_v19  ;;  %v784_v58 = vld [vmem:[#allocation8 + $0x250] sm:$0xff]  ;;  %v785_v5 = vld [vmem:[#allocation8 + $0x258] sm:$0xff] }
 0x225   :  { %v4701_v32 = vcombine.low %v744_v13, %v748_v19  ;;  %v788_v4 = vld [vmem:[#allocation8 + $0x270] sm:$0xff]  ;;  %v789_v6 = vld [vmem:[#allocation8 + $0x278] sm:$0xff] }
 0x226   :  { %v792_v13 = vld [vmem:[#allocation8 + $0x290] sm:$0xff] }
 0x227   :  { %3976 = vmatpush1.bf16.msra.mxu0 %v5161_v29  ;;  %4140 = vmatpush1.bf16.msra.mxu1 %v5163_v30  ;;  %v753_v29 = vld [vmem:[#allocation8 + $0x158] sm:$0xff]  ;;  %v796_v19 = vld [vmem:[#allocation8 + $0x2b0] sm:$0xff] }
 0x228   :  { %3977 = vmatprep.subr.bf16.mxu0 %v5170_v33  ;;  %4141 = vmatprep.subr.bf16.mxu1 %v5172_v37  ;;  %v757_v30 = vld [vmem:[#allocation8 + $0x178] sm:$0xff]  ;;  %v4710_v37 = vcombine.high %v752_v25, %v756_v28 }
 0x229   :  { %v4712_v38 = vcombine.high %v753_v29, %v757_v30  ;;  %v4711_v45 = vcombine.low %v753_v29, %v757_v30  ;;  %v801_v29 = vld [vmem:[#allocation8 + $0x2d8] sm:$0xff] }
 0x22a   :  { %v805_v30 = vld [vmem:[#allocation8 + $0x2f8] sm:$0xff] }
 0x22b   :  { %3978 = vmatpush1.bf16.msra.mxu0 %v5169_v1  ;;  %4142 = vmatpush1.bf16.msra.mxu1 %v5171_v44  ;;  %v765_v1 = vld [vmem:[#allocation8 + $0x1b8] sm:$0xff]  ;;  %v4709_v44 = vcombine.low %v752_v25, %v756_v28  ;;  %v800_v25 = vld [vmem:[#allocation8 + $0x2d0] sm:$0xff] }
 0x22c   :  { %4152 = vmatprep.subr.bf16.mxu0 %v4670_v46  ;;  %4316 = vmatprep.subr.bf16.mxu1 %v4672_v47  ;;  %v4718_v46 = vcombine.high %v760_v39, %v764_v7  ;;  %v4720_v47 = vcombine.high %v761_v42, %v765_v1  ;;  %v804_v28 = vld [vmem:[#allocation8 + $0x2f0] sm:$0xff] }
 0x22e   :  { %3980 = vmatmul.mubr.bf16.vlgmr.msra.gmra.mrb[8].mxu0 %v5600_v52  ;;  %4144 = vmatmul.mubr.bf16.vlgmr.msra.gmra.mrb[8].mxu1 %v5600_v52 }
 0x22f   :  { %4153 = vmatpush1.bf16.msra.mxu0 %v4669_v51  ;;  %4184 = vmatprep.mubr.bf16.mxu0 %v5535_v34  ;;  %v4717_v51 = vcombine.low %v760_v39, %v764_v7  ;;  %v808_v39 = vld [vmem:[#allocation8 + $0x310] sm:$0xff] }
 0x230   :  { %4317 = vmatpush1.bf16.msra.mxu1 %v4671_v55  ;;  %4348 = vmatprep.mubr.bf16.mxu1 %v5535_v34  ;;  %v745_v34 = vld [vmem:[#allocation8 + $0x118] sm:$0xff]  ;;  %v4719_v55 = vcombine.low %v761_v42, %v765_v1  ;;  %v812_v7 = vld [vmem:[#allocation8 + $0x330] sm:$0xff] }
 0x231   :  { %4154 = vmatprep.subr.bf16.mxu0 %v4678_v16  ;;  %4318 = vmatprep.subr.bf16.mxu1 %v4680_v56  ;;  %v4704_v24 = vcombine.high %v745_v34, %v749_v41  ;;  %v4703_v33 = vcombine.low %v745_v34, %v749_v41  ;;  %v4726_v16 = vcombine.high %v768_v48, %v772_v49  ;;  %v793_v34 = vld [vmem:[#allocation8 + $0x298] sm:$0xff] }
 0x232   :  { %v4728_v56 = vcombine.high %v769_v53, %v773_v50  ;;  %v797_v41 = vld [vmem:[#allocation8 + $0x2b8] sm:$0xff] }
 0x233   :  { %4155 = vmatpush1.bf16.msra.mxu0 %v4677_v61  ;;  %v4725_v61 = vcombine.low %v768_v48, %v772_v49  ;;  %v809_v42 = vld [vmem:[#allocation8 + $0x318] sm:$0xff]  ;;  %v816_v48 = vld [vmem:[#allocation8 + $0x350] sm:$0xff] }
 0x234   :  { %4319 = vmatpush1.bf16.msra.mxu1 %v4679_v62  ;;  %4156 = vmatprep.subr.bf16.mxu0 %v4686_v63  ;;  %v4727_v62 = vcombine.low %v769_v53, %v773_v50  ;;  %v4734_v63 = vcombine.high %v776_v40, %v780_v57  ;;  %v813_v1 = vld [vmem:[#allocation8 + $0x338] sm:$0xff]  ;;  %v820_v49 = vld [vmem:[#allocation8 + $0x370] sm:$0xff] }
 0x235   :  { %4320 = vmatprep.subr.bf16.mxu1 %v4688_v2  ;;  %v4736_v2 = vcombine.high %v777_v59, %v781_v60  ;;  %v817_v53 = vld [vmem:[#allocation8 + $0x358] sm:$0xff] }
 0x236   :  { %v821_v50 = vld [vmem:[#allocation8 + $0x378] sm:$0xff] }
 0x237   :  { %4157 = vmatpush1.bf16.msra.mxu0 %v4685_v35  ;;  %v4733_v35 = vcombine.low %v776_v40, %v780_v57  ;;  %v824_v40 = vld [vmem:[#allocation8 + $0x390] sm:$0xff] }
 0x238   :  { %4321 = vmatpush1.bf16.msra.mxu1 %v4687_v8  ;;  %4158 = vmatprep.subr.bf16.mxu0 %v4694_v10  ;;  %v4735_v8 = vcombine.low %v777_v59, %v781_v60  ;;  %v4742_v10 = vcombine.high %v784_v58, %v788_v4  ;;  %v828_v57 = vld [vmem:[#allocation8 + $0x3b0] sm:$0xff]  ;;  %v825_v59 = vld [vmem:[#allocation8 + $0x398] sm:$0xff] }
 0x239   :  { %4322 = vmatprep.subr.bf16.mxu1 %v4696_v11  ;;  %v4744_v11 = vcombine.high %v785_v5, %v789_v6  ;;  %v829_v60 = vld [vmem:[#allocation8 + $0x3b8] sm:$0xff] }
 0x23b   :  { %4159 = vmatpush1.bf16.msra.mxu0 %v4693_v20  ;;  %v4741_v20 = vcombine.low %v784_v58, %v788_v4  ;;  %v832_v58 = vld [vmem:[#allocation8 + $0x3d0] sm:$0xff] }
 0x23c   :  { %4323 = vmatpush1.bf16.msra.mxu1 %v4695_v22  ;;  %4160 = vmatprep.subr.bf16.mxu0 %v4702_v23  ;;  %v4743_v22 = vcombine.low %v785_v5, %v789_v6  ;;  %v4750_v23 = vcombine.high %v792_v13, %v796_v19  ;;  %v836_v4 = vld [vmem:[#allocation8 + $0x3f0] sm:$0xff]  ;;  %v833_v5 = vld [vmem:[#allocation8 + $0x3d8] sm:$0xff] }
 0x23d   :  { %4324 = vmatprep.subr.bf16.mxu1 %v4704_v24  ;;  %v4752_v24 = vcombine.high %v793_v34, %v797_v41  ;;  %v837_v6 = vld [vmem:[#allocation8 + $0x3f8] sm:$0xff] }
 0x23f   :  { %4161 = vmatpush1.bf16.msra.mxu0 %v4701_v32  ;;  %v4749_v32 = vcombine.low %v792_v13, %v796_v19  ;;  %v840_v13 = vld [vmem:[#allocation8 + $0x410] sm:$0xff] }
 0x240   :  { %4325 = vmatpush1.bf16.msra.mxu1 %v4703_v33  ;;  %4162 = vmatprep.subr.bf16.mxu0 %v4710_v37  ;;  %v4751_v33 = vcombine.low %v793_v34, %v797_v41  ;;  %v4758_v37 = vcombine.high %v800_v25, %v804_v28  ;;  %v844_v19 = vld [vmem:[#allocation8 + $0x430] sm:$0xff]  ;;  %v841_v34 = vld [vmem:[#allocation8 + $0x418] sm:$0xff] }
 0x241   :  { %4326 = vmatprep.subr.bf16.mxu1 %v4712_v38  ;;  %v4760_v38 = vcombine.high %v801_v29, %v805_v30  ;;  %v845_v41 = vld [vmem:[#allocation8 + $0x438] sm:$0xff] }
 0x243   :  { %4163 = vmatpush1.bf16.msra.mxu0 %v4709_v44  ;;  %v4757_v44 = vcombine.low %v800_v25, %v804_v28  ;;  %v848_v25 = vld [vmem:[#allocation8 + $0x450] sm:$0xff] }
 0x244   :  { %4327 = vmatpush1.bf16.msra.mxu1 %v4711_v45  ;;  %4164 = vmatprep.subr.bf16.mxu0 %v4718_v46  ;;  %v4759_v45 = vcombine.low %v801_v29, %v805_v30  ;;  %v4766_v46 = vcombine.high %v808_v39, %v812_v7  ;;  %v852_v28 = vld [vmem:[#allocation8 + $0x470] sm:$0xff]  ;;  %v4797_v29 = vcombine.low %v840_v13, %v844_v19  ;;  %v849_v30 = vld [vmem:[#allocation8 + $0x458] sm:$0xff] }
 0x245   :  { %4328 = vmatprep.subr.bf16.mxu1 %v4720_v47  ;;  %v4768_v47 = vcombine.high %v809_v42, %v813_v1 }
 0x247   :  { %4165 = vmatpush1.bf16.msra.mxu0 %v4717_v51  ;;  %v4765_v51 = vcombine.low %v808_v39, %v812_v7  ;;  %v860_v39 = vld [vmem:[#allocation8 + $0x4b0] sm:$0xff] }
 0x248   :  { %4329 = vmatpush1.bf16.msra.mxu1 %v4719_v55  ;;  %4166 = vmatprep.subr.bf16.mxu0 %v4726_v16  ;;  %v4767_v55 = vcombine.low %v809_v42, %v813_v1  ;;  %v4774_v16 = vcombine.high %v816_v48, %v820_v49  ;;  %v857_v42 = vld [vmem:[#allocation8 + $0x498] sm:$0xff] }
 0x249   :  { %4330 = vmatprep.subr.bf16.mxu1 %v4728_v56  ;;  %v4776_v56 = vcombine.high %v817_v53, %v821_v50  ;;  %v861_v1 = vld [vmem:[#allocation8 + $0x4b8] sm:$0xff] }
 0x24b   :  { %4167 = vmatpush1.bf16.msra.mxu0 %v4725_v61  ;;  %v4773_v61 = vcombine.low %v816_v48, %v820_v49  ;;  %v864_v48 = vld [vmem:[#allocation8 + $0x4d0] sm:$0xff] }
 0x24c   :  { %4331 = vmatpush1.bf16.msra.mxu1 %v4727_v62  ;;  %4168 = vmatprep.subr.bf16.mxu0 %v4734_v63  ;;  %v4775_v62 = vcombine.low %v817_v53, %v821_v50  ;;  %v4782_v63 = vcombine.high %v824_v40, %v828_v57  ;;  %v868_v49 = vld [vmem:[#allocation8 + $0x4f0] sm:$0xff]  ;;  %v865_v53 = vld [vmem:[#allocation8 + $0x4d8] sm:$0xff] }
 0x24d   :  { %4332 = vmatprep.subr.bf16.mxu1 %v4736_v2  ;;  %v4784_v2 = vcombine.high %v825_v59, %v829_v60  ;;  %v869_v50 = vld [vmem:[#allocation8 + $0x4f8] sm:$0xff] }
 0x24f   :  { %4169 = vmatpush1.bf16.msra.mxu0 %v4733_v35  ;;  %v4781_v35 = vcombine.low %v824_v40, %v828_v57  ;;  %v876_v40 = vld [vmem:[#allocation8 + $0x530] sm:$0xff]  ;;  %v873_v57 = vld [vmem:[#allocation8 + $0x518] sm:$0xff] }
 0x250   :  { %4333 = vmatpush1.bf16.msra.mxu1 %v4735_v8  ;;  %4170 = vmatprep.subr.bf16.mxu0 %v4742_v10  ;;  %v4783_v8 = vcombine.low %v825_v59, %v829_v60  ;;  %v4790_v10 = vcombine.high %v832_v58, %v836_v4  ;;  %v877_v59 = vld [vmem:[#allocation8 + $0x538] sm:$0xff]  ;;  %v4823_v60 = vcombine.low %v865_v53, %v869_v50 }
 0x251   :  { %4334 = vmatprep.subr.bf16.mxu1 %v4744_v11  ;;  %v4792_v11 = vcombine.high %v833_v5, %v837_v6 }
 0x253   :  { %4171 = vmatpush1.bf16.msra.mxu0 %v4741_v20  ;;  %v4789_v20 = vcombine.low %v832_v58, %v836_v4  ;;  %v881_v58 = vld [vmem:[#allocation8 + $0x558] sm:$0xff] }
 0x254   :  { %4335 = vmatpush1.bf16.msra.mxu1 %v4743_v22  ;;  %4172 = vmatprep.subr.bf16.mxu0 %v4750_v23  ;;  %v4791_v22 = vcombine.low %v833_v5, %v837_v6  ;;  %v4798_v23 = vcombine.high %v840_v13, %v844_v19  ;;  %v885_v4 = vld [vmem:[#allocation8 + $0x578] sm:$0xff]  ;;  %v4831_v6 = vcombine.low %v873_v57, %v877_v59 }
 0x255   :  { %4336 = vmatprep.subr.bf16.mxu1 %v4752_v24  ;;  %v4800_v24 = vcombine.high %v841_v34, %v845_v41  ;;  %v889_v13 = vld [vmem:[#allocation8 + $0x598] sm:$0xff] }
 0x256   :  { %v893_v19 = vld [vmem:[#allocation8 + $0x5b8] sm:$0xff] }
 0x257   :  { %4173 = vmatpush1.bf16.msra.mxu0 %v4749_v32  ;;  %v853_v32 = vld [vmem:[#allocation8 + $0x478] sm:$0xff] }
 0x258   :  { %4337 = vmatpush1.bf16.msra.mxu1 %v4751_v33  ;;  %4174 = vmatprep.subr.bf16.mxu0 %v4758_v37  ;;  %v4799_v33 = vcombine.low %v841_v34, %v845_v41  ;;  %v4806_v37 = vcombine.high %v848_v25, %v852_v28  ;;  %v4808_v7 = vcombine.high %v849_v30, %v853_v32 }
 0x259   :  { %4338 = vmatprep.subr.bf16.mxu1 %v4760_v38  ;;  %v856_v38 = vld [vmem:[#allocation8 + $0x490] sm:$0xff]  ;;  %v4839_v41 = vcombine.low %v881_v58, %v885_v4 }
 0x25b   :  { %4175 = vmatpush1.bf16.msra.mxu0 %v4757_v44  ;;  %v4805_v44 = vcombine.low %v848_v25, %v852_v28  ;;  %v897_v25 = vld [vmem:[#allocation8 + $0x5d8] sm:$0xff] }
 0x25c   :  { %4339 = vmatpush1.bf16.msra.mxu1 %v4759_v45  ;;  %4176 = vmatprep.subr.bf16.mxu0 %v4766_v46  ;;  %v4807_v45 = vcombine.low %v849_v30, %v853_v32  ;;  %v4814_v46 = vcombine.high %v856_v38, %v860_v39  ;;  %v901_v28 = vld [vmem:[#allocation8 + $0x5f8] sm:$0xff]  ;;  %v4847_v30 = vcombine.low %v889_v13, %v893_v19 }
 0x25d   :  { %4340 = vmatprep.subr.bf16.mxu1 %v4768_v47  ;;  %v4816_v47 = vcombine.high %v857_v42, %v861_v1 }
 0x25f   :  { %4177 = vmatpush1.bf16.msra.mxu0 %v4765_v51  ;;  %v4813_v51 = vcombine.low %v856_v38, %v860_v39  ;;  %v908_v38 = vld [vmem:[#allocation8 + $0x630] sm:$0xff]  ;;  %v905_v39 = vld [vmem:[#allocation8 + $0x618] sm:$0xff] }
 0x260   :  { %4341 = vmatpush1.bf16.msra.mxu1 %v4767_v55  ;;  %4178 = vmatprep.subr.bf16.mxu0 %v4774_v16  ;;  %v4822_v55 = vcombine.high %v864_v48, %v868_v49  ;;  %v4824_v16 = vcombine.high %v865_v53, %v869_v50 }
 0x261   :  { %4342 = vmatprep.subr.bf16.mxu1 %v4776_v56  ;;  %v872_v56 = vld [vmem:[#allocation8 + $0x510] sm:$0xff] }
 0x262   :  { %v4829_v5 = vcombine.low %v872_v56, %v876_v40 }
 0x263   :  { %4179 = vmatpush1.bf16.msra.mxu0 %v4773_v61  ;;  %v4830_v61 = vcombine.high %v872_v56, %v876_v40  ;;  %v921_v56 = vld [vmem:[#allocation8 + $0x698] sm:$0xff] }
 0x264   :  { %4343 = vmatpush1.bf16.msra.mxu1 %v4775_v62  ;;  %4180 = vmatprep.subr.bf16.mxu0 %v4782_v63  ;;  %v4832_v62 = vcombine.high %v873_v57, %v877_v59  ;;  %v880_v63 = vld [vmem:[#allocation8 + $0x550] sm:$0xff]  ;;  %v925_v40 = vld [vmem:[#allocation8 + $0x6b8] sm:$0xff] }
 0x265   :  { %4344 = vmatprep.subr.bf16.mxu1 %v4784_v2  ;;  %v884_v2 = vld [vmem:[#allocation8 + $0x570] sm:$0xff] }
 0x266   :  { %v4837_v34 = vcombine.low %v880_v63, %v884_v2 }
 0x267   :  { %4181 = vmatpush1.bf16.msra.mxu0 %v4781_v35  ;;  %v4838_v35 = vcombine.high %v880_v63, %v884_v2  ;;  %v929_v63 = vld [vmem:[#allocation8 + $0x6d8] sm:$0xff] }
 0x268   :  { %4345 = vmatpush1.bf16.msra.mxu1 %v4783_v8  ;;  %4182 = vmatprep.subr.bf16.mxu0 %v4790_v10  ;;  %v4840_v8 = vcombine.high %v881_v58, %v885_v4  ;;  %v888_v10 = vld [vmem:[#allocation8 + $0x590] sm:$0xff]  ;;  %v933_v2 = vld [vmem:[#allocation8 + $0x6f8] sm:$0xff]  ;;  %v4879_v4 = vcombine.low %v921_v56, %v925_v40 }
 0x269   :  { %4346 = vmatprep.subr.bf16.mxu1 %v4792_v11  ;;  %v892_v11 = vld [vmem:[#allocation8 + $0x5b0] sm:$0xff] }
 0x26b   :  { %4183 = vmatpush1.bf16.msra.mxu0 %v4789_v20  ;;  %v4846_v20 = vcombine.high %v888_v10, %v892_v11 }
 0x26c   :  { %4347 = vmatpush1.bf16.msra.mxu1 %v4791_v22  ;;  %4193 = vmatprep.subr.bf16.mxu0 %v4798_v23  ;;  %v4848_v22 = vcombine.high %v889_v13, %v893_v19  ;;  %v896_v23 = vld [vmem:[#allocation8 + $0x5d0] sm:$0xff]  ;;  %v4887_v19 = vcombine.low %v929_v63, %v933_v2 }
 0x26d   :  { %4357 = vmatprep.subr.bf16.mxu1 %v4800_v24  ;;  %v900_v24 = vld [vmem:[#allocation8 + $0x5f0] sm:$0xff] }
 0x26e   :  { %4185 = vmatmul.mubr.bf16.vlgmr.msra.gmra.mrb[12].mxu0 %v5539_v36  ;;  %v4854_v32 = vcombine.high %v896_v23, %v900_v24 }
 0x26f   :  { %4349 = vmatmul.mubr.bf16.vlgmr.msra.gmra.mrb[12].mxu1 %v5539_v36  ;;  %4194 = vmatpush1.bf16.msra.mxu0 %v4797_v29  ;;  %v4815_v36 = vcombine.low %v857_v42, %v861_v1  ;;  %v4845_v29 = vcombine.low %v888_v10, %v892_v11  ;;  %v4853_v42 = vcombine.low %v896_v23, %v900_v24  ;;  %v937_v10 = vld [vmem:[#allocation8 + $0x718] sm:$0xff] }
 0x270   :  { %4225 = vmatprep.mubr.bf16.mxu0 %v5545_v54  ;;  %4358 = vmatpush1.bf16.msra.mxu1 %v4799_v33  ;;  %v4856_v33 = vcombine.high %v897_v25, %v901_v28  ;;  %v4855_v1 = vcombine.low %v897_v25, %v901_v28  ;;  %v941_v11 = vld [vmem:[#allocation8 + $0x738] sm:$0xff] }
 0x271   :  { %4389 = vmatprep.mubr.bf16.mxu1 %v5545_v54  ;;  %4195 = vmatprep.subr.bf16.mxu0 %v4806_v37  ;;  %v4821_v54 = vcombine.low %v864_v48, %v868_v49  ;;  %v904_v37 = vld [vmem:[#allocation8 + $0x610] sm:$0xff]  ;;  %v913_v48 = vld [vmem:[#allocation8 + $0x658] sm:$0xff]  ;;  %v4895_v28 = vcombine.low %v937_v10, %v941_v11 }
 0x272   :  { %4359 = vmatprep.subr.bf16.mxu1 %v4808_v7  ;;  %v909_v7 = vld [vmem:[#allocation8 + $0x638] sm:$0xff]  ;;  %v4861_v53 = vcombine.low %v904_v37, %v908_v38 }
 0x273   :  { %4196 = vmatpush1.bf16.msra.mxu0 %v4805_v44  ;;  %v4862_v44 = vcombine.high %v904_v37, %v908_v38  ;;  %v917_v49 = vld [vmem:[#allocation8 + $0x678] sm:$0xff]  ;;  %v4863_v50 = vcombine.low %v905_v39, %v909_v7 }
 0x274   :  { %4360 = vmatpush1.bf16.msra.mxu1 %v4807_v45  ;;  %4197 = vmatprep.subr.bf16.mxu0 %v4814_v46  ;;  %v4864_v45 = vcombine.high %v905_v39, %v909_v7  ;;  %v912_v46 = vld [vmem:[#allocation8 + $0x650] sm:$0xff]  ;;  %v4871_v59 = vcombine.low %v913_v48, %v917_v49  ;;  %v945_v23 = vld [vmem:[#allocation8 + $0x758] sm:$0xff] }
 0x275   :  { %4361 = vmatprep.subr.bf16.mxu1 %v4816_v47  ;;  %v916_v47 = vld [vmem:[#allocation8 + $0x670] sm:$0xff]  ;;  %v949_v24 = vld [vmem:[#allocation8 + $0x778] sm:$0xff] }
 0x276   :  { %v4869_v57 = vcombine.low %v912_v46, %v916_v47  ;;  %v953_v37 = vld [vmem:[#allocation8 + $0x798] sm:$0xff]  ;;  %v4903_v7 = vcombine.low %v945_v23, %v949_v24 }
 0x277   :  { %4198 = vmatpush1.bf16.msra.mxu0 %v4813_v51  ;;  %v4870_v51 = vcombine.high %v912_v46, %v916_v47  ;;  %v957_v38 = vld [vmem:[#allocation8 + $0x7b8] sm:$0xff] }
 0x278   :  { %4362 = vmatpush1.bf16.msra.mxu1 %v4815_v36  ;;  %4199 = vmatprep.subr.bf16.mxu0 %v4822_v55  ;;  %v4872_v36 = vcombine.high %v913_v48, %v917_v49  ;;  %v920_v55 = vld [vmem:[#allocation8 + $0x690] sm:$0xff]  ;;  %v961_v46 = vld [vmem:[#allocation8 + $0x7d8] sm:$0xff]  ;;  %v4911_v49 = vcombine.low %v953_v37, %v957_v38 }
 0x279   :  { %4363 = vmatprep.subr.bf16.mxu1 %v4824_v16  ;;  %v924_v16 = vld [vmem:[#allocation8 + $0x6b0] sm:$0xff]  ;;  %v965_v47 = vld [vmem:[#allocation8 + $0x7f8] sm:$0xff] }
 0x27a   :  { %v4877_v58 = vcombine.low %v920_v55, %v924_v16 }
 0x27b   :  { %4200 = vmatpush1.bf16.msra.mxu0 %v4821_v54  ;;  %v4878_v54 = vcombine.high %v920_v55, %v924_v16  ;;  %v969_v55 = vld [vmem:[#allocation8 + $0x818] sm:$0xff] }
 0x27c   :  { %4364 = vmatpush1.bf16.msra.mxu1 %v4823_v60  ;;  %4201 = vmatprep.subr.bf16.mxu0 %v4830_v61  ;;  %v4880_v60 = vcombine.high %v921_v56, %v925_v40  ;;  %v928_v61 = vld [vmem:[#allocation8 + $0x6d0] sm:$0xff]  ;;  %v973_v16 = vld [vmem:[#allocation8 + $0x838] sm:$0xff]  ;;  %v4919_v40 = vcombine.low %v961_v46, %v965_v47 }
 0x27d   :  { %4365 = vmatprep.subr.bf16.mxu1 %v4832_v62  ;;  %v932_v62 = vld [vmem:[#allocation8 + $0x6f0] sm:$0xff] }
 0x27e   :  { %v4885_v13 = vcombine.low %v928_v61, %v932_v62 }
 0x27f   :  { %4202 = vmatpush1.bf16.msra.mxu0 %v4829_v5  ;;  %v4886_v5 = vcombine.high %v928_v61, %v932_v62  ;;  %v977_v62 = vld [vmem:[#allocation8 + $0x858] sm:$0xff] }
 0x280   :  { %4366 = vmatpush1.bf16.msra.mxu1 %v4831_v6  ;;  %4203 = vmatprep.subr.bf16.mxu0 %v4838_v35  ;;  %v4888_v6 = vcombine.high %v929_v63, %v933_v2  ;;  %v936_v35 = vld [vmem:[#allocation8 + $0x710] sm:$0xff]  ;;  %v981_v63 = vld [vmem:[#allocation8 + $0x878] sm:$0xff]  ;;  %v4927_v2 = vcombine.low %v969_v55, %v973_v16 }
 0x281   :  { %4367 = vmatprep.subr.bf16.mxu1 %v4840_v8  ;;  %v940_v8 = vld [vmem:[#allocation8 + $0x730] sm:$0xff] }
 0x282   :  { %v4893_v25 = vcombine.low %v936_v35, %v940_v8 }
 0x283   :  { %4204 = vmatpush1.bf16.msra.mxu0 %v4837_v34  ;;  %v4894_v34 = vcombine.high %v936_v35, %v940_v8  ;;  %v985_v35 = vld [vmem:[#allocation8 + $0x898] sm:$0xff] }
 0x284   :  { %4368 = vmatpush1.bf16.msra.mxu1 %v4839_v41  ;;  %4205 = vmatprep.subr.bf16.mxu0 %v4846_v20  ;;  %v4896_v41 = vcombine.high %v937_v10, %v941_v11  ;;  %v944_v20 = vld [vmem:[#allocation8 + $0x750] sm:$0xff]  ;;  %v989_v8 = vld [vmem:[#allocation8 + $0x8b8] sm:$0xff]  ;;  %v4935_v11 = vcombine.low %v977_v62, %v981_v63 }
 0x285   :  { %4369 = vmatprep.subr.bf16.mxu1 %v4848_v22  ;;  %v948_v22 = vld [vmem:[#allocation8 + $0x770] sm:$0xff] }
 0x286   :  { %v4901_v39 = vcombine.low %v944_v20, %v948_v22 }
 0x287   :  { %4206 = vmatpush1.bf16.msra.mxu0 %v4845_v29  ;;  %v4902_v29 = vcombine.high %v944_v20, %v948_v22  ;;  %v993_v20 = vld [vmem:[#allocation8 + $0x8d8] sm:$0xff] }
 0x288   :  { %4370 = vmatpush1.bf16.msra.mxu1 %v4847_v30  ;;  %4207 = vmatprep.subr.bf16.mxu0 %v4854_v32  ;;  %v4904_v30 = vcombine.high %v945_v23, %v949_v24  ;;  %v952_v32 = vld [vmem:[#allocation8 + $0x790] sm:$0xff]  ;;  %v997_v22 = vld [vmem:[#allocation8 + $0x8f8] sm:$0xff] }
 0x289   :  { %4371 = vmatprep.subr.bf16.mxu1 %v4856_v33  ;;  %v956_v33 = vld [vmem:[#allocation8 + $0x7b0] sm:$0xff] }
 0x28a   :  { %v4909_v48 = vcombine.low %v952_v32, %v956_v33 }
 0x28b   :  { %4208 = vmatpush1.bf16.msra.mxu0 %v4853_v42  ;;  %v4910_v42 = vcombine.high %v952_v32, %v956_v33  ;;  %v1005_v32 = vld [vmem:[#allocation8 + $0x938] sm:$0xff]  ;;  %v4951_v33 = vcombine.low %v993_v20, %v997_v22 }
 0x28c   :  { %4372 = vmatpush1.bf16.msra.mxu1 %v4855_v1  ;;  %4209 = vmatprep.subr.bf16.mxu0 %v4862_v44  ;;  %v4912_v1 = vcombine.high %v953_v37, %v957_v38  ;;  %v960_v44 = vld [vmem:[#allocation8 + $0x7d0] sm:$0xff] }
 0x28d   :  { %4373 = vmatprep.subr.bf16.mxu1 %v4864_v45  ;;  %v964_v45 = vld [vmem:[#allocation8 + $0x7f0] sm:$0xff] }
 0x28e   :  { %v4917_v56 = vcombine.low %v960_v44, %v964_v45 }
 0x28f   :  { %4210 = vmatpush1.bf16.msra.mxu0 %v4861_v53  ;;  %v4918_v53 = vcombine.high %v960_v44, %v964_v45 }
 0x290   :  { %4374 = vmatpush1.bf16.msra.mxu1 %v4863_v50  ;;  %4211 = vmatprep.subr.bf16.mxu0 %v4870_v51  ;;  %v4920_v50 = vcombine.high %v961_v46, %v965_v47  ;;  %v968_v51 = vld [vmem:[#allocation8 + $0x810] sm:$0xff] }
 0x291   :  { %4375 = vmatprep.subr.bf16.mxu1 %v4872_v36  ;;  %v972_v36 = vld [vmem:[#allocation8 + $0x830] sm:$0xff] }
 0x292   :  { %v4925_v61 = vcombine.low %v968_v51, %v972_v36 }
 0x293   :  { %4212 = vmatpush1.bf16.msra.mxu0 %v4869_v57  ;;  %v4926_v57 = vcombine.high %v968_v51, %v972_v36 }
 0x294   :  { %4376 = vmatpush1.bf16.msra.mxu1 %v4871_v59  ;;  %4213 = vmatprep.subr.bf16.mxu0 %v4878_v54  ;;  %v4928_v59 = vcombine.high %v969_v55, %v973_v16  ;;  %v976_v54 = vld [vmem:[#allocation8 + $0x850] sm:$0xff] }
 0x295   :  { %4377 = vmatprep.subr.bf16.mxu1 %v4880_v60  ;;  %v980_v60 = vld [vmem:[#allocation8 + $0x870] sm:$0xff] }
 0x296   :  { %v4933_v10 = vcombine.low %v976_v54, %v980_v60 }
 0x297   :  { %4214 = vmatpush1.bf16.msra.mxu0 %v4877_v58  ;;  %v4934_v58 = vcombine.high %v976_v54, %v980_v60 }
 0x298   :  { %4378 = vmatpush1.bf16.msra.mxu1 %v4879_v4  ;;  %4215 = vmatprep.subr.bf16.mxu0 %v4886_v5  ;;  %v984_v4 = vld [vmem:[#allocation8 + $0x890] sm:$0xff] }
 0x299   :  { %4379 = vmatprep.subr.bf16.mxu1 %v4888_v6  ;;  %v988_v5 = vld [vmem:[#allocation8 + $0x8b0] sm:$0xff]  ;;  %v4936_v6 = vcombine.high %v977_v62, %v981_v63 }
 0x29a   :  { %v4941_v23 = vcombine.low %v984_v4, %v988_v5  ;;  %v1032_v63 = vld [vmem:[#allocation8 + $0xa10] sm:$0xff] }
 0x29b   :  { %4216 = vmatpush1.bf16.msra.mxu0 %v4885_v13  ;;  %v4942_v13 = vcombine.high %v984_v4, %v988_v5  ;;  %v1037_v4 = vld [vmem:[#allocation8 + $0xa38] sm:$0xff] }
 0x29c   :  { %4380 = vmatpush1.bf16.msra.mxu1 %v4887_v19  ;;  %4217 = vmatprep.subr.bf16.mxu0 %v4894_v34  ;;  %v4944_v19 = vcombine.high %v985_v35, %v989_v8  ;;  %v992_v34 = vld [vmem:[#allocation8 + $0x8d0] sm:$0xff] }
 0x29d   :  { %4381 = vmatprep.subr.bf16.mxu1 %v4896_v41  ;;  %v996_v41 = vld [vmem:[#allocation8 + $0x8f0] sm:$0xff] }
 0x29e   :  { %v4950_v24 = vcombine.high %v992_v34, %v996_v41 }
 0x29f   :  { %4218 = vmatpush1.bf16.msra.mxu0 %v4893_v25  ;;  %v4952_v25 = vcombine.high %v993_v20, %v997_v22 }
 0x2a0   :  { %4382 = vmatpush1.bf16.msra.mxu1 %v4895_v28  ;;  %4219 = vmatprep.subr.bf16.mxu0 %v4902_v29  ;;  %v1000_v28 = vld [vmem:[#allocation8 + $0x910] sm:$0xff] }
 0x2a1   :  { %4383 = vmatprep.subr.bf16.mxu1 %v4904_v30  ;;  %v1004_v29 = vld [vmem:[#allocation8 + $0x930] sm:$0xff]  ;;  %v1001_v30 = vld [vmem:[#allocation8 + $0x918] sm:$0xff] }
 0x2a2   :  { %v4958_v37 = vcombine.high %v1000_v28, %v1004_v29  ;;  %v4960_v38 = vcombine.high %v1001_v30, %v1005_v32  ;;  %v4957_v44 = vcombine.low %v1000_v28, %v1004_v29  ;;  %v4959_v45 = vcombine.low %v1001_v30, %v1005_v32 }
 0x2a3   :  { %4220 = vmatpush1.bf16.msra.mxu0 %v4901_v39  ;;  %v1008_v39 = vld [vmem:[#allocation8 + $0x950] sm:$0xff] }
 0x2a4   :  { %4384 = vmatpush1.bf16.msra.mxu1 %v4903_v7  ;;  %4221 = vmatprep.subr.bf16.mxu0 %v4910_v42  ;;  %v1012_v7 = vld [vmem:[#allocation8 + $0x970] sm:$0xff]  ;;  %v1009_v42 = vld [vmem:[#allocation8 + $0x958] sm:$0xff] }
 0x2a5   :  { %4385 = vmatprep.subr.bf16.mxu1 %v4912_v1  ;;  %v1013_v1 = vld [vmem:[#allocation8 + $0x978] sm:$0xff]  ;;  %v4966_v46 = vcombine.high %v1008_v39, %v1012_v7  ;;  %v4965_v51 = vcombine.low %v1008_v39, %v1012_v7 }
 0x2a6   :  { %v4968_v47 = vcombine.high %v1009_v42, %v1013_v1  ;;  %v4967_v36 = vcombine.low %v1009_v42, %v1013_v1 }
 0x2a7   :  { %4222 = vmatpush1.bf16.msra.mxu0 %v4909_v48  ;;  %v1016_v48 = vld [vmem:[#allocation8 + $0x990] sm:$0xff] }
 0x2a8   :  { %4386 = vmatpush1.bf16.msra.mxu1 %v4911_v49  ;;  %4223 = vmatprep.subr.bf16.mxu0 %v4918_v53  ;;  %v1020_v49 = vld [vmem:[#allocation8 + $0x9b0] sm:$0xff]  ;;  %v1017_v53 = vld [vmem:[#allocation8 + $0x998] sm:$0xff] }
 0x2a9   :  { %4387 = vmatprep.subr.bf16.mxu1 %v4920_v50  ;;  %v1021_v50 = vld [vmem:[#allocation8 + $0x9b8] sm:$0xff]  ;;  %v4974_v55 = vcombine.high %v1016_v48, %v1020_v49  ;;  %v4973_v54 = vcombine.low %v1016_v48, %v1020_v49 }
 0x2aa   :  { %v4976_v16 = vcombine.high %v1017_v53, %v1021_v50  ;;  %v4975_v60 = vcombine.low %v1017_v53, %v1021_v50 }
 0x2ab   :  { %4224 = vmatpush1.bf16.msra.mxu0 %v4917_v56  ;;  %v1024_v56 = vld [vmem:[#allocation8 + $0x9d0] sm:$0xff] }
 0x2ac   :  { %4388 = vmatpush1.bf16.msra.mxu1 %v4919_v40  ;;  %4234 = vmatprep.subr.bf16.mxu0 %v4926_v57  ;;  %v1028_v40 = vld [vmem:[#allocation8 + $0x9f0] sm:$0xff]  ;;  %v1025_v57 = vld [vmem:[#allocation8 + $0x9d8] sm:$0xff] }
 0x2ad   :  { %4398 = vmatprep.subr.bf16.mxu1 %v4928_v59  ;;  %v1029_v59 = vld [vmem:[#allocation8 + $0x9f8] sm:$0xff]  ;;  %v4981_v5 = vcombine.low %v1024_v56, %v1028_v40 }
 0x2ae   :  { %4226 = vmatmul.mubr.bf16.vlgmr.msra.gmra.mrb[12].mxu0 %v5568_v18  ;;  %v4984_v62 = vcombine.high %v1025_v57, %v1029_v59 }
 0x2af   :  { %4390 = vmatmul.mubr.bf16.vlgmr.msra.gmra.mrb[12].mxu1 %v5568_v18  ;;  %4235 = vmatpush1.bf16.msra.mxu0 %v4925_v61  ;;  %v4943_v18 = vcombine.low %v985_v35, %v989_v8  ;;  %v4982_v61 = vcombine.high %v1024_v56, %v1028_v40 }
 0x2b0   :  { %4266 = vmatprep.mubr.bf16.mxu0 %v5570_v27  ;;  %4399 = vmatpush1.bf16.msra.mxu1 %v4927_v2  ;;  %v1036_v2 = vld [vmem:[#allocation8 + $0xa30] sm:$0xff] }
 0x2b1   :  { %4430 = vmatprep.mubr.bf16.mxu1 %v5570_v27  ;;  %4236 = vmatprep.subr.bf16.mxu0 %v4934_v58  ;;  %v4949_v27 = vcombine.low %v992_v34, %v996_v41  ;;  %v1033_v58 = vld [vmem:[#allocation8 + $0xa18] sm:$0xff]  ;;  %v4990_v35 = vcombine.high %v1032_v63, %v1036_v2  ;;  %v4989_v34 = vcombine.low %v1032_v63, %v1036_v2 }
 0x2b2   :  { %4400 = vmatprep.subr.bf16.mxu1 %v4936_v6  ;;  %v4983_v6 = vcombine.low %v1025_v57, %v1029_v59  ;;  %v4992_v8 = vcombine.high %v1033_v58, %v1037_v4  ;;  %v4991_v41 = vcombine.low %v1033_v58, %v1037_v4 }
 0x2b3   :  { %4237 = vmatpush1.bf16.msra.mxu0 %v4933_v10  ;;  %v1040_v10 = vld [vmem:[#allocation8 + $0xa50] sm:$0xff] }
 0x2b4   :  { %4401 = vmatpush1.bf16.msra.mxu1 %v4935_v11  ;;  %4238 = vmatprep.subr.bf16.mxu0 %v4942_v13  ;;  %v1044_v11 = vld [vmem:[#allocation8 + $0xa70] sm:$0xff]  ;;  %v1041_v13 = vld [vmem:[#allocation8 + $0xa58] sm:$0xff] }
 0x2b5   :  { %4402 = vmatprep.subr.bf16.mxu1 %v4944_v19  ;;  %v1045_v19 = vld [vmem:[#allocation8 + $0xa78] sm:$0xff]  ;;  %v4998_v20 = vcombine.high %v1040_v10, %v1044_v11  ;;  %v4997_v28 = vcombine.low %v1040_v10, %v1044_v11 }
 0x2b6   :  { %v5000_v22 = vcombine.high %v1041_v13, %v1045_v19  ;;  %v4999_v29 = vcombine.low %v1041_v13, %v1045_v19 }
 0x2b7   :  { %4239 = vmatpush1.bf16.msra.mxu0 %v4941_v23  ;;  %v1048_v23 = vld [vmem:[#allocation8 + $0xa90] sm:$0xff] }
 0x2b8   :  { %4403 = vmatpush1.bf16.msra.mxu1 %v4943_v18  ;;  %4240 = vmatprep.subr.bf16.mxu0 %v4950_v24  ;;  %v1052_v18 = vld [vmem:[#allocation8 + $0xab0] sm:$0xff]  ;;  %v1049_v24 = vld [vmem:[#allocation8 + $0xa98] sm:$0xff] }
 0x2b9   :  { %4404 = vmatprep.subr.bf16.mxu1 %v4952_v25  ;;  %v1053_v25 = vld [vmem:[#allocation8 + $0xab8] sm:$0xff]  ;;  %v5006_v30 = vcombine.high %v1048_v23, %v1052_v18  ;;  %v5005_v39 = vcombine.low %v1048_v23, %v1052_v18 }
 0x2ba   :  { %v5008_v32 = vcombine.high %v1049_v24, %v1053_v25  ;;  %v5007_v7 = vcombine.low %v1049_v24, %v1053_v25 }
 0x2bb   :  { %4241 = vmatpush1.bf16.msra.mxu0 %v4949_v27  ;;  %v1056_v27 = vld [vmem:[#allocation8 + $0xad0] sm:$0xff] }
 0x2bc   :  { %4405 = vmatpush1.bf16.msra.mxu1 %v4951_v33  ;;  %4242 = vmatprep.subr.bf16.mxu0 %v4958_v37  ;;  %v1060_v33 = vld [vmem:[#allocation8 + $0xaf0] sm:$0xff]  ;;  %v1057_v37 = vld [vmem:[#allocation8 + $0xad8] sm:$0xff] }
 0x2bd   :  { %4406 = vmatprep.subr.bf16.mxu1 %v4960_v38  ;;  %v1061_v38 = vld [vmem:[#allocation8 + $0xaf8] sm:$0xff]  ;;  %v5014_v42 = vcombine.high %v1056_v27, %v1060_v33  ;;  %v5013_v48 = vcombine.low %v1056_v27, %v1060_v33 }
 0x2be   :  { %v5016_v1 = vcombine.high %v1057_v37, %v1061_v38  ;;  %v5015_v49 = vcombine.low %v1057_v37, %v1061_v38  ;;  %v1109_v27 = vld [vmem:[#allocation8 + $0xc78] sm:$0xff]  ;;  %v1112_v38 = vld [vmem:[#allocation8 + $0xc90] sm:$0xff] }
 0x2bf   :  { %4243 = vmatpush1.bf16.msra.mxu0 %v4957_v44  ;;  %v1064_v44 = vld [vmem:[#allocation8 + $0xb10] sm:$0xff] }
 0x2c0   :  { %4407 = vmatpush1.bf16.msra.mxu1 %v4959_v45  ;;  %4244 = vmatprep.subr.bf16.mxu0 %v4966_v46  ;;  %v1068_v45 = vld [vmem:[#allocation8 + $0xb30] sm:$0xff]  ;;  %v1065_v46 = vld [vmem:[#allocation8 + $0xb18] sm:$0xff] }
 0x2c1   :  { %4408 = vmatprep.subr.bf16.mxu1 %v4968_v47  ;;  %v1069_v47 = vld [vmem:[#allocation8 + $0xb38] sm:$0xff]  ;;  %v5022_v53 = vcombine.high %v1064_v44, %v1068_v45  ;;  %v5021_v56 = vcombine.low %v1064_v44, %v1068_v45 }
 0x2c2   :  { %v5024_v50 = vcombine.high %v1065_v46, %v1069_v47  ;;  %v5023_v40 = vcombine.low %v1065_v46, %v1069_v47 }
 0x2c3   :  { %4245 = vmatpush1.bf16.msra.mxu0 %v4965_v51  ;;  %v1072_v51 = vld [vmem:[#allocation8 + $0xb50] sm:$0xff] }
 0x2c4   :  { %4409 = vmatpush1.bf16.msra.mxu1 %v4967_v36  ;;  %4246 = vmatprep.subr.bf16.mxu0 %v4974_v55  ;;  %v1076_v36 = vld [vmem:[#allocation8 + $0xb70] sm:$0xff]  ;;  %v1073_v55 = vld [vmem:[#allocation8 + $0xb58] sm:$0xff] }
 0x2c5   :  { %4410 = vmatprep.subr.bf16.mxu1 %v4976_v16  ;;  %v1077_v16 = vld [vmem:[#allocation8 + $0xb78] sm:$0xff]  ;;  %v5030_v57 = vcombine.high %v1072_v51, %v1076_v36  ;;  %v5029_v63 = vcombine.low %v1072_v51, %v1076_v36 }
 0x2c6   :  { %v5032_v59 = vcombine.high %v1073_v55, %v1077_v16  ;;  %v5031_v2 = vcombine.low %v1073_v55, %v1077_v16  ;;  %v1128_v16 = vld [vmem:[#allocation8 + $0xd10] sm:$0xff] }
 0x2c7   :  { %4247 = vmatpush1.bf16.msra.mxu0 %v4973_v54  ;;  %v1080_v54 = vld [vmem:[#allocation8 + $0xb90] sm:$0xff] }
 0x2c8   :  { %4411 = vmatpush1.bf16.msra.mxu1 %v4975_v60  ;;  %4248 = vmatprep.subr.bf16.mxu0 %v4982_v61  ;;  %v1084_v60 = vld [vmem:[#allocation8 + $0xbb0] sm:$0xff]  ;;  %v1081_v61 = vld [vmem:[#allocation8 + $0xb98] sm:$0xff] }
 0x2c9   :  { %4412 = vmatprep.subr.bf16.mxu1 %v4984_v62  ;;  %v1085_v62 = vld [vmem:[#allocation8 + $0xbb8] sm:$0xff]  ;;  %v5038_v58 = vcombine.high %v1080_v54, %v1084_v60  ;;  %v5037_v10 = vcombine.low %v1080_v54, %v1084_v60 }
 0x2ca   :  { %v5040_v4 = vcombine.high %v1081_v61, %v1085_v62  ;;  %v5039_v11 = vcombine.low %v1081_v61, %v1085_v62  ;;  %v1136_v62 = vld [vmem:[#allocation8 + $0xd50] sm:$0xff] }
 0x2cb   :  { %4249 = vmatpush1.bf16.msra.mxu0 %v4981_v5  ;;  %v1088_v5 = vld [vmem:[#allocation8 + $0xbd0] sm:$0xff] }
 0x2cc   :  { %4413 = vmatpush1.bf16.msra.mxu1 %v4983_v6  ;;  %4250 = vmatprep.subr.bf16.mxu0 %v4990_v35  ;;  %v1092_v6 = vld [vmem:[#allocation8 + $0xbf0] sm:$0xff]  ;;  %v1089_v35 = vld [vmem:[#allocation8 + $0xbd8] sm:$0xff] }
 0x2cd   :  { %4414 = vmatprep.subr.bf16.mxu1 %v4992_v8  ;;  %v1093_v8 = vld [vmem:[#allocation8 + $0xbf8] sm:$0xff]  ;;  %v5046_v13 = vcombine.high %v1088_v5, %v1092_v6  ;;  %v5045_v23 = vcombine.low %v1088_v5, %v1092_v6  ;;  %v5623_v6 = vld [vmem:[#allocation10] sm:$0xff] }
 0x2ce   :  { %v5048_v19 = vcombine.high %v1089_v35, %v1093_v8  ;;  %v5047_v18 = vcombine.low %v1089_v35, %v1093_v8 }
 0x2cf   :  { %4251 = vmatpush1.bf16.msra.mxu0 %v4989_v34  ;;  %v1096_v34 = vld [vmem:[#allocation8 + $0xc10] sm:$0xff] }
 0x2d0   :  { %4415 = vmatpush1.bf16.msra.mxu1 %v4991_v41  ;;  %4252 = vmatprep.subr.bf16.mxu0 %v4998_v20  ;;  %v1100_v41 = vld [vmem:[#allocation8 + $0xc30] sm:$0xff]  ;;  %v1097_v20 = vld [vmem:[#allocation8 + $0xc18] sm:$0xff] }
 0x2d1   :  { %4416 = vmatprep.subr.bf16.mxu1 %v5000_v22  ;;  %v1101_v22 = vld [vmem:[#allocation8 + $0xc38] sm:$0xff]  ;;  %v5054_v24 = vcombine.high %v1096_v34, %v1100_v41 }
 0x2d2   :  { %v5056_v25 = vcombine.high %v1097_v20, %v1101_v22  ;;  %v5055_v33 = vcombine.low %v1097_v20, %v1101_v22  ;;  %v1145_v20 = vld [vmem:[#allocation8 + $0xd98] sm:$0xff] }
 0x2d3   :  { %4253 = vmatpush1.bf16.msra.mxu0 %v4997_v28  ;;  %v1104_v28 = vld [vmem:[#allocation8 + $0xc50] sm:$0xff]  ;;  %v1149_v22 = vld [vmem:[#allocation8 + $0xdb8] sm:$0xff] }
 0x2d4   :  { %4417 = vmatpush1.bf16.msra.mxu1 %v4999_v29  ;;  %4254 = vmatprep.subr.bf16.mxu0 %v5006_v30  ;;  %v1108_v29 = vld [vmem:[#allocation8 + $0xc70] sm:$0xff]  ;;  %v5053_v30 = vcombine.low %v1096_v34, %v1100_v41  ;;  %v1235_v41 = vrot.slane %v5623_v6, %v5558_v31 }
 0x2d5   :  { %4418 = vmatprep.subr.bf16.mxu1 %v5008_v32  ;;  %v1105_v32 = vld [vmem:[#allocation8 + $0xc58] sm:$0xff]  ;;  %v5062_v37 = vcombine.high %v1104_v28, %v1108_v29  ;;  %v5061_v44 = vcombine.low %v1104_v28, %v1108_v29 }
 0x2d6   :  { %v5063_v45 = vcombine.low %v1105_v32, %v1109_v27 }
 0x2d7   :  { %4255 = vmatpush1.bf16.msra.mxu0 %v5005_v39  ;;  %v1116_v39 = vld [vmem:[#allocation8 + $0xcb0] sm:$0xff] }
 0x2d8   :  { %4419 = vmatpush1.bf16.msra.mxu1 %v5007_v7  ;;  %4256 = vmatprep.subr.bf16.mxu0 %v5014_v42  ;;  %v5064_v7 = vcombine.high %v1105_v32, %v1109_v27  ;;  %v1113_v42 = vld [vmem:[#allocation8 + $0xc98] sm:$0xff]  ;;  %v5070_v46 = vcombine.high %v1112_v38, %v1116_v39  ;;  %v5069_v51 = vcombine.low %v1112_v38, %v1116_v39 }
 0x2d9   :  { %4420 = vmatprep.subr.bf16.mxu1 %v5016_v1  ;;  %v1117_v1 = vld [vmem:[#allocation8 + $0xcb8] sm:$0xff] }
 0x2da   :  { %v5072_v47 = vcombine.high %v1113_v42, %v1117_v1 }
 0x2db   :  { %4257 = vmatpush1.bf16.msra.mxu0 %v5013_v48  ;;  %v1120_v48 = vld [vmem:[#allocation8 + $0xcd0] sm:$0xff] }
 0x2dc   :  { %4421 = vmatpush1.bf16.msra.mxu1 %v5015_v49  ;;  %4258 = vmatprep.subr.bf16.mxu0 %v5022_v53  ;;  %v1124_v49 = vld [vmem:[#allocation8 + $0xcf0] sm:$0xff]  ;;  %v1121_v53 = vld [vmem:[#allocation8 + $0xcd8] sm:$0xff] }
 0x2dd   :  { %4422 = vmatprep.subr.bf16.mxu1 %v5024_v50  ;;  %v1125_v50 = vld [vmem:[#allocation8 + $0xcf8] sm:$0xff]  ;;  %v5078_v36 = vcombine.high %v1120_v48, %v1124_v49 }
 0x2de   :  { %v5080_v55 = vcombine.high %v1121_v53, %v1125_v50  ;;  %v5079_v54 = vcombine.low %v1121_v53, %v1125_v50 }
 0x2df   :  { %4259 = vmatpush1.bf16.msra.mxu0 %v5021_v56  ;;  %v1132_v56 = vld [vmem:[#allocation8 + $0xd30] sm:$0xff] }
 0x2e0   :  { %4423 = vmatpush1.bf16.msra.mxu1 %v5023_v40  ;;  %4260 = vmatprep.subr.bf16.mxu0 %v5030_v57  ;;  %v1129_v40 = vld [vmem:[#allocation8 + $0xd18] sm:$0xff]  ;;  %v5086_v60 = vcombine.high %v1128_v16, %v1132_v56  ;;  %v5085_v5 = vcombine.low %v1128_v16, %v1132_v56 }
 0x2e1   :  { %4424 = vmatprep.subr.bf16.mxu1 %v5032_v59  ;;  %v1133_v57 = vld [vmem:[#allocation8 + $0xd38] sm:$0xff]  ;;  %v5618_v59 = vld [vmem:[#allocation11] sm:$0xff] }
 0x2e2   :  { %v5088_v61 = vcombine.high %v1129_v40, %v1133_v57  ;;  %v5087_v35 = vcombine.low %v1129_v40, %v1133_v57 }
 0x2e3   :  { %4261 = vmatpush1.bf16.msra.mxu0 %v5029_v63  ;;  %v1140_v63 = vld [vmem:[#allocation8 + $0xd70] sm:$0xff] }
 0x2e4   :  { %4425 = vmatpush1.bf16.msra.mxu1 %v5031_v2  ;;  %4262 = vmatprep.subr.bf16.mxu0 %v5038_v58  ;;  %v5621_v2 = vunpack.c.l.bf16 %v5618_v59  ;;  %v1137_v58 = vld [vmem:[#allocation8 + $0xd58] sm:$0xff]  ;;  %v5094_v8 = vcombine.high %v1136_v62, %v1140_v63 }
 0x2e5   :  { %4426 = vmatprep.subr.bf16.mxu1 %v5040_v4  ;;  %v1141_v4 = vld [vmem:[#allocation8 + $0xd78] sm:$0xff] }
 0x2e6   :  { %v4496_v34 = vrot.slane %v5621_v2, %v5521_v15  ;;  %v5095_v28 = vcombine.low %v1137_v58, %v1141_v4  ;;  %v4504_v27 = vrot.slane %v5621_v2, %v5577_v12 }
 0x2e7   :  { %4263 = vmatpush1.bf16.msra.mxu0 %v5037_v10  ;;  %v5096_v10 = vcombine.high %v1137_v58, %v1141_v4 }
 0x2e8   :  { %4427 = vmatpush1.bf16.msra.mxu1 %v5039_v11  ;;  %4264 = vmatprep.subr.bf16.mxu0 %v5046_v13  ;;  %v1144_v11 = vld [vmem:[#allocation8 + $0xd90] sm:$0xff]  ;;  %v4536_v39 = vrot.slane %v4496_v34, %v5521_v15  ;;  %v4544_v40 = vrot.slane %v4504_v27, %v5521_v15  ;;  %v1177_v27 = vld [vmem:[#allocation8 + $0xe98] sm:$0xff] }
 0x2e9   :  { %4428 = vmatprep.subr.bf16.mxu1 %v5048_v19  ;;  %v1148_v13 = vld [vmem:[#allocation8 + $0xdb0] sm:$0xff]  ;;  %v1227_v19 = vrot.slane %v5623_v6, %v5521_v15 }
 0x2ea   :  { %v5102_v29 = vcombine.high %v1144_v11, %v1148_v13  ;;  %v5101_v50 = vcombine.low %v1144_v11, %v1148_v13  ;;  %v1172_v34 = vld [vmem:[#allocation8 + $0xe70] sm:$0xff] }
 0x2eb   :  { %4265 = vmatpush1.bf16.msra.mxu0 %v5045_v23  ;;  %v1231_v23 = vrot.slane %v5623_v6, %v176_v17  ;;  %v1152_v17 = vld [vmem:[#allocation8 + $0xdd0] sm:$0xff] }
 0x2ec   :  { %4429 = vmatpush1.bf16.msra.mxu1 %v5047_v18  ;;  %4275 = vmatprep.subr.bf16.mxu0 %v5054_v24  ;;  %v4500_v18 = vrot.slane %v5621_v2, %v5558_v31  ;;  %v1239_v24 = vrot.slane %v5623_v6, %v184_v21 }
 0x2ed   :  { %4439 = vmatprep.subr.bf16.mxu1 %v5056_v25  ;;  %v5093_v25 = vcombine.low %v1136_v62, %v1140_v63  ;;  %v1161_v62 = vld [vmem:[#allocation8 + $0xe18] sm:$0xff] }
 0x2ee   :  { %4267 = vmatmul.mubr.bf16.vlgmr.msra.gmra.mrb[12].mxu0 %v5587_v0  ;;  %v1165_v63 = vld [vmem:[#allocation8 + $0xe38] sm:$0xff] }
 0x2ef   :  { %4431 = vmatmul.mubr.bf16.vlgmr.msra.gmra.mrb[12].mxu1 %v5587_v0  ;;  %4276 = vmatpush1.bf16.msra.mxu0 %v5053_v30  ;;  %v5071_v0 = vcombine.low %v1113_v42, %v1117_v1  ;;  %v4508_v1 = vrot.slane %v5621_v2, %v5596_v3  ;;  %v5120_v13 = vcombine.high %v1161_v62, %v1165_v63 }
 0x2f0   :  { %4307 = vmatprep.mubr.bf16.mxu0 %v5589_v9  ;;  %4440 = vmatpush1.bf16.msra.mxu1 %v5055_v33  ;;  %v5104_v33 = vcombine.high %v1145_v20, %v1149_v22 }
 0x2f1   :  { %4471 = vmatprep.mubr.bf16.mxu1 %v5589_v9  ;;  %4277 = vmatprep.subr.bf16.mxu0 %v5062_v37  ;;  %v5077_v9 = vcombine.low %v1120_v48, %v1124_v49  ;;  %v1156_v37 = vld [vmem:[#allocation8 + $0xdf0] sm:$0xff]  ;;  %v4548_v4 = vrot.slane %v4508_v1, %v5521_v15  ;;  %v1189_v1 = vld [vmem:[#allocation8 + $0xef8] sm:$0xff] }
 0x2f2   :  { %4441 = vmatprep.subr.bf16.mxu1 %v5064_v7  ;;  %v5110_v16 = vcombine.high %v1152_v17, %v1156_v37 }
 0x2f3   :  { %4278 = vmatpush1.bf16.msra.mxu0 %v5061_v44  ;;  %v1153_v44 = vld [vmem:[#allocation8 + $0xdd8] sm:$0xff] }
 0x2f4   :  { %4442 = vmatpush1.bf16.msra.mxu1 %v5063_v45  ;;  %4279 = vmatprep.subr.bf16.mxu0 %v5070_v46  ;;  %v1157_v45 = vld [vmem:[#allocation8 + $0xdf8] sm:$0xff] }
 0x2f5   :  { %4443 = vmatprep.subr.bf16.mxu1 %v5072_v47  ;;  %v4540_v47 = vrot.slane %v4500_v18, %v5521_v15 }
 0x2f7   :  { %4280 = vmatpush1.bf16.msra.mxu0 %v5069_v51 }
 0x2f8   :  { %4444 = vmatpush1.bf16.msra.mxu1 %v5071_v0  ;;  %4281 = vmatprep.subr.bf16.mxu0 %v5078_v36 }
 0x2f9   :  { %4445 = vmatprep.subr.bf16.mxu1 %v5080_v55  ;;  %v5103_v55 = vcombine.low %v1145_v20, %v1149_v22  ;;  %v1173_v20 = vld [vmem:[#allocation8 + $0xe78] sm:$0xff] }
 0x2fb   :  { %4282 = vmatpush1.bf16.msra.mxu0 %v5077_v9  ;;  %v5112_v9 = vcombine.high %v1153_v44, %v1157_v45 }
 0x2fc   :  { %4446 = vmatpush1.bf16.msra.mxu1 %v5079_v54  ;;  %4283 = vmatprep.subr.bf16.mxu0 %v5086_v60  ;;  %v1160_v54 = vld [vmem:[#allocation8 + $0xe10] sm:$0xff] }
 0x2fd   :  { %4447 = vmatprep.subr.bf16.mxu1 %v5088_v61  ;;  %v1164_v60 = vld [vmem:[#allocation8 + $0xe30] sm:$0xff] }
 0x2fe   :  { %v5117_v18 = vcombine.low %v1160_v54, %v1164_v60 }
 0x2ff   :  { %4284 = vmatpush1.bf16.msra.mxu0 %v5085_v5  ;;  %v5109_v5 = vcombine.low %v1152_v17, %v1156_v37 }
 0x300   :  { %4448 = vmatpush1.bf16.msra.mxu1 %v5087_v35  ;;  %4285 = vmatprep.subr.bf16.mxu0 %v5094_v8  ;;  %v5111_v35 = vcombine.low %v1153_v44, %v1157_v45  ;;  %v5118_v8 = vcombine.high %v1160_v54, %v1164_v60 }
 0x301   :  { %v3981_v30 = vpop.f32.mrb[8].mxu0  ;;  %v4145_v32 = vpop.f32.mrb[8].mxu1  ;;  %4449 = vmatprep.subr.bf16.mxu1 %v5096_v10 }
 0x302   :  { %v5178_v38 = vadd.f32 %v3981_v30, %v1227_v19  ;;  %v5180_v7 = vadd.f32 %v4145_v32, %v1235_v41  ;;  %v3983_v42 = vpop.f32.mrb[9].mxu0  ;;  %v4147_v21 = vpop.f32.mrb[9].mxu1  ;;  %v1168_v19 = vld [vmem:[#allocation8 + $0xe50] sm:$0xff]  ;;  %v1169_v41 = vld [vmem:[#allocation8 + $0xe58] sm:$0xff] }
 0x303   :  { %v5179_v46 = vadd.f32 %v3983_v42, %v1231_v23  ;;  %v5181_v48 = vadd.f32 %v4147_v21, %v1239_v24  ;;  %v3985_v49 = vpop.f32.mrb[10].mxu0  ;;  %v4149_v53 = vpop.f32.mrb[10].mxu1  ;;  %4286 = vmatpush1.bf16.msra.mxu0 %v5093_v25  ;;  %v5119_v24 = vcombine.low %v1161_v62, %v1165_v63  ;;  %v5126_v25 = vcombine.high %v1168_v19, %v1172_v34  ;;  %v1176_v30 = vld [vmem:[#allocation8 + $0xe90] sm:$0xff]  ;;  %v1185_v21 = vld [vmem:[#allocation8 + $0xed8] sm:$0xff] }
 0x304   :  { %v4480_v51 = vmax.f32 %v5178_v38, 0.0  ;;  %4450 = vmatpush1.bf16.msra.mxu1 %v5095_v28  ;;  %v3986_v0 = vpop.f32.mrb[11].mxu0  ;;  %v4150_v36 = vpop.f32.mrb[11].mxu1  ;;  %4287 = vmatprep.subr.bf16.mxu0 %v5102_v29  ;;  %v4482_v56 = vmax.f32 %v5180_v7, 0.0  ;;  %v5128_v29 = vcombine.high %v1169_v41, %v1173_v20  ;;  %v1180_v32 = vld [vmem:[#allocation8 + $0xeb0] sm:$0xff]  ;;  %v5125_v17 = vcombine.low %v1168_v19, %v1172_v34  ;;  %v1193_v53 = vld [vmem:[#allocation8 + $0xf18] sm:$0xff] }
 0x305   :  { %v4481_v57 = vmax.f32 %v5179_v46, 0.0  ;;  %4451 = vmatprep.subr.bf16.mxu1 %v5104_v33  ;;  %v4483_v58 = vmax.f32 %v5181_v48, 0.0  ;;  %v1181_v33 = vld [vmem:[#allocation8 + $0xeb8] sm:$0xff]  ;;  %v5127_v37 = vcombine.low %v1169_v41, %v1173_v20  ;;  %v5134_v38 = vcombine.high %v1176_v30, %v1180_v32  ;;  %v1184_v7 = vld [vmem:[#allocation8 + $0xed0] sm:$0xff] }
 0x306   :  { %v4565_v61 = vmul.f32 %v4536_v39, %v4480_v51  ;;  %v4567_v10 = vmul.f32 %v4544_v40, %v4482_v56  ;;  %v5136_v39 = vcombine.high %v1177_v27, %v1181_v33  ;;  %v1188_v42 = vld [vmem:[#allocation8 + $0xef0] sm:$0xff]  ;;  %v5133_v44 = vcombine.low %v1176_v30, %v1180_v32  ;;  %v1201_v40 = vld [vmem:[#allocation8 + $0xf58] sm:$0xff] }
 0x307   :  { %v4566_v2 = vmul.f32 %v4540_v47, %v4481_v57  ;;  %4288 = vmatpush1.bf16.msra.mxu0 %v5101_v50  ;;  %v4568_v22 = vmul.f32 %v4548_v4, %v4483_v58  ;;  %v5135_v45 = vcombine.low %v1177_v27, %v1181_v33  ;;  %v5142_v46 = vcombine.high %v1184_v7, %v1188_v42  ;;  %v1192_v48 = vld [vmem:[#allocation8 + $0xf10] sm:$0xff]  ;;  %v1197_v50 = vld [vmem:[#allocation8 + $0xf38] sm:$0xff] }
 0x308   :  { %4452 = vmatpush1.bf16.msra.mxu1 %v5103_v55  ;;  %4289 = vmatprep.subr.bf16.mxu0 %v5110_v16  ;;  %v5144_v47 = vcombine.high %v1185_v21, %v1189_v1  ;;  %v1196_v49 = vld [vmem:[#allocation8 + $0xf30] sm:$0xff]  ;;  %v5141_v51 = vcombine.low %v1184_v7, %v1188_v42  ;;  %v5143_v0 = vcombine.low %v1185_v21, %v1189_v1  ;;  %v1205_v57 = vld [vmem:[#allocation8 + $0xf78] sm:$0xff] }
 0x309   :  { %v4573_v11 = vadd.f32 %v4566_v2, %v4565_v61  ;;  %4453 = vmatprep.subr.bf16.mxu1 %v5112_v9  ;;  %v5150_v36 = vcombine.high %v1192_v48, %v1196_v49  ;;  %v5152_v55 = vcombine.high %v1193_v53, %v1197_v50  ;;  %v1200_v16 = vld [vmem:[#allocation8 + $0xf50] sm:$0xff]  ;;  %v5149_v9 = vcombine.low %v1192_v48, %v1196_v49  ;;  %v1209_v2 = vld [vmem:[#allocation8 + $0xf98] sm:$0xff] }
 0x30a   :  { %v1204_v56 = vld [vmem:[#allocation8 + $0xf70] sm:$0xff]  ;;  %v5151_v54 = vcombine.low %v1193_v53, %v1197_v50  ;;  %v5160_v61 = vcombine.high %v1201_v40, %v1205_v57  ;;  %v1213_v58 = vld [vmem:[#allocation8 + $0xfb8] sm:$0xff]  ;;  %v1251_v30 = vrot.slane %v5623_v6, %v5596_v3  ;;  %v1247_v32 = vrot.slane %v5623_v6, %v192_v43 }
 0x30b   :  { %v4574_v23 = vadd.f32 %v4573_v11, %v4567_v10  ;;  %4290 = vmatpush1.bf16.msra.mxu0 %v5109_v5  ;;  %v5158_v60 = vcombine.high %v1200_v16, %v1204_v56  ;;  %v1208_v62 = vld [vmem:[#allocation8 + $0xf90] sm:$0xff]  ;;  %v5157_v4 = vcombine.low %v1200_v16, %v1204_v56  ;;  %v5159_v5 = vcombine.low %v1201_v40, %v1205_v57  ;;  %v1221_v19 = vld [vmem:[#allocation8 + $0xff8] sm:$0xff] }
 0x30c   :  { %4454 = vmatpush1.bf16.msra.mxu1 %v5111_v35  ;;  %4291 = vmatprep.subr.bf16.mxu0 %v5118_v8  ;;  %v1212_v63 = vld [vmem:[#allocation8 + $0xfb0] sm:$0xff]  ;;  %v5168_v8 = vcombine.high %v1209_v2, %v1213_v58  ;;  %v5167_v41 = vcombine.low %v1209_v2, %v1213_v58 }
 0x30d   :  { %v5647_v28 = vadd.f32 %v4574_v23, %v4568_v22  ;;  %4455 = vmatprep.subr.bf16.mxu1 %v5120_v13  ;;  %v5166_v35 = vcombine.high %v1208_v62, %v1212_v63  ;;  %v1216_v10 = vld [vmem:[#allocation8 + $0xfd0] sm:$0xff]  ;;  %v1217_v13 = vld [vmem:[#allocation8 + $0xfd8] sm:$0xff]  ;;  %v5165_v34 = vcombine.low %v1208_v62, %v1212_v63 }
 0x30e   :  { %v1220_v11 = vld [vmem:[#allocation8 + $0xff0] sm:$0xff]  ;;  %v5176_v22 = vcombine.high %v1217_v13, %v1221_v19 }
 0x30f   :  { %4292 = vmatpush1.bf16.msra.mxu0 %v5117_v18  ;;  %v5174_v20 = vcombine.high %v1216_v10, %v1220_v11  ;;  %v5173_v23 = vcombine.low %v1216_v10, %v1220_v11  ;;  %v5175_v18 = vcombine.low %v1217_v13, %v1221_v19  ;;  %v5177_v40 = vld [vmem:[#allocation2] ss:$0 sm:$0xff] }
 0x310   :  { %4456 = vmatpush1.bf16.msra.mxu1 %v5119_v24  ;;  %4293 = vmatprep.subr.bf16.mxu0 %v5126_v25  ;;  %v4490_v24 = vunpack.c.h.bf16 %v5618_v59  ;;  %v1243_v25 = vrot.slane %v5623_v6, %v5577_v12 }
 0x311   :  { %4457 = vmatprep.subr.bf16.mxu1 %v5128_v29 }
 0x312   :  { %v4512_v29 = vrot.slane %v4490_v24, %v5521_v15  ;;  %v4516_v27 = vrot.slane %v4490_v24, %v5558_v31 }
 0x313   :  { %4294 = vmatpush1.bf16.msra.mxu0 %v5125_v17 }
 0x314   :  { %4458 = vmatpush1.bf16.msra.mxu1 %v5127_v37  ;;  %4295 = vmatprep.subr.bf16.mxu0 %v5134_v38  ;;  %v4552_v17 = vrot.slane %v4512_v29, %v5521_v15  ;;  %v4520_v38 = vrot.slane %v4490_v24, %v5577_v12  ;;  %v4556_v21 = vrot.slane %v4516_v27, %v5521_v15 }
 0x315   :  { %4459 = vmatprep.subr.bf16.mxu1 %v5136_v39 }
 0x316   :  { %v4560_v49 = vrot.slane %v4520_v38, %v5521_v15 }
 0x317   :  { %4296 = vmatpush1.bf16.msra.mxu0 %v5133_v44 }
 0x318   :  { %4460 = vmatpush1.bf16.msra.mxu1 %v5135_v45  ;;  %4297 = vmatprep.subr.bf16.mxu0 %v5142_v46 }
 0x319   :  { %4461 = vmatprep.subr.bf16.mxu1 %v5144_v47 }
 0x31b   :  { %4298 = vmatpush1.bf16.msra.mxu0 %v5141_v51 }
 0x31c   :  { %4462 = vmatpush1.bf16.msra.mxu1 %v5143_v0  ;;  %4299 = vmatprep.subr.bf16.mxu0 %v5150_v36 }
 0x31d   :  { %4463 = vmatprep.subr.bf16.mxu1 %v5152_v55 }
 0x31f   :  { %4300 = vmatpush1.bf16.msra.mxu0 %v5149_v9 }
 0x320   :  { %4464 = vmatpush1.bf16.msra.mxu1 %v5151_v54  ;;  %4301 = vmatprep.subr.bf16.mxu0 %v5158_v60 }
 0x321   :  { %4465 = vmatprep.subr.bf16.mxu1 %v5160_v61 }
 0x323   :  { %4302 = vmatpush1.bf16.msra.mxu0 %v5157_v4 }
 0x324   :  { %4466 = vmatpush1.bf16.msra.mxu1 %v5159_v5  ;;  %4303 = vmatprep.subr.bf16.mxu0 %v5166_v35 }
 0x325   :  { %4467 = vmatprep.subr.bf16.mxu1 %v5168_v8 }
 0x327   :  { %4304 = vmatpush1.bf16.msra.mxu0 %v5165_v34 }
 0x328   :  { %4468 = vmatpush1.bf16.msra.mxu1 %v5167_v41  ;;  %4305 = vmatprep.subr.bf16.mxu0 %v5174_v20 }
 0x329   :  { %4469 = vmatprep.subr.bf16.mxu1 %v5176_v22 }
 0x32b   :  { %4306 = vmatpush1.bf16.msra.mxu0 %v5173_v23 }
 0x32c   :  { %4470 = vmatpush1.bf16.msra.mxu1 %v5175_v18 }
 0x32e   :  { %4308 = vmatmul.mubr.bf16.vlgmr.msra.gmra.mrb[12].mxu0 %v5600_v52 }
 0x32f   :  { %4472 = vmatmul.mubr.bf16.vlgmr.msra.gmra.mrb[12].mxu1 %v5600_v52  ;;  %v1255_v52 = vrot.slane %v5623_v6, %v200_v26  ;;  %v4524_v26 = vrot.slane %v4490_v24, %v5596_v3 }
 0x331   :  { %v4564_v51 = vrot.slane %v4524_v26, %v5521_v15 }
 0x401   :  { %v4309_v33 = vpop.f32.mrb[12].mxu0 }
 0x402   :  { %v5182_v59 = vadd.f32 %v4309_v33, %v1243_v25  ;;  %v4473_v37 = vpop.f32.mrb[12].mxu1  ;;  %v4311_v39 = vpop.f32.mrb[13].mxu0 }
 0x403   :  { %v5184_v7 = vadd.f32 %v4473_v37, %v1251_v30  ;;  %v5183_v42 = vadd.f32 %v4311_v39, %v1247_v32  ;;  %v4475_v1 = vpop.f32.mrb[13].mxu1  ;;  %v4313_v43 = vpop.f32.mrb[14].mxu0 }
 0x404   :  { %v4484_v44 = vmax.f32 %v5182_v59, 0.0  ;;  %v5185_v31 = vadd.f32 %v4475_v1, %v1255_v52  ;;  %v4477_v45 = vpop.f32.mrb[14].mxu1  ;;  %v4314_v14 = vpop.f32.mrb[15].mxu0 }
 0x405   :  { %v4485_v6 = vmax.f32 %v5183_v42, 0.0  ;;  %v4478_v46 = vpop.f32.mrb[15].mxu1  ;;  %v4486_v48 = vmax.f32 %v5184_v7, 0.0 }
 0x406   :  { %v4569_v47 = vmul.f32 %v4552_v17, %v4484_v44  ;;  %v4487_v50 = vmax.f32 %v5185_v31, 0.0 }
 0x407   :  { %v4570_v12 = vmul.f32 %v4556_v21, %v4485_v6  ;;  %v4571_v0 = vmul.f32 %v4560_v49, %v4486_v48 }
 0x408   :  { %v4576_v53 = vadd.f32 %v5647_v28, %v4569_v47  ;;  %v4572_v55 = vmul.f32 %v4564_v51, %v4487_v50 }
 0x40a   :  { %v4577_v36 = vadd.f32 %v4576_v53, %v4570_v12 }
 0x40c   :  { %v4578_v16 = vadd.f32 %v4577_v36, %v4571_v0 }
 0x40e   :  { %v4579_v56 = vadd.f32 %v4578_v16, %v4572_v55 }
 0x410   :  { %4580 = vadd.xlane.f32.xlu0 %v4579_v56 }
 0x49d   :  { %v4581_v3 = vpop.xlane.xlu0 %4580 }
 0x49e   :  { %v4589_v57 = vadd.f32 %v5177_v40, %v4581_v3 }
 0x4a0   :  { %v4590_v9 = vmax.f32 %v4589_v57, 0.0 }
 0x4a2   :  { %4592 = vst.msk [vmem:[%s5681_s7] sm:$0xff] %vm4591_vm0, %v4590_v9 }
 0x4a3   :  { %4597 = vsyncpa [#allocation4], 1 }
 0x4a4   :  { %4598 = vsyncpa [#allocation6], 1 }
 0x4a5   :  { %4599 = vsyncpa [#allocation9], 1 }
 0x4a6   :  { %4600 = vsyncpa [#allocation12], 1 }

</bundles_post_ra>
